<compile_context>
chip_gen: v5e
topology: v5e:2x2
jax: 0.10.0
libtpu: 0.0.40
codegen_flags: <defaults>
</compile_context>

<pallas_src>
import functools

import jax
import jax.numpy as jnp
from jax.experimental import pallas as pl
from jax.experimental.pallas import tpu as pltpu


_PAD = 5          # pad for kernel=11; the kernel=7 (pad=3) windows nest inside
_KERNELS = (7, 11)
_NPARAM = 18      # 3 modules x (hori_low, hori_high, vert_low, vert_high, gamma, beta)


def _spec_atte_kernel(x_ref, prm_ref, wc_ref, b_ref, out_ref,
                      wpad, hpad, tbuf, flat, acc, *, H, W):
    cb = pl.program_id(1)
    n_cb = pl.num_programs(1)

    x = x_ref[0].astype(jnp.float32)                       # (tc, H, W)

    def p(i):                                              # per-channel scalar, (tc, 1, 1)
        return prm_ref[i].astype(jnp.float32)

    # ---- reflection-pad x along W once (shared by kernel=7 and kernel=11) ----
    wpad[:, :, _PAD:_PAD + W] = x
    for j in range(1, _PAD + 1):
        wpad[:, :, _PAD - j:_PAD - j + 1] = x[:, :, j:j + 1]                   # left
        wpad[:, :, _PAD + W - 1 + j:_PAD + W + j] = x[:, :, W - 1 - j:W - j]   # right

    # Sliding W-sums: the 7-tap window (offsets 2..8 in the pad-5 buffer) nests
    # inside the 11-tap window (offsets 0..10), so sum11 reuses sum7.
    sum7 = wpad[:, :, 2:2 + W]
    for o in range(3, 9):
        sum7 = sum7 + wpad[:, :, o:o + W]
    sum11 = sum7
    for o in (0, 1, 9, 10):
        sum11 = sum11 + wpad[:, :, o:o + W]
    hori_l7 = sum7 * (1.0 / 7.0)
    hori_l11 = sum11 * (1.0 / 11.0)

    def slide_h(t, K):
        # AvgPool2d((K, 1), stride=1) over reflection-padded (along H) t.
        pad = K // 2
        hpad[:, _PAD:_PAD + H, :] = t
        for j in range(1, pad + 1):
            hpad[:, _PAD - j:_PAD - j + 1, :] = t[:, j:j + 1, :]
            hpad[:, _PAD + H - 1 + j:_PAD + H + j, :] = t[:, H - 1 - j:H - j, :]
        off = _PAD - pad
        s = hpad[:, off:off + H, :]
        for kk in range(1, K):
            s = s + hpad[:, off + kk:off + kk + H, :]
        return s * (1.0 / K)

    def strip(hori_l, base, pool_h):
        # Folded form of the PyTorch strip-attention body:
        #   hori_out = (hh+1)*x + (hl-hh-1)*hori_l
        #   vert_out = (vh+1)*hori_out + (vl-vh-1)*vert_l
        #   out      = beta*x + gamma*vert_out
        hl, hh, vl, vh, gamma, beta = (p(base + i) for i in range(6))
        hori_out = (hh + 1.0) * x + (hl - hh - 1.0) * hori_l
        vert_l = pool_h(hori_out)
        vert_out = (vh + 1.0) * hori_out + (vl - vh - 1.0) * vert_l
        return beta * x + gamma * vert_out

    g_out = strip(jnp.mean(x, axis=2, keepdims=True), 0,
                  lambda t: jnp.mean(t, axis=1, keepdims=True))
    l7_out = strip(hori_l7, 6, lambda t: slide_h(t, 7))
    l11_out = strip(hori_l11, 12, lambda t: slide_h(t, 11))

    # ---- repack (tc, H, W) -> lane-dense (tc, H*W) through VMEM scratch ----
    tbuf[...] = g_out + l7_out + l11_out
    for h in range(H):
        flat[:, h * W:(h + 1) * W] = tbuf[:, h, :]

    # ---- 1x1 conv: contract this channel block on the MXU and accumulate ----
    y = jnp.dot(wc_ref[...].astype(jnp.float32), flat[...],
                preferred_element_type=jnp.float32)          # (C, H*W)

    @pl.when(cb == 0)
    def _():
        acc[...] = b_ref[...].astype(jnp.float32) + y

    @pl.when(cb > 0)
    def _():
        acc[...] = acc[...] + y

    @pl.when(cb == n_cb - 1)
    def _():
        out_ref[0] = acc[...].astype(out_ref.dtype)


def _pick_block_c(C):
    # The conv-weight block (C, tc) needs tc to be a multiple of 128 or == C.
    for tc in (256, 128):
        if C % tc == 0:
            return tc
    return C


def spec_atte(x, strip_params, conv_w, conv_b, *, block_c=None):
    """SpecAtte forward pass.

    x            : (N, C, H, W) float32 (NCHW, same as the PyTorch module)
    strip_params : (18, C) rows = [hori_low, hori_high, vert_low, vert_high,
                   gamma, beta] for the global module, then the kernel=7 and
                   kernel=11 local modules (in that order).
    conv_w       : (C, C) 1x1 conv weight (out_ch, in_ch)
    conv_b       : (C,)   1x1 conv bias
    """
    N, C, H, W = x.shape
    assert strip_params.shape == (_NPARAM, C)
    assert conv_w.shape == (C, C) and conv_b.shape == (C,)
    # reflection padding for kernel=11 needs H, W >= pad + 1 = 6
    assert H > _PAD and W > _PAD, "SpecAtte needs H >= 6 and W >= 6"

    tc = block_c if block_c is not None else _pick_block_c(C)
    assert C % tc == 0 and (tc == C or tc % 128 == 0)

    kernel = functools.partial(_spec_atte_kernel, H=H, W=W)

    # Advisory cost estimate: 3 strip modules (pool taps + elementwise) + 1x1 conv.
    flops = int(N * C * H * W * (2 * sum(_KERNELS) + 36 + 2 * C))
    bytes_accessed = int(4 * (2 * N * C * H * W + C * C + (_NPARAM + 1) * C))

    out_flat = pl.pallas_call(
        kernel,
        out_shape=jax.ShapeDtypeStruct((N, C, H * W), x.dtype),
        grid_spec=pltpu.PrefetchScalarGridSpec(
            num_scalar_prefetch=0,
            grid=(N, C // tc),
            in_specs=[
                pl.BlockSpec((1, tc, H, W), lambda n, cb: (n, cb, 0, 0)),
                pl.BlockSpec((_NPARAM, tc, 1, 1), lambda n, cb: (0, cb, 0, 0)),
                pl.BlockSpec((C, tc), lambda n, cb: (0, cb)),
                pl.BlockSpec((C, 1), lambda n, cb: (0, 0)),
            ],
            out_specs=pl.BlockSpec((1, C, H * W), lambda n, cb: (n, 0, 0)),
            scratch_shapes=[
                pltpu.VMEM((tc, H, W + 2 * _PAD), jnp.float32),   # x padded along W
                pltpu.VMEM((tc, H + 2 * _PAD, W), jnp.float32),   # hori_out padded along H
                pltpu.VMEM((tc, H, W), jnp.float32),              # summed strip outputs
                pltpu.VMEM((tc, H * W), jnp.float32),             # lane-dense repack
                pltpu.VMEM((C, H * W), jnp.float32),              # f32 conv accumulator
            ],
        ),
        compiler_params=pltpu.CompilerParams(
            dimension_semantics=("parallel", "arbitrary"),
            vmem_limit_bytes=32 * 1024 * 1024,
        ),
        cost_estimate=pl.CostEstimate(
            flops=flops, transcendentals=0, bytes_accessed=bytes_accessed),
    )(x, strip_params.reshape(_NPARAM, C, 1, 1), conv_w, conv_b.reshape(C, 1))

    # (N, C, H*W) -> (N, C, H, W) is a free metadata reshape in the wrapper.
    return out_flat.reshape(N, C, H, W)


# ----------------------------- pure-JAX reference -----------------------------

def _ref_local_avg(t, K, axis):
    pad = K // 2
    cfg = [(0, 0)] * t.ndim
    cfg[axis] = (pad, pad)
    tp = jnp.pad(t, cfg, mode="reflect")
    acc = 0.0
    for kk in range(K):
        sl = [slice(None)] * t.ndim
        sl[axis] = slice(kk, kk + t.shape[axis])
        acc = acc + tp[tuple(sl)]
    return acc / K


def _ref_strip(x, prm, base, pool_w, pool_h):
    def pc(i):
        return prm[base + i].reshape(1, -1, 1, 1)

    hori_l = pool_w(x)
    hori_h = x - hori_l
    hori_out = pc(0) * hori_l + (pc(1) + 1.0) * hori_h
    vert_l = pool_h(hori_out)
    vert_h = hori_out - vert_l
    vert_out = pc(2) * vert_l + (pc(3) + 1.0) * vert_h
    return x * pc(5) + vert_out * pc(4)


def spec_atte_reference(x, prm, conv_w, conv_b):
    g = _ref_strip(x, prm, 0,
                   lambda t: jnp.mean(t, axis=3, keepdims=True),
                   lambda t: jnp.mean(t, axis=2, keepdims=True))
    l7 = _ref_strip(x, prm, 6,
                    lambda t: _ref_local_avg(t, 7, 3),
                    lambda t: _ref_local_avg(t, 7, 2))
    l11 = _ref_strip(x, prm, 12,
                     lambda t: _ref_local_avg(t, 11, 3),
                     lambda t: _ref_local_avg(t, 11, 2))
    t = g + l7 + l11
    return jnp.einsum("oc,nchw->nohw", conv_w, t) + conv_b.reshape(1, -1, 1, 1)


# ------------------------------------ test ------------------------------------

def _make_inputs(key, N, C, H, W):
    kx, kp, kw, kb = jax.random.split(key, 4)
    x = jax.random.normal(kx, (N, C, H, W), dtype=jnp.float32)
    # NOTE: the PyTorch module initialises the strip parameters to zeros/ones
    # (identity branches); use random values so the full math is exercised.
    prm = 0.5 * jax.random.normal(kp, (_NPARAM, C), dtype=jnp.float32)
    bound = 1.0 / (C ** 0.5)
    conv_w = jax.random.uniform(kw, (C, C), minval=-bound, maxval=bound,
                                dtype=jnp.float32)
    conv_b = jax.random.uniform(kb, (C,), minval=-bound, maxval=bound,
                                dtype=jnp.float32)
    return x, prm, conv_w, conv_b


if __name__ == "__main__":
    key = jax.random.PRNGKey(0)
    k1, k2 = jax.random.split(key)

    # small config consistent with the module: N=2, C=k=4, 16x16 spatial
    x, prm, conv_w, conv_b = _make_inputs(k1, 2, 4, 16, 16)
    out = jax.block_until_ready(spec_atte(x, prm, conv_w, conv_b))
    ref = spec_atte_reference(x, prm, conv_w, conv_b)
    assert out.shape == (2, 4, 16, 16)
    assert jnp.allclose(out, ref, atol=1e-4, rtol=1e-4), \
        float(jnp.max(jnp.abs(out - ref)))

    # larger channel count to exercise the channel-block reduction path
    x2, prm2, conv_w2, conv_b2 = _make_inputs(k2, 1, 256, 16, 16)
    out2 = jax.block_until_ready(
        spec_atte(x2, prm2, conv_w2, conv_b2, block_c=128))
    ref2 = spec_atte_reference(x2, prm2, conv_w2, conv_b2)
    assert jnp.allclose(out2, ref2, atol=1e-3, rtol=1e-3), \
        float(jnp.max(jnp.abs(out2 - ref2)))

    print("KERNEL_OK")
</pallas_src>

<mosaic_0001>
module attributes {stable_mosaic.version = 11 : i64} {
  func.func @_spec_atte_kernel(%arg0: i32, %arg1: i32, %arg2: memref<1x4x16x16xf32, #tpu.memory_space<vmem>>, %arg3: memref<18x4x1x1xf32, #tpu.memory_space<vmem>>, %arg4: memref<4x4xf32, #tpu.memory_space<vmem>>, %arg5: memref<4x1xf32, #tpu.memory_space<vmem>>, %arg6: memref<1x4x256xf32, #tpu.memory_space<vmem>>, %arg7: memref<4x16x26xf32, #tpu.memory_space<vmem>>, %arg8: memref<4x26x16xf32, #tpu.memory_space<vmem>>, %arg9: memref<4x16x16xf32, #tpu.memory_space<vmem>>, %arg10: memref<4x256xf32, #tpu.memory_space<vmem>>, %arg11: memref<4x256xf32, #tpu.memory_space<vmem>>) attributes {dimension_semantics = [#tpu.dimension_semantics<parallel>, #tpu.dimension_semantics<arbitrary>], iteration_bounds = array<i64: 2, 1>, scalar_prefetch = 0 : i64, scratch_operands = 5 : i64, tpu.core_type = #tpu.core_type<tc>, window_params = [{transform_indices = @transform_0, window_bounds = array<i64: 1, 4, 16, 16>}, {transform_indices = @transform_1, window_bounds = array<i64: 18, 4, 1, 1>}, {transform_indices = @transform_2, window_bounds = array<i64: 4, 4>}, {pipeline_mode = #tpu.pipeline_mode<synchronous>, transform_indices = @transform_3, window_bounds = array<i64: 4, 1>}, {transform_indices = @transform_4, window_bounds = array<i64: 1, 4, 256>}]} {
    %c0 = arith.constant 0 : index
    %c0_0 = arith.constant 0 : index
    %c0_1 = arith.constant 0 : index
    %c0_2 = arith.constant 0 : index
    %0 = vector.load %arg2[%c0, %c0_0, %c0_1, %c0_2] : memref<1x4x16x16xf32, #tpu.memory_space<vmem>>, vector<1x4x16x16xf32>
    %1 = vector.shape_cast %0 : vector<1x4x16x16xf32> to vector<4x16x16xf32>
    %c0_3 = arith.constant 0 : index
    %c0_4 = arith.constant 0 : index
    %c5 = arith.constant 5 : index
    %2 = vector.load %arg7[%c0_3, %c0_4, %c5] : memref<4x16x26xf32, #tpu.memory_space<vmem>>, vector<4x16x16xf32>
    tpu.vector_store %arg7[%c0_3, %c0_4, %c5], %1 {strides = array<i32>} : memref<4x16x26xf32, #tpu.memory_space<vmem>>, vector<4x16x16xf32>,
    %3 = vector.extract_strided_slice %1 {offsets = [0, 0, 1], sizes = [4, 16, 1], strides = [1, 1, 1]} : vector<4x16x16xf32> to vector<4x16x1xf32>
    %c0_5 = arith.constant 0 : index
    %c0_6 = arith.constant 0 : index
    %c4 = arith.constant 4 : index
    %4 = vector.load %arg7[%c0_5, %c0_6, %c4] : memref<4x16x26xf32, #tpu.memory_space<vmem>>, vector<4x16x1xf32>
    tpu.vector_store %arg7[%c0_5, %c0_6, %c4], %3 {strides = array<i32>} : memref<4x16x26xf32, #tpu.memory_space<vmem>>, vector<4x16x1xf32>,
    %5 = vector.extract_strided_slice %1 {offsets = [0, 0, 14], sizes = [4, 16, 1], strides = [1, 1, 1]} : vector<4x16x16xf32> to vector<4x16x1xf32>
    %c0_7 = arith.constant 0 : index
    %c0_8 = arith.constant 0 : index
    %c21 = arith.constant 21 : index
    %6 = vector.load %arg7[%c0_7, %c0_8, %c21] : memref<4x16x26xf32, #tpu.memory_space<vmem>>, vector<4x16x1xf32>
    tpu.vector_store %arg7[%c0_7, %c0_8, %c21], %5 {strides = array<i32>} : memref<4x16x26xf32, #tpu.memory_space<vmem>>, vector<4x16x1xf32>,
    %7 = vector.extract_strided_slice %1 {offsets = [0, 0, 2], sizes = [4, 16, 1], strides = [1, 1, 1]} : vector<4x16x16xf32> to vector<4x16x1xf32>
    %c0_9 = arith.constant 0 : index
    %c0_10 = arith.constant 0 : index
    %c3 = arith.constant 3 : index
    %8 = vector.load %arg7[%c0_9, %c0_10, %c3] : memref<4x16x26xf32, #tpu.memory_space<vmem>>, vector<4x16x1xf32>
    tpu.vector_store %arg7[%c0_9, %c0_10, %c3], %7 {strides = array<i32>} : memref<4x16x26xf32, #tpu.memory_space<vmem>>, vector<4x16x1xf32>,
    %9 = vector.extract_strided_slice %1 {offsets = [0, 0, 13], sizes = [4, 16, 1], strides = [1, 1, 1]} : vector<4x16x16xf32> to vector<4x16x1xf32>
    %c0_11 = arith.constant 0 : index
    %c0_12 = arith.constant 0 : index
    %c22 = arith.constant 22 : index
    %10 = vector.load %arg7[%c0_11, %c0_12, %c22] : memref<4x16x26xf32, #tpu.memory_space<vmem>>, vector<4x16x1xf32>
    tpu.vector_store %arg7[%c0_11, %c0_12, %c22], %9 {strides = array<i32>} : memref<4x16x26xf32, #tpu.memory_space<vmem>>, vector<4x16x1xf32>,
    %11 = vector.extract_strided_slice %1 {offsets = [0, 0, 3], sizes = [4, 16, 1], strides = [1, 1, 1]} : vector<4x16x16xf32> to vector<4x16x1xf32>
    %c0_13 = arith.constant 0 : index
    %c0_14 = arith.constant 0 : index
    %c2 = arith.constant 2 : index
    %12 = vector.load %arg7[%c0_13, %c0_14, %c2] : memref<4x16x26xf32, #tpu.memory_space<vmem>>, vector<4x16x1xf32>
    tpu.vector_store %arg7[%c0_13, %c0_14, %c2], %11 {strides = array<i32>} : memref<4x16x26xf32, #tpu.memory_space<vmem>>, vector<4x16x1xf32>,
    %13 = vector.extract_strided_slice %1 {offsets = [0, 0, 12], sizes = [4, 16, 1], strides = [1, 1, 1]} : vector<4x16x16xf32> to vector<4x16x1xf32>
    %c0_15 = arith.constant 0 : index
    %c0_16 = arith.constant 0 : index
    %c23 = arith.constant 23 : index
    %14 = vector.load %arg7[%c0_15, %c0_16, %c23] : memref<4x16x26xf32, #tpu.memory_space<vmem>>, vector<4x16x1xf32>
    tpu.vector_store %arg7[%c0_15, %c0_16, %c23], %13 {strides = array<i32>} : memref<4x16x26xf32, #tpu.memory_space<vmem>>, vector<4x16x1xf32>,
    %15 = vector.extract_strided_slice %1 {offsets = [0, 0, 4], sizes = [4, 16, 1], strides = [1, 1, 1]} : vector<4x16x16xf32> to vector<4x16x1xf32>
    %c0_17 = arith.constant 0 : index
    %c0_18 = arith.constant 0 : index
    %c1 = arith.constant 1 : index
    %16 = vector.load %arg7[%c0_17, %c0_18, %c1] : memref<4x16x26xf32, #tpu.memory_space<vmem>>, vector<4x16x1xf32>
    tpu.vector_store %arg7[%c0_17, %c0_18, %c1], %15 {strides = array<i32>} : memref<4x16x26xf32, #tpu.memory_space<vmem>>, vector<4x16x1xf32>,
    %17 = vector.extract_strided_slice %1 {offsets = [0, 0, 11], sizes = [4, 16, 1], strides = [1, 1, 1]} : vector<4x16x16xf32> to vector<4x16x1xf32>
    %c0_19 = arith.constant 0 : index
    %c0_20 = arith.constant 0 : index
    %c24 = arith.constant 24 : index
    %18 = vector.load %arg7[%c0_19, %c0_20, %c24] : memref<4x16x26xf32, #tpu.memory_space<vmem>>, vector<4x16x1xf32>
    tpu.vector_store %arg7[%c0_19, %c0_20, %c24], %17 {strides = array<i32>} : memref<4x16x26xf32, #tpu.memory_space<vmem>>, vector<4x16x1xf32>,
    %19 = vector.extract_strided_slice %1 {offsets = [0, 0, 5], sizes = [4, 16, 1], strides = [1, 1, 1]} : vector<4x16x16xf32> to vector<4x16x1xf32>
    %c0_21 = arith.constant 0 : index
    %c0_22 = arith.constant 0 : index
    %c0_23 = arith.constant 0 : index
    %20 = vector.load %arg7[%c0_21, %c0_22, %c0_23] : memref<4x16x26xf32, #tpu.memory_space<vmem>>, vector<4x16x1xf32>
    tpu.vector_store %arg7[%c0_21, %c0_22, %c0_23], %19 {strides = array<i32>} : memref<4x16x26xf32, #tpu.memory_space<vmem>>, vector<4x16x1xf32>,
    %21 = vector.extract_strided_slice %1 {offsets = [0, 0, 10], sizes = [4, 16, 1], strides = [1, 1, 1]} : vector<4x16x16xf32> to vector<4x16x1xf32>
    %c0_24 = arith.constant 0 : index
    %c0_25 = arith.constant 0 : index
    %c25 = arith.constant 25 : index
    %22 = vector.load %arg7[%c0_24, %c0_25, %c25] : memref<4x16x26xf32, #tpu.memory_space<vmem>>, vector<4x16x1xf32>
    tpu.vector_store %arg7[%c0_24, %c0_25, %c25], %21 {strides = array<i32>} : memref<4x16x26xf32, #tpu.memory_space<vmem>>, vector<4x16x1xf32>,
    %c0_26 = arith.constant 0 : index
    %c0_27 = arith.constant 0 : index
    %c2_28 = arith.constant 2 : index
    %23 = vector.load %arg7[%c0_26, %c0_27, %c2_28] : memref<4x16x26xf32, #tpu.memory_space<vmem>>, vector<4x16x16xf32>
    %c0_29 = arith.constant 0 : index
    %c0_30 = arith.constant 0 : index
    %c3_31 = arith.constant 3 : index
    %24 = vector.load %arg7[%c0_29, %c0_30, %c3_31] : memref<4x16x26xf32, #tpu.memory_space<vmem>>, vector<4x16x16xf32>
    %25 = arith.addf %23, %24 : vector<4x16x16xf32>
    %c0_32 = arith.constant 0 : index
    %c0_33 = arith.constant 0 : index
    %c4_34 = arith.constant 4 : index
    %26 = vector.load %arg7[%c0_32, %c0_33, %c4_34] : memref<4x16x26xf32, #tpu.memory_space<vmem>>, vector<4x16x16xf32>
    %27 = arith.addf %25, %26 : vector<4x16x16xf32>
    %c0_35 = arith.constant 0 : index
    %c0_36 = arith.constant 0 : index
    %c5_37 = arith.constant 5 : index
    %28 = vector.load %arg7[%c0_35, %c0_36, %c5_37] : memref<4x16x26xf32, #tpu.memory_space<vmem>>, vector<4x16x16xf32>
    %29 = arith.addf %27, %28 : vector<4x16x16xf32>
    %c0_38 = arith.constant 0 : index
    %c0_39 = arith.constant 0 : index
    %c6 = arith.constant 6 : index
    %30 = vector.load %arg7[%c0_38, %c0_39, %c6] : memref<4x16x26xf32, #tpu.memory_space<vmem>>, vector<4x16x16xf32>
    %31 = arith.addf %29, %30 : vector<4x16x16xf32>
    %c0_40 = arith.constant 0 : index
    %c0_41 = arith.constant 0 : index
    %c7 = arith.constant 7 : index
    %32 = vector.load %arg7[%c0_40, %c0_41, %c7] : memref<4x16x26xf32, #tpu.memory_space<vmem>>, vector<4x16x16xf32>
    %33 = arith.addf %31, %32 : vector<4x16x16xf32>
    %c0_42 = arith.constant 0 : index
    %c0_43 = arith.constant 0 : index
    %c8 = arith.constant 8 : index
    %34 = vector.load %arg7[%c0_42, %c0_43, %c8] : memref<4x16x26xf32, #tpu.memory_space<vmem>>, vector<4x16x16xf32>
    %35 = arith.addf %33, %34 : vector<4x16x16xf32>
    %c0_44 = arith.constant 0 : index
    %c0_45 = arith.constant 0 : index
    %c0_46 = arith.constant 0 : index
    %36 = vector.load %arg7[%c0_44, %c0_45, %c0_46] : memref<4x16x26xf32, #tpu.memory_space<vmem>>, vector<4x16x16xf32>
    %37 = arith.addf %35, %36 : vector<4x16x16xf32>
    %c0_47 = arith.constant 0 : index
    %c0_48 = arith.constant 0 : index
    %c1_49 = arith.constant 1 : index
    %38 = vector.load %arg7[%c0_47, %c0_48, %c1_49] : memref<4x16x26xf32, #tpu.memory_space<vmem>>, vector<4x16x16xf32>
    %39 = arith.addf %37, %38 : vector<4x16x16xf32>
    %c0_50 = arith.constant 0 : index
    %c0_51 = arith.constant 0 : index
    %c9 = arith.constant 9 : index
    %40 = vector.load %arg7[%c0_50, %c0_51, %c9] : memref<4x16x26xf32, #tpu.memory_space<vmem>>, vector<4x16x16xf32>
    %41 = arith.addf %39, %40 : vector<4x16x16xf32>
    %c0_52 = arith.constant 0 : index
    %c0_53 = arith.constant 0 : index
    %c10 = arith.constant 10 : index
    %42 = vector.load %arg7[%c0_52, %c0_53, %c10] : memref<4x16x26xf32, #tpu.memory_space<vmem>>, vector<4x16x16xf32>
    %43 = arith.addf %41, %42 : vector<4x16x16xf32>
    %cst = arith.constant 0.142857149 : f32
    %44 = vector.broadcast %cst : f32 to vector<4x16x16xf32>
    %45 = arith.mulf %35, %44 : vector<4x16x16xf32>
    %cst_54 = arith.constant 0.0909090936 : f32
    %46 = vector.broadcast %cst_54 : f32 to vector<4x16x16xf32>
    %47 = arith.mulf %43, %46 : vector<4x16x16xf32>
    %cst_55 = arith.constant dense<0.000000e+00> : vector<4x16xf32>
    %48 = vector.multi_reduction <add>, %1, %cst_55 [2] : vector<4x16x16xf32> to vector<4x16xf32>
    %49 = vector.shape_cast %48 : vector<4x16xf32> to vector<4x16x1xf32>
    %cst_56 = arith.constant 1.600000e+01 : f32
    %50 = vector.broadcast %cst_56 : f32 to vector<4x16x1xf32>
    %51 = arith.divf %49, %50 : vector<4x16x1xf32>
    %c0_57 = arith.constant 0 : index
    %c0_58 = arith.constant 0 : index
    %c0_59 = arith.constant 0 : index
    %c0_60 = arith.constant 0 : index
    %52 = vector.load %arg3[%c0_57, %c0_58, %c0_59, %c0_60] : memref<18x4x1x1xf32, #tpu.memory_space<vmem>>, vector<1x4x1x1xf32>
    %53 = vector.shape_cast %52 : vector<1x4x1x1xf32> to vector<4x1x1xf32>
    %c1_61 = arith.constant 1 : index
    %c0_62 = arith.constant 0 : index
    %c0_63 = arith.constant 0 : index
    %c0_64 = arith.constant 0 : index
    %54 = vector.load %arg3[%c1_61, %c0_62, %c0_63, %c0_64] : memref<18x4x1x1xf32, #tpu.memory_space<vmem>>, vector<1x4x1x1xf32>
    %55 = vector.shape_cast %54 : vector<1x4x1x1xf32> to vector<4x1x1xf32>
    %c2_65 = arith.constant 2 : index
    %c0_66 = arith.constant 0 : index
    %c0_67 = arith.constant 0 : index
    %c0_68 = arith.constant 0 : index
    %56 = vector.load %arg3[%c2_65, %c0_66, %c0_67, %c0_68] : memref<18x4x1x1xf32, #tpu.memory_space<vmem>>, vector<1x4x1x1xf32>
    %57 = vector.shape_cast %56 : vector<1x4x1x1xf32> to vector<4x1x1xf32>
    %c3_69 = arith.constant 3 : index
    %c0_70 = arith.constant 0 : index
    %c0_71 = arith.constant 0 : index
    %c0_72 = arith.constant 0 : index
    %58 = vector.load %arg3[%c3_69, %c0_70, %c0_71, %c0_72] : memref<18x4x1x1xf32, #tpu.memory_space<vmem>>, vector<1x4x1x1xf32>
    %59 = vector.shape_cast %58 : vector<1x4x1x1xf32> to vector<4x1x1xf32>
    %c4_73 = arith.constant 4 : index
    %c0_74 = arith.constant 0 : index
    %c0_75 = arith.constant 0 : index
    %c0_76 = arith.constant 0 : index
    %60 = vector.load %arg3[%c4_73, %c0_74, %c0_75, %c0_76] : memref<18x4x1x1xf32, #tpu.memory_space<vmem>>, vector<1x4x1x1xf32>
    %61 = vector.shape_cast %60 : vector<1x4x1x1xf32> to vector<4x1x1xf32>
    %c5_77 = arith.constant 5 : index
    %c0_78 = arith.constant 0 : index
    %c0_79 = arith.constant 0 : index
    %c0_80 = arith.constant 0 : index
    %62 = vector.load %arg3[%c5_77, %c0_78, %c0_79, %c0_80] : memref<18x4x1x1xf32, #tpu.memory_space<vmem>>, vector<1x4x1x1xf32>
    %63 = vector.shape_cast %62 : vector<1x4x1x1xf32> to vector<4x1x1xf32>
    %cst_81 = arith.constant 1.000000e+00 : f32
    %64 = vector.broadcast %cst_81 : f32 to vector<4x1x1xf32>
    %65 = arith.addf %55, %64 : vector<4x1x1xf32>
    %66 = vector.broadcast %65 : vector<4x1x1xf32> to vector<4x16x16xf32>
    %67 = arith.mulf %66, %1 : vector<4x16x16xf32>
    %68 = arith.subf %53, %55 : vector<4x1x1xf32>
    %cst_82 = arith.constant 1.000000e+00 : f32
    %69 = vector.broadcast %cst_82 : f32 to vector<4x1x1xf32>
    %70 = arith.subf %68, %69 : vector<4x1x1xf32>
    %71 = vector.broadcast %70 : vector<4x1x1xf32> to vector<4x16x1xf32>
    %72 = arith.mulf %71, %51 : vector<4x16x1xf32>
    %73 = vector.broadcast %72 : vector<4x16x1xf32> to vector<4x16x16xf32>
    %74 = arith.addf %67, %73 : vector<4x16x16xf32>
    %cst_83 = arith.constant dense<0.000000e+00> : vector<4x16xf32>
    %75 = vector.multi_reduction <add>, %74, %cst_83 [1] : vector<4x16x16xf32> to vector<4x16xf32>
    %76 = vector.shape_cast %75 : vector<4x16xf32> to vector<4x1x16xf32>
    %cst_84 = arith.constant 1.600000e+01 : f32
    %77 = vector.broadcast %cst_84 : f32 to vector<4x1x16xf32>
    %78 = arith.divf %76, %77 : vector<4x1x16xf32>
    %cst_85 = arith.constant 1.000000e+00 : f32
    %79 = vector.broadcast %cst_85 : f32 to vector<4x1x1xf32>
    %80 = arith.addf %59, %79 : vector<4x1x1xf32>
    %81 = vector.broadcast %80 : vector<4x1x1xf32> to vector<4x16x16xf32>
    %82 = arith.mulf %81, %74 : vector<4x16x16xf32>
    %83 = arith.subf %57, %59 : vector<4x1x1xf32>
    %cst_86 = arith.constant 1.000000e+00 : f32
    %84 = vector.broadcast %cst_86 : f32 to vector<4x1x1xf32>
    %85 = arith.subf %83, %84 : vector<4x1x1xf32>
    %86 = vector.broadcast %85 : vector<4x1x1xf32> to vector<4x1x16xf32>
    %87 = arith.mulf %86, %78 : vector<4x1x16xf32>
    %88 = vector.broadcast %87 : vector<4x1x16xf32> to vector<4x16x16xf32>
    %89 = arith.addf %82, %88 : vector<4x16x16xf32>
    %90 = vector.broadcast %63 : vector<4x1x1xf32> to vector<4x16x16xf32>
    %91 = arith.mulf %90, %1 : vector<4x16x16xf32>
    %92 = vector.broadcast %61 : vector<4x1x1xf32> to vector<4x16x16xf32>
    %93 = arith.mulf %92, %89 : vector<4x16x16xf32>
    %94 = arith.addf %91, %93 : vector<4x16x16xf32>
    %c6_87 = arith.constant 6 : index
    %c0_88 = arith.constant 0 : index
    %c0_89 = arith.constant 0 : index
    %c0_90 = arith.constant 0 : index
    %95 = vector.load %arg3[%c6_87, %c0_88, %c0_89, %c0_90] : memref<18x4x1x1xf32, #tpu.memory_space<vmem>>, vector<1x4x1x1xf32>
    %96 = vector.shape_cast %95 : vector<1x4x1x1xf32> to vector<4x1x1xf32>
    %c7_91 = arith.constant 7 : index
    %c0_92 = arith.constant 0 : index
    %c0_93 = arith.constant 0 : index
    %c0_94 = arith.constant 0 : index
    %97 = vector.load %arg3[%c7_91, %c0_92, %c0_93, %c0_94] : memref<18x4x1x1xf32, #tpu.memory_space<vmem>>, vector<1x4x1x1xf32>
    %98 = vector.shape_cast %97 : vector<1x4x1x1xf32> to vector<4x1x1xf32>
    %c8_95 = arith.constant 8 : index
    %c0_96 = arith.constant 0 : index
    %c0_97 = arith.constant 0 : index
    %c0_98 = arith.constant 0 : index
    %99 = vector.load %arg3[%c8_95, %c0_96, %c0_97, %c0_98] : memref<18x4x1x1xf32, #tpu.memory_space<vmem>>, vector<1x4x1x1xf32>
    %100 = vector.shape_cast %99 : vector<1x4x1x1xf32> to vector<4x1x1xf32>
    %c9_99 = arith.constant 9 : index
    %c0_100 = arith.constant 0 : index
    %c0_101 = arith.constant 0 : index
    %c0_102 = arith.constant 0 : index
    %101 = vector.load %arg3[%c9_99, %c0_100, %c0_101, %c0_102] : memref<18x4x1x1xf32, #tpu.memory_space<vmem>>, vector<1x4x1x1xf32>
    %102 = vector.shape_cast %101 : vector<1x4x1x1xf32> to vector<4x1x1xf32>
    %c10_103 = arith.constant 10 : index
    %c0_104 = arith.constant 0 : index
    %c0_105 = arith.constant 0 : index
    %c0_106 = arith.constant 0 : index
    %103 = vector.load %arg3[%c10_103, %c0_104, %c0_105, %c0_106] : memref<18x4x1x1xf32, #tpu.memory_space<vmem>>, vector<1x4x1x1xf32>
    %104 = vector.shape_cast %103 : vector<1x4x1x1xf32> to vector<4x1x1xf32>
    %c11 = arith.constant 11 : index
    %c0_107 = arith.constant 0 : index
    %c0_108 = arith.constant 0 : index
    %c0_109 = arith.constant 0 : index
    %105 = vector.load %arg3[%c11, %c0_107, %c0_108, %c0_109] : memref<18x4x1x1xf32, #tpu.memory_space<vmem>>, vector<1x4x1x1xf32>
    %106 = vector.shape_cast %105 : vector<1x4x1x1xf32> to vector<4x1x1xf32>
    %cst_110 = arith.constant 1.000000e+00 : f32
    %107 = vector.broadcast %cst_110 : f32 to vector<4x1x1xf32>
    %108 = arith.addf %98, %107 : vector<4x1x1xf32>
    %109 = vector.broadcast %108 : vector<4x1x1xf32> to vector<4x16x16xf32>
    %110 = arith.mulf %109, %1 : vector<4x16x16xf32>
    %111 = arith.subf %96, %98 : vector<4x1x1xf32>
    %cst_111 = arith.constant 1.000000e+00 : f32
    %112 = vector.broadcast %cst_111 : f32 to vector<4x1x1xf32>
    %113 = arith.subf %111, %112 : vector<4x1x1xf32>
    %114 = vector.broadcast %113 : vector<4x1x1xf32> to vector<4x16x16xf32>
    %115 = arith.mulf %114, %45 : vector<4x16x16xf32>
    %116 = arith.addf %110, %115 : vector<4x16x16xf32>
    %c0_112 = arith.constant 0 : index
    %c5_113 = arith.constant 5 : index
    %c0_114 = arith.constant 0 : index
    %117 = vector.load %arg8[%c0_112, %c5_113, %c0_114] : memref<4x26x16xf32, #tpu.memory_space<vmem>>, vector<4x16x16xf32>
    tpu.vector_store %arg8[%c0_112, %c5_113, %c0_114], %116 {strides = array<i32>} : memref<4x26x16xf32, #tpu.memory_space<vmem>>, vector<4x16x16xf32>,
    %118 = vector.extract_strided_slice %116 {offsets = [0, 1, 0], sizes = [4, 1, 16], strides = [1, 1, 1]} : vector<4x16x16xf32> to vector<4x1x16xf32>
    %c0_115 = arith.constant 0 : index
    %c4_116 = arith.constant 4 : index
    %c0_117 = arith.constant 0 : index
    %119 = vector.load %arg8[%c0_115, %c4_116, %c0_117] : memref<4x26x16xf32, #tpu.memory_space<vmem>>, vector<4x1x16xf32>
    tpu.vector_store %arg8[%c0_115, %c4_116, %c0_117], %118 {strides = array<i32>} : memref<4x26x16xf32, #tpu.memory_space<vmem>>, vector<4x1x16xf32>,
    %120 = vector.extract_strided_slice %116 {offsets = [0, 14, 0], sizes = [4, 1, 16], strides = [1, 1, 1]} : vector<4x16x16xf32> to vector<4x1x16xf32>
    %c0_118 = arith.constant 0 : index
    %c21_119 = arith.constant 21 : index
    %c0_120 = arith.constant 0 : index
    %121 = vector.load %arg8[%c0_118, %c21_119, %c0_120] : memref<4x26x16xf32, #tpu.memory_space<vmem>>, vector<4x1x16xf32>
    tpu.vector_store %arg8[%c0_118, %c21_119, %c0_120], %120 {strides = array<i32>} : memref<4x26x16xf32, #tpu.memory_space<vmem>>, vector<4x1x16xf32>,
    %122 = vector.extract_strided_slice %116 {offsets = [0, 2, 0], sizes = [4, 1, 16], strides = [1, 1, 1]} : vector<4x16x16xf32> to vector<4x1x16xf32>
    %c0_121 = arith.constant 0 : index
    %c3_122 = arith.constant 3 : index
    %c0_123 = arith.constant 0 : index
    %123 = vector.load %arg8[%c0_121, %c3_122, %c0_123] : memref<4x26x16xf32, #tpu.memory_space<vmem>>, vector<4x1x16xf32>
    tpu.vector_store %arg8[%c0_121, %c3_122, %c0_123], %122 {strides = array<i32>} : memref<4x26x16xf32, #tpu.memory_space<vmem>>, vector<4x1x16xf32>,
    %124 = vector.extract_strided_slice %116 {offsets = [0, 13, 0], sizes = [4, 1, 16], strides = [1, 1, 1]} : vector<4x16x16xf32> to vector<4x1x16xf32>
    %c0_124 = arith.constant 0 : index
    %c22_125 = arith.constant 22 : index
    %c0_126 = arith.constant 0 : index
    %125 = vector.load %arg8[%c0_124, %c22_125, %c0_126] : memref<4x26x16xf32, #tpu.memory_space<vmem>>, vector<4x1x16xf32>
    tpu.vector_store %arg8[%c0_124, %c22_125, %c0_126], %124 {strides = array<i32>} : memref<4x26x16xf32, #tpu.memory_space<vmem>>, vector<4x1x16xf32>,
    %126 = vector.extract_strided_slice %116 {offsets = [0, 3, 0], sizes = [4, 1, 16], strides = [1, 1, 1]} : vector<4x16x16xf32> to vector<4x1x16xf32>
    %c0_127 = arith.constant 0 : index
    %c2_128 = arith.constant 2 : index
    %c0_129 = arith.constant 0 : index
    %127 = vector.load %arg8[%c0_127, %c2_128, %c0_129] : memref<4x26x16xf32, #tpu.memory_space<vmem>>, vector<4x1x16xf32>
    tpu.vector_store %arg8[%c0_127, %c2_128, %c0_129], %126 {strides = array<i32>} : memref<4x26x16xf32, #tpu.memory_space<vmem>>, vector<4x1x16xf32>,
    %128 = vector.extract_strided_slice %116 {offsets = [0, 12, 0], sizes = [4, 1, 16], strides = [1, 1, 1]} : vector<4x16x16xf32> to vector<4x1x16xf32>
    %c0_130 = arith.constant 0 : index
    %c23_131 = arith.constant 23 : index
    %c0_132 = arith.constant 0 : index
    %129 = vector.load %arg8[%c0_130, %c23_131, %c0_132] : memref<4x26x16xf32, #tpu.memory_space<vmem>>, vector<4x1x16xf32>
    tpu.vector_store %arg8[%c0_130, %c23_131, %c0_132], %128 {strides = array<i32>} : memref<4x26x16xf32, #tpu.memory_space<vmem>>, vector<4x1x16xf32>,
    %c0_133 = arith.constant 0 : index
    %c2_134 = arith.constant 2 : index
    %c0_135 = arith.constant 0 : index
    %130 = vector.load %arg8[%c0_133, %c2_134, %c0_135] : memref<4x26x16xf32, #tpu.memory_space<vmem>>, vector<4x16x16xf32>
    %c0_136 = arith.constant 0 : index
    %c3_137 = arith.constant 3 : index
    %c0_138 = arith.constant 0 : index
    %131 = vector.load %arg8[%c0_136, %c3_137, %c0_138] : memref<4x26x16xf32, #tpu.memory_space<vmem>>, vector<4x16x16xf32>
    %132 = arith.addf %130, %131 : vector<4x16x16xf32>
    %c0_139 = arith.constant 0 : index
    %c4_140 = arith.constant 4 : index
    %c0_141 = arith.constant 0 : index
    %133 = vector.load %arg8[%c0_139, %c4_140, %c0_141] : memref<4x26x16xf32, #tpu.memory_space<vmem>>, vector<4x16x16xf32>
    %134 = arith.addf %132, %133 : vector<4x16x16xf32>
    %c0_142 = arith.constant 0 : index
    %c5_143 = arith.constant 5 : index
    %c0_144 = arith.constant 0 : index
    %135 = vector.load %arg8[%c0_142, %c5_143, %c0_144] : memref<4x26x16xf32, #tpu.memory_space<vmem>>, vector<4x16x16xf32>
    %136 = arith.addf %134, %135 : vector<4x16x16xf32>
    %c0_145 = arith.constant 0 : index
    %c6_146 = arith.constant 6 : index
    %c0_147 = arith.constant 0 : index
    %137 = vector.load %arg8[%c0_145, %c6_146, %c0_147] : memref<4x26x16xf32, #tpu.memory_space<vmem>>, vector<4x16x16xf32>
    %138 = arith.addf %136, %137 : vector<4x16x16xf32>
    %c0_148 = arith.constant 0 : index
    %c7_149 = arith.constant 7 : index
    %c0_150 = arith.constant 0 : index
    %139 = vector.load %arg8[%c0_148, %c7_149, %c0_150] : memref<4x26x16xf32, #tpu.memory_space<vmem>>, vector<4x16x16xf32>
    %140 = arith.addf %138, %139 : vector<4x16x16xf32>
    %c0_151 = arith.constant 0 : index
    %c8_152 = arith.constant 8 : index
    %c0_153 = arith.constant 0 : index
    %141 = vector.load %arg8[%c0_151, %c8_152, %c0_153] : memref<4x26x16xf32, #tpu.memory_space<vmem>>, vector<4x16x16xf32>
    %142 = arith.addf %140, %141 : vector<4x16x16xf32>
    %cst_154 = arith.constant 0.142857149 : f32
    %143 = vector.broadcast %cst_154 : f32 to vector<4x16x16xf32>
    %144 = arith.mulf %142, %143 : vector<4x16x16xf32>
    %cst_155 = arith.constant 1.000000e+00 : f32
    %145 = vector.broadcast %cst_155 : f32 to vector<4x1x1xf32>
    %146 = arith.addf %102, %145 : vector<4x1x1xf32>
    %147 = vector.broadcast %146 : vector<4x1x1xf32> to vector<4x16x16xf32>
    %148 = arith.mulf %147, %116 : vector<4x16x16xf32>
    %149 = arith.subf %100, %102 : vector<4x1x1xf32>
    %cst_156 = arith.constant 1.000000e+00 : f32
    %150 = vector.broadcast %cst_156 : f32 to vector<4x1x1xf32>
    %151 = arith.subf %149, %150 : vector<4x1x1xf32>
    %152 = vector.broadcast %151 : vector<4x1x1xf32> to vector<4x16x16xf32>
    %153 = arith.mulf %152, %144 : vector<4x16x16xf32>
    %154 = arith.addf %148, %153 : vector<4x16x16xf32>
    %155 = vector.broadcast %106 : vector<4x1x1xf32> to vector<4x16x16xf32>
    %156 = arith.mulf %155, %1 : vector<4x16x16xf32>
    %157 = vector.broadcast %104 : vector<4x1x1xf32> to vector<4x16x16xf32>
    %158 = arith.mulf %157, %154 : vector<4x16x16xf32>
    %159 = arith.addf %156, %158 : vector<4x16x16xf32>
    %c12 = arith.constant 12 : index
    %c0_157 = arith.constant 0 : index
    %c0_158 = arith.constant 0 : index
    %c0_159 = arith.constant 0 : index
    %160 = vector.load %arg3[%c12, %c0_157, %c0_158, %c0_159] : memref<18x4x1x1xf32, #tpu.memory_space<vmem>>, vector<1x4x1x1xf32>
    %161 = vector.shape_cast %160 : vector<1x4x1x1xf32> to vector<4x1x1xf32>
    %c13 = arith.constant 13 : index
    %c0_160 = arith.constant 0 : index
    %c0_161 = arith.constant 0 : index
    %c0_162 = arith.constant 0 : index
    %162 = vector.load %arg3[%c13, %c0_160, %c0_161, %c0_162] : memref<18x4x1x1xf32, #tpu.memory_space<vmem>>, vector<1x4x1x1xf32>
    %163 = vector.shape_cast %162 : vector<1x4x1x1xf32> to vector<4x1x1xf32>
    %c14 = arith.constant 14 : index
    %c0_163 = arith.constant 0 : index
    %c0_164 = arith.constant 0 : index
    %c0_165 = arith.constant 0 : index
    %164 = vector.load %arg3[%c14, %c0_163, %c0_164, %c0_165] : memref<18x4x1x1xf32, #tpu.memory_space<vmem>>, vector<1x4x1x1xf32>
    %165 = vector.shape_cast %164 : vector<1x4x1x1xf32> to vector<4x1x1xf32>
    %c15 = arith.constant 15 : index
    %c0_166 = arith.constant 0 : index
    %c0_167 = arith.constant 0 : index
    %c0_168 = arith.constant 0 : index
    %166 = vector.load %arg3[%c15, %c0_166, %c0_167, %c0_168] : memref<18x4x1x1xf32, #tpu.memory_space<vmem>>, vector<1x4x1x1xf32>
    %167 = vector.shape_cast %166 : vector<1x4x1x1xf32> to vector<4x1x1xf32>
    %c16 = arith.constant 16 : index
    %c0_169 = arith.constant 0 : index
    %c0_170 = arith.constant 0 : index
    %c0_171 = arith.constant 0 : index
    %168 = vector.load %arg3[%c16, %c0_169, %c0_170, %c0_171] : memref<18x4x1x1xf32, #tpu.memory_space<vmem>>, vector<1x4x1x1xf32>
    %169 = vector.shape_cast %168 : vector<1x4x1x1xf32> to vector<4x1x1xf32>
    %c17 = arith.constant 17 : index
    %c0_172 = arith.constant 0 : index
    %c0_173 = arith.constant 0 : index
    %c0_174 = arith.constant 0 : index
    %170 = vector.load %arg3[%c17, %c0_172, %c0_173, %c0_174] : memref<18x4x1x1xf32, #tpu.memory_space<vmem>>, vector<1x4x1x1xf32>
    %171 = vector.shape_cast %170 : vector<1x4x1x1xf32> to vector<4x1x1xf32>
    %cst_175 = arith.constant 1.000000e+00 : f32
    %172 = vector.broadcast %cst_175 : f32 to vector<4x1x1xf32>
    %173 = arith.addf %163, %172 : vector<4x1x1xf32>
    %174 = vector.broadcast %173 : vector<4x1x1xf32> to vector<4x16x16xf32>
    %175 = arith.mulf %174, %1 : vector<4x16x16xf32>
    %176 = arith.subf %161, %163 : vector<4x1x1xf32>
    %cst_176 = arith.constant 1.000000e+00 : f32
    %177 = vector.broadcast %cst_176 : f32 to vector<4x1x1xf32>
    %178 = arith.subf %176, %177 : vector<4x1x1xf32>
    %179 = vector.broadcast %178 : vector<4x1x1xf32> to vector<4x16x16xf32>
    %180 = arith.mulf %179, %47 : vector<4x16x16xf32>
    %181 = arith.addf %175, %180 : vector<4x16x16xf32>
    %c0_177 = arith.constant 0 : index
    %c5_178 = arith.constant 5 : index
    %c0_179 = arith.constant 0 : index
    %182 = vector.load %arg8[%c0_177, %c5_178, %c0_179] : memref<4x26x16xf32, #tpu.memory_space<vmem>>, vector<4x16x16xf32>
    tpu.vector_store %arg8[%c0_177, %c5_178, %c0_179], %181 {strides = array<i32>} : memref<4x26x16xf32, #tpu.memory_space<vmem>>, vector<4x16x16xf32>,
    %183 = vector.extract_strided_slice %181 {offsets = [0, 1, 0], sizes = [4, 1, 16], strides = [1, 1, 1]} : vector<4x16x16xf32> to vector<4x1x16xf32>
    %c0_180 = arith.constant 0 : index
    %c4_181 = arith.constant 4 : index
    %c0_182 = arith.constant 0 : index
    %184 = vector.load %arg8[%c0_180, %c4_181, %c0_182] : memref<4x26x16xf32, #tpu.memory_space<vmem>>, vector<4x1x16xf32>
    tpu.vector_store %arg8[%c0_180, %c4_181, %c0_182], %183 {strides = array<i32>} : memref<4x26x16xf32, #tpu.memory_space<vmem>>, vector<4x1x16xf32>,
    %185 = vector.extract_strided_slice %181 {offsets = [0, 14, 0], sizes = [4, 1, 16], strides = [1, 1, 1]} : vector<4x16x16xf32> to vector<4x1x16xf32>
    %c0_183 = arith.constant 0 : index
    %c21_184 = arith.constant 21 : index
    %c0_185 = arith.constant 0 : index
    %186 = vector.load %arg8[%c0_183, %c21_184, %c0_185] : memref<4x26x16xf32, #tpu.memory_space<vmem>>, vector<4x1x16xf32>
    tpu.vector_store %arg8[%c0_183, %c21_184, %c0_185], %185 {strides = array<i32>} : memref<4x26x16xf32, #tpu.memory_space<vmem>>, vector<4x1x16xf32>,
    %187 = vector.extract_strided_slice %181 {offsets = [0, 2, 0], sizes = [4, 1, 16], strides = [1, 1, 1]} : vector<4x16x16xf32> to vector<4x1x16xf32>
    %c0_186 = arith.constant 0 : index
    %c3_187 = arith.constant 3 : index
    %c0_188 = arith.constant 0 : index
    %188 = vector.load %arg8[%c0_186, %c3_187, %c0_188] : memref<4x26x16xf32, #tpu.memory_space<vmem>>, vector<4x1x16xf32>
    tpu.vector_store %arg8[%c0_186, %c3_187, %c0_188], %187 {strides = array<i32>} : memref<4x26x16xf32, #tpu.memory_space<vmem>>, vector<4x1x16xf32>,
    %189 = vector.extract_strided_slice %181 {offsets = [0, 13, 0], sizes = [4, 1, 16], strides = [1, 1, 1]} : vector<4x16x16xf32> to vector<4x1x16xf32>
    %c0_189 = arith.constant 0 : index
    %c22_190 = arith.constant 22 : index
    %c0_191 = arith.constant 0 : index
    %190 = vector.load %arg8[%c0_189, %c22_190, %c0_191] : memref<4x26x16xf32, #tpu.memory_space<vmem>>, vector<4x1x16xf32>
    tpu.vector_store %arg8[%c0_189, %c22_190, %c0_191], %189 {strides = array<i32>} : memref<4x26x16xf32, #tpu.memory_space<vmem>>, vector<4x1x16xf32>,
    %191 = vector.extract_strided_slice %181 {offsets = [0, 3, 0], sizes = [4, 1, 16], strides = [1, 1, 1]} : vector<4x16x16xf32> to vector<4x1x16xf32>
    %c0_192 = arith.constant 0 : index
    %c2_193 = arith.constant 2 : index
    %c0_194 = arith.constant 0 : index
    %192 = vector.load %arg8[%c0_192, %c2_193, %c0_194] : memref<4x26x16xf32, #tpu.memory_space<vmem>>, vector<4x1x16xf32>
    tpu.vector_store %arg8[%c0_192, %c2_193, %c0_194], %191 {strides = array<i32>} : memref<4x26x16xf32, #tpu.memory_space<vmem>>, vector<4x1x16xf32>,
    %193 = vector.extract_strided_slice %181 {offsets = [0, 12, 0], sizes = [4, 1, 16], strides = [1, 1, 1]} : vector<4x16x16xf32> to vector<4x1x16xf32>
    %c0_195 = arith.constant 0 : index
    %c23_196 = arith.constant 23 : index
    %c0_197 = arith.constant 0 : index
    %194 = vector.load %arg8[%c0_195, %c23_196, %c0_197] : memref<4x26x16xf32, #tpu.memory_space<vmem>>, vector<4x1x16xf32>
    tpu.vector_store %arg8[%c0_195, %c23_196, %c0_197], %193 {strides = array<i32>} : memref<4x26x16xf32, #tpu.memory_space<vmem>>, vector<4x1x16xf32>,
    %195 = vector.extract_strided_slice %181 {offsets = [0, 4, 0], sizes = [4, 1, 16], strides = [1, 1, 1]} : vector<4x16x16xf32> to vector<4x1x16xf32>
    %c0_198 = arith.constant 0 : index
    %c1_199 = arith.constant 1 : index
    %c0_200 = arith.constant 0 : index
    %196 = vector.load %arg8[%c0_198, %c1_199, %c0_200] : memref<4x26x16xf32, #tpu.memory_space<vmem>>, vector<4x1x16xf32>
    tpu.vector_store %arg8[%c0_198, %c1_199, %c0_200], %195 {strides = array<i32>} : memref<4x26x16xf32, #tpu.memory_space<vmem>>, vector<4x1x16xf32>,
    %197 = vector.extract_strided_slice %181 {offsets = [0, 11, 0], sizes = [4, 1, 16], strides = [1, 1, 1]} : vector<4x16x16xf32> to vector<4x1x16xf32>
    %c0_201 = arith.constant 0 : index
    %c24_202 = arith.constant 24 : index
    %c0_203 = arith.constant 0 : index
    %198 = vector.load %arg8[%c0_201, %c24_202, %c0_203] : memref<4x26x16xf32, #tpu.memory_space<vmem>>, vector<4x1x16xf32>
    tpu.vector_store %arg8[%c0_201, %c24_202, %c0_203], %197 {strides = array<i32>} : memref<4x26x16xf32, #tpu.memory_space<vmem>>, vector<4x1x16xf32>,
    %199 = vector.extract_strided_slice %181 {offsets = [0, 5, 0], sizes = [4, 1, 16], strides = [1, 1, 1]} : vector<4x16x16xf32> to vector<4x1x16xf32>
    %c0_204 = arith.constant 0 : index
    %c0_205 = arith.constant 0 : index
    %c0_206 = arith.constant 0 : index
    %200 = vector.load %arg8[%c0_204, %c0_205, %c0_206] : memref<4x26x16xf32, #tpu.memory_space<vmem>>, vector<4x1x16xf32>
    tpu.vector_store %arg8[%c0_204, %c0_205, %c0_206], %199 {strides = array<i32>} : memref<4x26x16xf32, #tpu.memory_space<vmem>>, vector<4x1x16xf32>,
    %201 = vector.extract_strided_slice %181 {offsets = [0, 10, 0], sizes = [4, 1, 16], strides = [1, 1, 1]} : vector<4x16x16xf32> to vector<4x1x16xf32>
    %c0_207 = arith.constant 0 : index
    %c25_208 = arith.constant 25 : index
    %c0_209 = arith.constant 0 : index
    %202 = vector.load %arg8[%c0_207, %c25_208, %c0_209] : memref<4x26x16xf32, #tpu.memory_space<vmem>>, vector<4x1x16xf32>
    tpu.vector_store %arg8[%c0_207, %c25_208, %c0_209], %201 {strides = array<i32>} : memref<4x26x16xf32, #tpu.memory_space<vmem>>, vector<4x1x16xf32>,
    %c0_210 = arith.constant 0 : index
    %c0_211 = arith.constant 0 : index
    %c0_212 = arith.constant 0 : index
    %203 = vector.load %arg8[%c0_210, %c0_211, %c0_212] : memref<4x26x16xf32, #tpu.memory_space<vmem>>, vector<4x16x16xf32>
    %c0_213 = arith.constant 0 : index
    %c1_214 = arith.constant 1 : index
    %c0_215 = arith.constant 0 : index
    %204 = vector.load %arg8[%c0_213, %c1_214, %c0_215] : memref<4x26x16xf32, #tpu.memory_space<vmem>>, vector<4x16x16xf32>
    %205 = arith.addf %203, %204 : vector<4x16x16xf32>
    %c0_216 = arith.constant 0 : index
    %c2_217 = arith.constant 2 : index
    %c0_218 = arith.constant 0 : index
    %206 = vector.load %arg8[%c0_216, %c2_217, %c0_218] : memref<4x26x16xf32, #tpu.memory_space<vmem>>, vector<4x16x16xf32>
    %207 = arith.addf %205, %206 : vector<4x16x16xf32>
    %c0_219 = arith.constant 0 : index
    %c3_220 = arith.constant 3 : index
    %c0_221 = arith.constant 0 : index
    %208 = vector.load %arg8[%c0_219, %c3_220, %c0_221] : memref<4x26x16xf32, #tpu.memory_space<vmem>>, vector<4x16x16xf32>
    %209 = arith.addf %207, %208 : vector<4x16x16xf32>
    %c0_222 = arith.constant 0 : index
    %c4_223 = arith.constant 4 : index
    %c0_224 = arith.constant 0 : index
    %210 = vector.load %arg8[%c0_222, %c4_223, %c0_224] : memref<4x26x16xf32, #tpu.memory_space<vmem>>, vector<4x16x16xf32>
    %211 = arith.addf %209, %210 : vector<4x16x16xf32>
    %c0_225 = arith.constant 0 : index
    %c5_226 = arith.constant 5 : index
    %c0_227 = arith.constant 0 : index
    %212 = vector.load %arg8[%c0_225, %c5_226, %c0_227] : memref<4x26x16xf32, #tpu.memory_space<vmem>>, vector<4x16x16xf32>
    %213 = arith.addf %211, %212 : vector<4x16x16xf32>
    %c0_228 = arith.constant 0 : index
    %c6_229 = arith.constant 6 : index
    %c0_230 = arith.constant 0 : index
    %214 = vector.load %arg8[%c0_228, %c6_229, %c0_230] : memref<4x26x16xf32, #tpu.memory_space<vmem>>, vector<4x16x16xf32>
    %215 = arith.addf %213, %214 : vector<4x16x16xf32>
    %c0_231 = arith.constant 0 : index
    %c7_232 = arith.constant 7 : index
    %c0_233 = arith.constant 0 : index
    %216 = vector.load %arg8[%c0_231, %c7_232, %c0_233] : memref<4x26x16xf32, #tpu.memory_space<vmem>>, vector<4x16x16xf32>
    %217 = arith.addf %215, %216 : vector<4x16x16xf32>
    %c0_234 = arith.constant 0 : index
    %c8_235 = arith.constant 8 : index
    %c0_236 = arith.constant 0 : index
    %218 = vector.load %arg8[%c0_234, %c8_235, %c0_236] : memref<4x26x16xf32, #tpu.memory_space<vmem>>, vector<4x16x16xf32>
    %219 = arith.addf %217, %218 : vector<4x16x16xf32>
    %c0_237 = arith.constant 0 : index
    %c9_238 = arith.constant 9 : index
    %c0_239 = arith.constant 0 : index
    %220 = vector.load %arg8[%c0_237, %c9_238, %c0_239] : memref<4x26x16xf32, #tpu.memory_space<vmem>>, vector<4x16x16xf32>
    %221 = arith.addf %219, %220 : vector<4x16x16xf32>
    %c0_240 = arith.constant 0 : index
    %c10_241 = arith.constant 10 : index
    %c0_242 = arith.constant 0 : index
    %222 = vector.load %arg8[%c0_240, %c10_241, %c0_242] : memref<4x26x16xf32, #tpu.memory_space<vmem>>, vector<4x16x16xf32>
    %223 = arith.addf %221, %222 : vector<4x16x16xf32>
    %cst_243 = arith.constant 0.0909090936 : f32
    %224 = vector.broadcast %cst_243 : f32 to vector<4x16x16xf32>
    %225 = arith.mulf %223, %224 : vector<4x16x16xf32>
    %cst_244 = arith.constant 1.000000e+00 : f32
    %226 = vector.broadcast %cst_244 : f32 to vector<4x1x1xf32>
    %227 = arith.addf %167, %226 : vector<4x1x1xf32>
    %228 = vector.broadcast %227 : vector<4x1x1xf32> to vector<4x16x16xf32>
    %229 = arith.mulf %228, %181 : vector<4x16x16xf32>
    %230 = arith.subf %165, %167 : vector<4x1x1xf32>
    %cst_245 = arith.constant 1.000000e+00 : f32
    %231 = vector.broadcast %cst_245 : f32 to vector<4x1x1xf32>
    %232 = arith.subf %230, %231 : vector<4x1x1xf32>
    %233 = vector.broadcast %232 : vector<4x1x1xf32> to vector<4x16x16xf32>
    %234 = arith.mulf %233, %225 : vector<4x16x16xf32>
    %235 = arith.addf %229, %234 : vector<4x16x16xf32>
    %236 = vector.broadcast %171 : vector<4x1x1xf32> to vector<4x16x16xf32>
    %237 = arith.mulf %236, %1 : vector<4x16x16xf32>
    %238 = vector.broadcast %169 : vector<4x1x1xf32> to vector<4x16x16xf32>
    %239 = arith.mulf %238, %235 : vector<4x16x16xf32>
    %240 = arith.addf %237, %239 : vector<4x16x16xf32>
    %241 = arith.addf %94, %159 : vector<4x16x16xf32>
    %242 = arith.addf %241, %240 : vector<4x16x16xf32>
    %c0_246 = arith.constant 0 : index
    %c0_247 = arith.constant 0 : index
    %c0_248 = arith.constant 0 : index
    %243 = vector.load %arg9[%c0_246, %c0_247, %c0_248] : memref<4x16x16xf32, #tpu.memory_space<vmem>>, vector<4x16x16xf32>
    tpu.vector_store %arg9[%c0_246, %c0_247, %c0_248], %242 {strides = array<i32>} : memref<4x16x16xf32, #tpu.memory_space<vmem>>, vector<4x16x16xf32>,
    %c0_249 = arith.constant 0 : index
    %c0_250 = arith.constant 0 : index
    %c0_251 = arith.constant 0 : index
    %244 = vector.load %arg9[%c0_249, %c0_250, %c0_251] : memref<4x16x16xf32, #tpu.memory_space<vmem>>, vector<4x1x16xf32>
    %245 = vector.shape_cast %244 : vector<4x1x16xf32> to vector<4x16xf32>
    %c0_252 = arith.constant 0 : index
    %c0_253 = arith.constant 0 : index
    %246 = vector.load %arg10[%c0_252, %c0_253] : memref<4x256xf32, #tpu.memory_space<vmem>>, vector<4x16xf32>
    tpu.vector_store %arg10[%c0_252, %c0_253], %245 {strides = array<i32>} : memref<4x256xf32, #tpu.memory_space<vmem>>, vector<4x16xf32>,
    %c0_254 = arith.constant 0 : index
    %c1_255 = arith.constant 1 : index
    %c0_256 = arith.constant 0 : index
    %247 = vector.load %arg9[%c0_254, %c1_255, %c0_256] : memref<4x16x16xf32, #tpu.memory_space<vmem>>, vector<4x1x16xf32>
    %248 = vector.shape_cast %247 : vector<4x1x16xf32> to vector<4x16xf32>
    %c0_257 = arith.constant 0 : index
    %c16_258 = arith.constant 16 : index
    %249 = vector.load %arg10[%c0_257, %c16_258] : memref<4x256xf32, #tpu.memory_space<vmem>>, vector<4x16xf32>
    tpu.vector_store %arg10[%c0_257, %c16_258], %248 {strides = array<i32>} : memref<4x256xf32, #tpu.memory_space<vmem>>, vector<4x16xf32>,
    %c0_259 = arith.constant 0 : index
    %c2_260 = arith.constant 2 : index
    %c0_261 = arith.constant 0 : index
    %250 = vector.load %arg9[%c0_259, %c2_260, %c0_261] : memref<4x16x16xf32, #tpu.memory_space<vmem>>, vector<4x1x16xf32>
    %251 = vector.shape_cast %250 : vector<4x1x16xf32> to vector<4x16xf32>
    %c0_262 = arith.constant 0 : index
    %c32 = arith.constant 32 : index
    %252 = vector.load %arg10[%c0_262, %c32] : memref<4x256xf32, #tpu.memory_space<vmem>>, vector<4x16xf32>
    tpu.vector_store %arg10[%c0_262, %c32], %251 {strides = array<i32>} : memref<4x256xf32, #tpu.memory_space<vmem>>, vector<4x16xf32>,
    %c0_263 = arith.constant 0 : index
    %c3_264 = arith.constant 3 : index
    %c0_265 = arith.constant 0 : index
    %253 = vector.load %arg9[%c0_263, %c3_264, %c0_265] : memref<4x16x16xf32, #tpu.memory_space<vmem>>, vector<4x1x16xf32>
    %254 = vector.shape_cast %253 : vector<4x1x16xf32> to vector<4x16xf32>
    %c0_266 = arith.constant 0 : index
    %c48 = arith.constant 48 : index
    %255 = vector.load %arg10[%c0_266, %c48] : memref<4x256xf32, #tpu.memory_space<vmem>>, vector<4x16xf32>
    tpu.vector_store %arg10[%c0_266, %c48], %254 {strides = array<i32>} : memref<4x256xf32, #tpu.memory_space<vmem>>, vector<4x16xf32>,
    %c0_267 = arith.constant 0 : index
    %c4_268 = arith.constant 4 : index
    %c0_269 = arith.constant 0 : index
    %256 = vector.load %arg9[%c0_267, %c4_268, %c0_269] : memref<4x16x16xf32, #tpu.memory_space<vmem>>, vector<4x1x16xf32>
    %257 = vector.shape_cast %256 : vector<4x1x16xf32> to vector<4x16xf32>
    %c0_270 = arith.constant 0 : index
    %c64 = arith.constant 64 : index
    %258 = vector.load %arg10[%c0_270, %c64] : memref<4x256xf32, #tpu.memory_space<vmem>>, vector<4x16xf32>
    tpu.vector_store %arg10[%c0_270, %c64], %257 {strides = array<i32>} : memref<4x256xf32, #tpu.memory_space<vmem>>, vector<4x16xf32>,
    %c0_271 = arith.constant 0 : index
    %c5_272 = arith.constant 5 : index
    %c0_273 = arith.constant 0 : index
    %259 = vector.load %arg9[%c0_271, %c5_272, %c0_273] : memref<4x16x16xf32, #tpu.memory_space<vmem>>, vector<4x1x16xf32>
    %260 = vector.shape_cast %259 : vector<4x1x16xf32> to vector<4x16xf32>
    %c0_274 = arith.constant 0 : index
    %c80 = arith.constant 80 : index
    %261 = vector.load %arg10[%c0_274, %c80] : memref<4x256xf32, #tpu.memory_space<vmem>>, vector<4x16xf32>
    tpu.vector_store %arg10[%c0_274, %c80], %260 {strides = array<i32>} : memref<4x256xf32, #tpu.memory_space<vmem>>, vector<4x16xf32>,
    %c0_275 = arith.constant 0 : index
    %c6_276 = arith.constant 6 : index
    %c0_277 = arith.constant 0 : index
    %262 = vector.load %arg9[%c0_275, %c6_276, %c0_277] : memref<4x16x16xf32, #tpu.memory_space<vmem>>, vector<4x1x16xf32>
    %263 = vector.shape_cast %262 : vector<4x1x16xf32> to vector<4x16xf32>
    %c0_278 = arith.constant 0 : index
    %c96 = arith.constant 96 : index
    %264 = vector.load %arg10[%c0_278, %c96] : memref<4x256xf32, #tpu.memory_space<vmem>>, vector<4x16xf32>
    tpu.vector_store %arg10[%c0_278, %c96], %263 {strides = array<i32>} : memref<4x256xf32, #tpu.memory_space<vmem>>, vector<4x16xf32>,
    %c0_279 = arith.constant 0 : index
    %c7_280 = arith.constant 7 : index
    %c0_281 = arith.constant 0 : index
    %265 = vector.load %arg9[%c0_279, %c7_280, %c0_281] : memref<4x16x16xf32, #tpu.memory_space<vmem>>, vector<4x1x16xf32>
    %266 = vector.shape_cast %265 : vector<4x1x16xf32> to vector<4x16xf32>
    %c0_282 = arith.constant 0 : index
    %c112 = arith.constant 112 : index
    %267 = vector.load %arg10[%c0_282, %c112] : memref<4x256xf32, #tpu.memory_space<vmem>>, vector<4x16xf32>
    tpu.vector_store %arg10[%c0_282, %c112], %266 {strides = array<i32>} : memref<4x256xf32, #tpu.memory_space<vmem>>, vector<4x16xf32>,
    %c0_283 = arith.constant 0 : index
    %c8_284 = arith.constant 8 : index
    %c0_285 = arith.constant 0 : index
    %268 = vector.load %arg9[%c0_283, %c8_284, %c0_285] : memref<4x16x16xf32, #tpu.memory_space<vmem>>, vector<4x1x16xf32>
    %269 = vector.shape_cast %268 : vector<4x1x16xf32> to vector<4x16xf32>
    %c0_286 = arith.constant 0 : index
    %c128 = arith.constant 128 : index
    %270 = vector.load %arg10[%c0_286, %c128] : memref<4x256xf32, #tpu.memory_space<vmem>>, vector<4x16xf32>
    tpu.vector_store %arg10[%c0_286, %c128], %269 {strides = array<i32>} : memref<4x256xf32, #tpu.memory_space<vmem>>, vector<4x16xf32>,
    %c0_287 = arith.constant 0 : index
    %c9_288 = arith.constant 9 : index
    %c0_289 = arith.constant 0 : index
    %271 = vector.load %arg9[%c0_287, %c9_288, %c0_289] : memref<4x16x16xf32, #tpu.memory_space<vmem>>, vector<4x1x16xf32>
    %272 = vector.shape_cast %271 : vector<4x1x16xf32> to vector<4x16xf32>
    %c0_290 = arith.constant 0 : index
    %c144 = arith.constant 144 : index
    %273 = vector.load %arg10[%c0_290, %c144] : memref<4x256xf32, #tpu.memory_space<vmem>>, vector<4x16xf32>
    tpu.vector_store %arg10[%c0_290, %c144], %272 {strides = array<i32>} : memref<4x256xf32, #tpu.memory_space<vmem>>, vector<4x16xf32>,
    %c0_291 = arith.constant 0 : index
    %c10_292 = arith.constant 10 : index
    %c0_293 = arith.constant 0 : index
    %274 = vector.load %arg9[%c0_291, %c10_292, %c0_293] : memref<4x16x16xf32, #tpu.memory_space<vmem>>, vector<4x1x16xf32>
    %275 = vector.shape_cast %274 : vector<4x1x16xf32> to vector<4x16xf32>
    %c0_294 = arith.constant 0 : index
    %c160 = arith.constant 160 : index
    %276 = vector.load %arg10[%c0_294, %c160] : memref<4x256xf32, #tpu.memory_space<vmem>>, vector<4x16xf32>
    tpu.vector_store %arg10[%c0_294, %c160], %275 {strides = array<i32>} : memref<4x256xf32, #tpu.memory_space<vmem>>, vector<4x16xf32>,
    %c0_295 = arith.constant 0 : index
    %c11_296 = arith.constant 11 : index
    %c0_297 = arith.constant 0 : index
    %277 = vector.load %arg9[%c0_295, %c11_296, %c0_297] : memref<4x16x16xf32, #tpu.memory_space<vmem>>, vector<4x1x16xf32>
    %278 = vector.shape_cast %277 : vector<4x1x16xf32> to vector<4x16xf32>
    %c0_298 = arith.constant 0 : index
    %c176 = arith.constant 176 : index
    %279 = vector.load %arg10[%c0_298, %c176] : memref<4x256xf32, #tpu.memory_space<vmem>>, vector<4x16xf32>
    tpu.vector_store %arg10[%c0_298, %c176], %278 {strides = array<i32>} : memref<4x256xf32, #tpu.memory_space<vmem>>, vector<4x16xf32>,
    %c0_299 = arith.constant 0 : index
    %c12_300 = arith.constant 12 : index
    %c0_301 = arith.constant 0 : index
    %280 = vector.load %arg9[%c0_299, %c12_300, %c0_301] : memref<4x16x16xf32, #tpu.memory_space<vmem>>, vector<4x1x16xf32>
    %281 = vector.shape_cast %280 : vector<4x1x16xf32> to vector<4x16xf32>
    %c0_302 = arith.constant 0 : index
    %c192 = arith.constant 192 : index
    %282 = vector.load %arg10[%c0_302, %c192] : memref<4x256xf32, #tpu.memory_space<vmem>>, vector<4x16xf32>
    tpu.vector_store %arg10[%c0_302, %c192], %281 {strides = array<i32>} : memref<4x256xf32, #tpu.memory_space<vmem>>, vector<4x16xf32>,
    %c0_303 = arith.constant 0 : index
    %c13_304 = arith.constant 13 : index
    %c0_305 = arith.constant 0 : index
    %283 = vector.load %arg9[%c0_303, %c13_304, %c0_305] : memref<4x16x16xf32, #tpu.memory_space<vmem>>, vector<4x1x16xf32>
    %284 = vector.shape_cast %283 : vector<4x1x16xf32> to vector<4x16xf32>
    %c0_306 = arith.constant 0 : index
    %c208 = arith.constant 208 : index
    %285 = vector.load %arg10[%c0_306, %c208] : memref<4x256xf32, #tpu.memory_space<vmem>>, vector<4x16xf32>
    tpu.vector_store %arg10[%c0_306, %c208], %284 {strides = array<i32>} : memref<4x256xf32, #tpu.memory_space<vmem>>, vector<4x16xf32>,
    %c0_307 = arith.constant 0 : index
    %c14_308 = arith.constant 14 : index
    %c0_309 = arith.constant 0 : index
    %286 = vector.load %arg9[%c0_307, %c14_308, %c0_309] : memref<4x16x16xf32, #tpu.memory_space<vmem>>, vector<4x1x16xf32>
    %287 = vector.shape_cast %286 : vector<4x1x16xf32> to vector<4x16xf32>
    %c0_310 = arith.constant 0 : index
    %c224 = arith.constant 224 : index
    %288 = vector.load %arg10[%c0_310, %c224] : memref<4x256xf32, #tpu.memory_space<vmem>>, vector<4x16xf32>
    tpu.vector_store %arg10[%c0_310, %c224], %287 {strides = array<i32>} : memref<4x256xf32, #tpu.memory_space<vmem>>, vector<4x16xf32>,
    %c0_311 = arith.constant 0 : index
    %c15_312 = arith.constant 15 : index
    %c0_313 = arith.constant 0 : index
    %289 = vector.load %arg9[%c0_311, %c15_312, %c0_313] : memref<4x16x16xf32, #tpu.memory_space<vmem>>, vector<4x1x16xf32>
    %290 = vector.shape_cast %289 : vector<4x1x16xf32> to vector<4x16xf32>
    %c0_314 = arith.constant 0 : index
    %c240 = arith.constant 240 : index
    %291 = vector.load %arg10[%c0_314, %c240] : memref<4x256xf32, #tpu.memory_space<vmem>>, vector<4x16xf32>
    tpu.vector_store %arg10[%c0_314, %c240], %290 {strides = array<i32>} : memref<4x256xf32, #tpu.memory_space<vmem>>, vector<4x16xf32>,
    %c0_315 = arith.constant 0 : index
    %c0_316 = arith.constant 0 : index
    %292 = vector.load %arg4[%c0_315, %c0_316] : memref<4x4xf32, #tpu.memory_space<vmem>>, vector<4x4xf32>
    %c0_317 = arith.constant 0 : index
    %c0_318 = arith.constant 0 : index
    %293 = vector.load %arg10[%c0_317, %c0_318] : memref<4x256xf32, #tpu.memory_space<vmem>>, vector<4x256xf32>
    %cst_319 = arith.constant dense<0.000000e+00> : vector<4x256xf32>
    %294 = tpu.matmul %292, %293, %cst_319 {dimension_numbers = #tpu.dot_dimension_numbers<[1], [0], [0], [1], [0, 0, 1, 1], [], []>} : vector<4x4xf32>, vector<4x256xf32>, vector<4x256xf32> -> vector<4x256xf32>
    %c0_i32 = arith.constant 0 : i32
    %295 = arith.cmpi eq, %arg1, %c0_i32 : i32
    %296 = arith.extui %295 : i1 to i32
    %c0_i32_320 = arith.constant 0 : i32
    %297 = arith.cmpi ne, %296, %c0_i32_320 : i32
    scf.if %297 {
      %c0_325 = arith.constant 0 : index
      %c0_326 = arith.constant 0 : index
      %304 = vector.load %arg5[%c0_325, %c0_326] : memref<4x1xf32, #tpu.memory_space<vmem>>, vector<4x1xf32>
      %305 = vector.broadcast %304 : vector<4x1xf32> to vector<4x256xf32>
      %306 = arith.addf %305, %294 : vector<4x256xf32>
      %c0_327 = arith.constant 0 : index
      %c0_328 = arith.constant 0 : index
      %307 = vector.load %arg11[%c0_327, %c0_328] : memref<4x256xf32, #tpu.memory_space<vmem>>, vector<4x256xf32>
      tpu.vector_store %arg11[%c0_327, %c0_328], %306 {strides = array<i32>} : memref<4x256xf32, #tpu.memory_space<vmem>>, vector<4x256xf32>,
    } else {
    }
    %c0_i32_321 = arith.constant 0 : i32
    %298 = arith.cmpi sgt, %arg1, %c0_i32_321 : i32
    %299 = arith.extui %298 : i1 to i32
    %c0_i32_322 = arith.constant 0 : i32
    %300 = arith.cmpi ne, %299, %c0_i32_322 : i32
    scf.if %300 {
      %c0_325 = arith.constant 0 : index
      %c0_326 = arith.constant 0 : index
      %304 = vector.load %arg11[%c0_325, %c0_326] : memref<4x256xf32, #tpu.memory_space<vmem>>, vector<4x256xf32>
      %305 = arith.addf %304, %294 : vector<4x256xf32>
      %c0_327 = arith.constant 0 : index
      %c0_328 = arith.constant 0 : index
      %306 = vector.load %arg11[%c0_327, %c0_328] : memref<4x256xf32, #tpu.memory_space<vmem>>, vector<4x256xf32>
      tpu.vector_store %arg11[%c0_327, %c0_328], %305 {strides = array<i32>} : memref<4x256xf32, #tpu.memory_space<vmem>>, vector<4x256xf32>,
    } else {
    }
    %c0_i32_323 = arith.constant 0 : i32
    %301 = arith.cmpi eq, %arg1, %c0_i32_323 : i32
    %302 = arith.extui %301 : i1 to i32
    %c0_i32_324 = arith.constant 0 : i32
    %303 = arith.cmpi ne, %302, %c0_i32_324 : i32
    scf.if %303 {
      %c0_325 = arith.constant 0 : index
      %c0_326 = arith.constant 0 : index
      %304 = vector.load %arg11[%c0_325, %c0_326] : memref<4x256xf32, #tpu.memory_space<vmem>>, vector<4x256xf32>
      %c0_327 = arith.constant 0 : index
      %c0_328 = arith.constant 0 : index
      %c0_329 = arith.constant 0 : index
      %305 = vector.load %arg6[%c0_327, %c0_328, %c0_329] : memref<1x4x256xf32, #tpu.memory_space<vmem>>, vector<1x4x256xf32>
      %306 = vector.shape_cast %305 : vector<1x4x256xf32> to vector<4x256xf32>
      %307 = vector.shape_cast %304 : vector<4x256xf32> to vector<1x4x256xf32>
      tpu.vector_store %arg6[%c0_327, %c0_328, %c0_329], %307 {strides = array<i32>} : memref<1x4x256xf32, #tpu.memory_space<vmem>>, vector<1x4x256xf32>,
    } else {
    }
    return
  }
  func.func @transform_0(%arg0: i32, %arg1: i32) -> (i32, i32, i32, i32) {
    %c0_i32 = arith.constant 0 : i32
    %c0_i32_0 = arith.constant 0 : i32
    %c0_i32_1 = arith.constant 0 : i32
    return %arg0, %arg1, %c0_i32, %c0_i32_0 : i32, i32, i32, i32
  }
  func.func @transform_1(%arg0: i32, %arg1: i32) -> (i32, i32, i32, i32) {
    %c0_i32 = arith.constant 0 : i32
    %c0_i32_0 = arith.constant 0 : i32
    %c0_i32_1 = arith.constant 0 : i32
    %c0_i32_2 = arith.constant 0 : i32
    return %c0_i32, %arg1, %c0_i32_0, %c0_i32_1 : i32, i32, i32, i32
  }
  func.func @transform_2(%arg0: i32, %arg1: i32) -> (i32, i32) {
    %c0_i32 = arith.constant 0 : i32
    %c0_i32_0 = arith.constant 0 : i32
    return %c0_i32, %arg1 : i32, i32
  }
  func.func @transform_3(%arg0: i32, %arg1: i32) -> (i32, i32) {
    %c0_i32 = arith.constant 0 : i32
    %c0_i32_0 = arith.constant 0 : i32
    %c0_i32_1 = arith.constant 0 : i32
    return %c0_i32, %c0_i32_0 : i32, i32
  }
  func.func @transform_4(%arg0: i32, %arg1: i32) -> (i32, i32, i32) {
    %c0_i32 = arith.constant 0 : i32
    %c0_i32_0 = arith.constant 0 : i32
    %c0_i32_1 = arith.constant 0 : i32
    return %arg0, %c0_i32, %c0_i32_0 : i32, i32, i32
  }
}

</mosaic_0001>

<bundles_post_ra>
// kernel: tpu_custom_call.1
= control target key start
LH: loop header
LB: loop body
LE: loop exit
PB: predicated region body
PF: predicated region fallthrough
CT: control target
= control target key end

     0   :  { %9 = vsyncpa [#allocation8], 0  ;;  %s5089_s0 = inlined_call_operand.hbm [shape: f32[2,4,16,16], index: 0, kind: input, shape index: {}]   ;;  %s5090_s1 = inlined_call_operand.vmem [shape: f32[18,4,1,1], index: 1, kind: input, shape index: {}]   ;;  %s5091_s2 = inlined_call_operand.vmem [shape: f32[4,4], index: 2, kind: input, shape index: {}]   ;;  %s5092_s3 = inlined_call_operand.vmem [shape: f32[4,1], index: 3, kind: input, shape index: {}]   ;;  %s5093_s4 = inlined_call_operand.hbm [shape: f32[2,4,256], index: 4, kind: output, shape index: {}]  }
   0x1   :  { %11 = vsyncpa [#allocation8 + $0x1], 0 }
   0x2   :  { %12 = vsyncpa [#allocation9], 0 }
   0x3   :  { %14 = vsyncpa [#allocation9 + $0x1], 0  ;;  %s3344_s15 = smov 0   ;;  %s3346_s16 = smov 0  }
   0x4   :  { %s3348_s17 = smov 0   ;;  %s3350_s18 = smov 0  }
   0x5   :  { %s3352_s19 = smov 0   ;;  %s3354_s20 = smov 0  }
   0x6 LB: > { %s2927_s21 = sadd.s32 4294967295, %s3289_s20   ;;  %s2928_s22 = sadd.s32 4294967294, %s3289_s20   ;;  %s3289_s20 = sphi %s3354_s20, %s20_s20   ;;  %s3285_s19 = sphi %s3352_s19, %s5227_s19   ;;  %s3281_s18 = sphi %s3350_s18, %s5226_s18   ;;  %s3277_s17 = sphi %s3348_s17, %s5225_s17   ;;  %s3273_s16 = sphi %s3346_s16, %s5224_s16   ;;  %s3269_s15 = sphi %s3344_s15, %s5223_s15  }
   0x7   : > { %s32_s23 = sadd.s32 1, %s3285_s19  ;;  %s41_s24 = sadd.s32 1, %s3277_s17 }
   0x8   : > { %p34_p0 = scmp.ge.s32.totalorder %s32_s23, 2  ;;  %p48_p1 = scmp.ne.s32.totalorder %s3277_s17, %s3273_s16 }
   0x9   : > { %p49_p2 = scmp.eq.s32.totalorder %s3289_s20, 0  ;;  %p54_p3 = scmp.ne.s32.totalorder %s3273_s16, %s3269_s15 }
   0xa   : > { %s5229_s23 = smov (%p34_p0, %s32_s23), 0  ;;  %p55_p5 = scmp.eq.s32.totalorder %s2927_s21, 0 }
   0xb   : > { %p3385_p4 = por %p49_p2, %p48_p1  ;;  %s36_s26 = ssub.s32 %s3285_s19, %s5229_s23 }
   0xc   : > { %p151_p6 = scmp.eq.s32.totalorder %s2927_s21, 1  ;;  %p39_p7 = scmp.eq.s32.totalorder %s36_s26, 0 }
   0xd   : > { %p3391_p8 = por %p55_p5, %p54_p3  ;;  %p157_p10 = scmp.eq.s32.totalorder %s2928_s22, 1 }
   0xe   : > { %p3395_p9 = por %p151_p6, %p48_p1  ;;  %p2932_p12 = scmp.ge.s32.totalorder %s3289_s20, 2 }
   0xf   : > { %s3400_s29 = scalar_select %p39_p7, %s3277_s17, %s41_s24  }
  0x10   : > { %p3402_p11 = por %p157_p10, %p54_p3  ;;  %p3054_p13 = scmp.lt.s32.totalorder %s3289_s20, 2 }
  0x11   : > { %s195_s5 = sand.u32 1, %s3277_s17   ;;  %s3040_s7 = sshll.u32 %s3285_s19, 6 }
  0x12   : > { %s2933_s6 = sshll.u32 %s195_s5, 6  ;;  %s207_s10 = scalar_lea.hbm %s5089_s0, %s3040_s7 }
  0x13   : > { %s199_s11 = scalar_lea.vmem [#allocation7], %s2933_s6  ;;  %s208_s13 = sshll.u32 %s207_s10, 4  ;;  %s209_s13 = int_to_ptr.hbm [resolvable:$true] %s208_s13 }
  0x14   : > { %s210_s12 = sshll.u32 %s199_s11, 4  ;;  %p3047_p0 = pnand %p3054_p13, %p3385_p4  ;;  %s211_s12 = int_to_ptr.vmem [resolvable:$true] %s210_s12 }
  0x15   : > { %p2936_p1 = scmp.ge.s32.totalorder %s3289_s20, 1  ;;  %s196_s14 = scalar_lea.sflag [#allocation8], %s195_s5 }
  0x16   : > { %s3291_s21 = smov 128   ;;  %s3292_s22 = smov 8  }
  0x17   : > { %3049 = dma.hbm_to_vmem [thread:$0]  (!%p3047_p0), %s209_s13, 1024, %s211_s12, %s196_s14, %s3291_s21, %s3291_s21, %s3292_s22  }
  0x18   : > { %p218_p2 = scmp.lt.s32.totalorder %s3289_s20, 3 }
  0x1a   : > { %p219_p3 = pnand %p2936_p1, %p218_p2 }
  0x1c   : > { %222 = sbr.rel (%p219_p3) target bundleno = 1570 (0x622), region = 36 }
  0x21   : > { %s3418_s24 = sand.u32 1, %s3273_s16  }
  0x22   : > { %s2937_s26 = sshll.u32 %s3418_s24, 6  ;;  %s225_s6 = scalar_lea.sflag [#allocation8], %s3418_s24 }
  0x23   : > { %s3422_s7 = scalar_lea.vmem [#allocation7], %s2937_s26 }
  0x24   : > { %3260 = dma.done.wait (%p3391_p8), %s225_s6, 1024  }
  0x25   : > { %3262 = vsyncadd (%p3391_p8), %s225_s6, 4294966272  ;;  %v3429_v0 = vld [vmem:[%s3422_s7 + $0x10] sm:$0xff]  ;;  %v3432_v1 = vld [vmem:[%s3422_s7] sm:$0xff]  ;;  %s3293_s25 = smov 5   ;;  %s3294_s27 = smov 3   ;;  %vm312_vm0 = vcmask 171048  }
  0x26   : > { %292 = vrot.lane.b32.xlu1 %v3429_v0, %s3293_s25  ;;  %288 = vrot.lane.b32.xlu0 %v3432_v1, %s3293_s25  ;;  %v3437_v2 = vld [vmem:[%s3422_s7 + $0x20] sm:$0xff]  ;;  %v3441_v3 = vld [vmem:[%s3422_s7 + $0x18] sm:$0xff]  ;;  %s3295_s5 = smov 7   ;;  %s3296_s8 = smov 1   ;;  %vm345_vm1 = vcmask 39968   ;;  %vm378_vm2 = vcmask 179368  }
  0x27   : > { %296 = vrot.lane.b32.xlu2 %v3437_v2, %s3293_s25  ;;  %v3444_v4 = vld [vmem:[%s3422_s7 + $0x8] sm:$0xff]  ;;  %v3453_v6 = vld [vmem:[%s3422_s7 + $0x38] sm:$0xff]  ;;  %v3456_v7 = vld [vmem:[%s3422_s7 + $0x30] sm:$0xff]  ;;  %s3297_s9 = smov 9   ;;  %s3298_s10 = smov 127   ;;  %vm411_vm3 = vcmask 31768  }
  0x28   : > { %v3447_v5 = vld [vmem:[%s3422_s7 + $0x28] sm:$0xff]  ;;  %5129 = vst [vmem:[#allocation13_spill] sm:$0xff] %v3453_v6  ;;  %s3299_s11 = smov 11   ;;  %s3300_s12 = smov 125   ;;  %vm444_vm4 = vcmask 187568   ;;  %vm477_vm5 = vcmask 23568  }
  0x29   : > { %s3301_s13 = smov 13   ;;  %s3302_s14 = smov 123   ;;  %vm510_vm6 = vcmask 195768   ;;  %vm543_vm7 = vcmask 15368   ;;  %vm576_vm8 = vcmask 203968   ;;  %vm609_vm9 = vcmask 7168  }
  0x2a   : > { %s3303_s21 = smov 15   ;;  %vm642_vm10 = vcmask 212168   ;;  %s3304_s22 = smov 126   ;;  %vm1003_vm11 = vcmask 130048   ;;  %vm1535_vm13 = vcmask 129030   ;;  %vm1545_vm14 = vcmask 128005  }
  0x2b   : > { %s3305_s26 = smov 124   ;;  %s3306_s6 = smov 122   ;;  %vm1555_vm15 = vcmask 126980  }
  0x2e   : > { %294 = vrot.lane.b32.xlu1 %v3441_v3, %s3293_s25  ;;  %290 = vrot.lane.b32.xlu0 %v3444_v4, %s3293_s25 }
  0x2f   : > { %298 = vrot.lane.b32.xlu2 %v3447_v5, %s3293_s25 }
  0x36   : > { %302 = vrot.lane.b32.xlu1 %v3453_v6, %s3293_s25  ;;  %300 = vrot.lane.b32.xlu0 %v3456_v7, %s3293_s25  ;;  %s3307_s25 = smov 2  }
  0x37   : > { %321 = vrot.lane.b32.xlu2 %v3432_v1, %s3294_s27 }
  0x3e   : > { %325 = vrot.lane.b32.xlu1 %v3429_v0, %s3294_s27  ;;  %323 = vrot.lane.b32.xlu0 %v3444_v4, %s3294_s27 }
  0x3f   : > { %327 = vrot.lane.b32.xlu2 %v3441_v3, %s3294_s27 }
  0x46   : > { %331 = vrot.lane.b32.xlu1 %v3447_v5, %s3294_s27  ;;  %329 = vrot.lane.b32.xlu0 %v3437_v2, %s3294_s27 }
  0x47   : > { %333 = vrot.lane.b32.xlu2 %v3456_v7, %s3294_s27 }
  0x4e   : > { %354 = vrot.lane.b32.xlu1 %v3432_v1, %s3295_s5  ;;  %335 = vrot.lane.b32.xlu0 %v3453_v6, %s3294_s27  ;;  %s3308_s27 = smov 121  }
  0x4f   : > { %356 = vrot.lane.b32.xlu2 %v3444_v4, %s3295_s5 }
  0x56   : > { %360 = vrot.lane.b32.xlu1 %v3441_v3, %s3295_s5  ;;  %358 = vrot.lane.b32.xlu0 %v3429_v0, %s3295_s5 }
  0x57   : > { %362 = vrot.lane.b32.xlu2 %v3437_v2, %s3295_s5 }
  0x5e   : > { %366 = vrot.lane.b32.xlu1 %v3456_v7, %s3295_s5  ;;  %364 = vrot.lane.b32.xlu0 %v3447_v5, %s3295_s5 }
  0x5f   : > { %368 = vrot.lane.b32.xlu2 %v3453_v6, %s3295_s5  ;;  %s3309_s5 = smov 120  }
  0x66   : > { %389 = vrot.lane.b32.xlu1 %v3444_v4, %s3296_s8  ;;  %387 = vrot.lane.b32.xlu0 %v3432_v1, %s3296_s8 }
  0x67   : > { %391 = vrot.lane.b32.xlu2 %v3429_v0, %s3296_s8 }
  0x6e   : > { %395 = vrot.lane.b32.xlu1 %v3437_v2, %s3296_s8  ;;  %393 = vrot.lane.b32.xlu0 %v3441_v3, %s3296_s8 }
  0x6f   : > { %397 = vrot.lane.b32.xlu2 %v3447_v5, %s3296_s8 }
  0x76   : > { %401 = vrot.lane.b32.xlu1 %v3453_v6, %s3296_s8  ;;  %399 = vrot.lane.b32.xlu0 %v3456_v7, %s3296_s8 }
  0x77   : > { %420 = vrot.lane.b32.xlu2 %v3432_v1, %s3297_s9 }
  0x7e   : > { %424 = vrot.lane.b32.xlu1 %v3429_v0, %s3297_s9  ;;  %422 = vrot.lane.b32.xlu0 %v3444_v4, %s3297_s9 }
  0x7f   : > { %426 = vrot.lane.b32.xlu2 %v3441_v3, %s3297_s9 }
  0x81   : > { %v297_v8 = vpop.permute.xlu2 %296 }
  0x82   : > { %317 = vst.msk [vmem:[#allocation2 + $0x20] sm:$0xff] %vm312_vm0, %v297_v8 }
  0x86   : > { %430 = vrot.lane.b32.xlu1 %v3447_v5, %s3297_s9  ;;  %428 = vrot.lane.b32.xlu0 %v3437_v2, %s3297_s9 }
  0x87   : > { %432 = vrot.lane.b32.xlu2 %v3456_v7, %s3297_s9 }
  0x89   : > { %v299_v9 = vpop.permute.xlu2 %298 }
  0x8a   : > { %318 = vst.msk [vmem:[#allocation2 + $0x28] sm:$0xff] %vm312_vm0, %v299_v9 }
  0x8e   : > { %453 = vrot.lane.b32.xlu1 %v3432_v1, %s3298_s10  ;;  %434 = vrot.lane.b32.xlu0 %v3453_v6, %s3297_s9 }
  0x8f   : > { %455 = vrot.lane.b32.xlu2 %v3444_v4, %s3298_s10 }
  0x91   : > { %v322_v10 = vpop.permute.xlu2 %321 }
  0x96   : > { %459 = vrot.lane.b32.xlu1 %v3441_v3, %s3298_s10  ;;  %457 = vrot.lane.b32.xlu0 %v3429_v0, %s3298_s10 }
  0x97   : > { %461 = vrot.lane.b32.xlu2 %v3437_v2, %s3298_s10 }
  0x98   : > { %v293_v11 = vpop.permute.xlu1 %292  ;;  %v289_v12 = vpop.permute.xlu0 %288 }
  0x99   : > { %315 = vst.msk [vmem:[#allocation2 + $0x10] sm:$0xff] %vm312_vm0, %v293_v11  ;;  %v328_v13 = vpop.permute.xlu2 %327 }
  0x9a   : > { %313 = vst.msk [vmem:[#allocation2] sm:$0xff] %vm312_vm0, %v289_v12 }
  0x9b   : > { %346 = vst.msk [vmem:[#allocation2] sm:$0xff] %vm345_vm1, %v322_v10 }
  0x9e   : > { %465 = vrot.lane.b32.xlu1 %v3456_v7, %s3298_s10  ;;  %463 = vrot.lane.b32.xlu0 %v3447_v5, %s3298_s10 }
  0x9f   : > { %467 = vrot.lane.b32.xlu2 %v3453_v6, %s3298_s10 }
  0xa0   : > { %v295_v14 = vpop.permute.xlu1 %294  ;;  %v291_v15 = vpop.permute.xlu0 %290 }
  0xa1   : > { %316 = vst.msk [vmem:[#allocation2 + $0x18] sm:$0xff] %vm312_vm0, %v295_v14  ;;  %v334_v16 = vpop.permute.xlu2 %333 }
  0xa2   : > { %314 = vst.msk [vmem:[#allocation2 + $0x8] sm:$0xff] %vm312_vm0, %v291_v15 }
  0xa3   : > { %349 = vst.msk [vmem:[#allocation2 + $0x18] sm:$0xff] %vm345_vm1, %v328_v13 }
  0xa6   : > { %488 = vrot.lane.b32.xlu1 %v3444_v4, %s3299_s11  ;;  %486 = vrot.lane.b32.xlu0 %v3432_v1, %s3299_s11 }
  0xa7   : > { %490 = vrot.lane.b32.xlu2 %v3429_v0, %s3299_s11 }
  0xa8   : > { %v303_v17 = vpop.permute.xlu1 %302  ;;  %v301_v18 = vpop.permute.xlu0 %300 }
  0xa9   : > { %320 = vst.msk [vmem:[#allocation2 + $0x38] sm:$0xff] %vm312_vm0, %v303_v17  ;;  %v357_v19 = vpop.permute.xlu2 %356 }
  0xaa   : > { %319 = vst.msk [vmem:[#allocation2 + $0x30] sm:$0xff] %vm312_vm0, %v301_v18  ;;  %vm1530_vm0 = vcmask 123905  }
  0xab   : > { %352 = vst.msk [vmem:[#allocation2 + $0x30] sm:$0xff] %vm345_vm1, %v334_v16 }
  0xae   : > { %494 = vrot.lane.b32.xlu1 %v3437_v2, %s3299_s11  ;;  %492 = vrot.lane.b32.xlu0 %v3441_v3, %s3299_s11 }
  0xaf   : > { %496 = vrot.lane.b32.xlu2 %v3447_v5, %s3299_s11 }
  0xb0   : > { %v326_v20 = vpop.permute.xlu1 %325  ;;  %v324_v21 = vpop.permute.xlu0 %323 }
  0xb1   : > { %348 = vst.msk [vmem:[#allocation2 + $0x10] sm:$0xff] %vm345_vm1, %v326_v20  ;;  %v363_v22 = vpop.permute.xlu2 %362 }
  0xb2   : > { %347 = vst.msk [vmem:[#allocation2 + $0x8] sm:$0xff] %vm345_vm1, %v324_v21 }
  0xb3   : > { %380 = vst.msk [vmem:[#allocation2 + $0x8] sm:$0xff] %vm378_vm2, %v357_v19 }
  0xb6   : > { %500 = vrot.lane.b32.xlu1 %v3453_v6, %s3299_s11  ;;  %498 = vrot.lane.b32.xlu0 %v3456_v7, %s3299_s11  ;;  %s3318_s11 = smov 112  }
  0xb7   : > { %519 = vrot.lane.b32.xlu2 %v3432_v1, %s3300_s12 }
  0xb8   : > { %v332_v23 = vpop.permute.xlu1 %331  ;;  %v330_v24 = vpop.permute.xlu0 %329 }
  0xb9   : > { %351 = vst.msk [vmem:[#allocation2 + $0x28] sm:$0xff] %vm345_vm1, %v332_v23  ;;  %v369_v25 = vpop.permute.xlu2 %368 }
  0xba   : > { %350 = vst.msk [vmem:[#allocation2 + $0x20] sm:$0xff] %vm345_vm1, %v330_v24 }
  0xbb   : > { %383 = vst.msk [vmem:[#allocation2 + $0x20] sm:$0xff] %vm378_vm2, %v363_v22 }
  0xbe   : > { %523 = vrot.lane.b32.xlu1 %v3429_v0, %s3300_s12  ;;  %521 = vrot.lane.b32.xlu0 %v3444_v4, %s3300_s12 }
  0xbf   : > { %525 = vrot.lane.b32.xlu2 %v3441_v3, %s3300_s12 }
  0xc0   : > { %v355_v26 = vpop.permute.xlu1 %354  ;;  %v336_v27 = vpop.permute.xlu0 %335 }
  0xc1   : > { %379 = vst.msk [vmem:[#allocation2] sm:$0xff] %vm378_vm2, %v355_v26  ;;  %v392_v28 = vpop.permute.xlu2 %391 }
  0xc2   : > { %353 = vst.msk [vmem:[#allocation2 + $0x38] sm:$0xff] %vm345_vm1, %v336_v27  ;;  %vm1540_vm1 = vcmask 124930  }
  0xc3   : > { %386 = vst.msk [vmem:[#allocation2 + $0x38] sm:$0xff] %vm378_vm2, %v369_v25 }
  0xc6   : > { %529 = vrot.lane.b32.xlu1 %v3447_v5, %s3300_s12  ;;  %527 = vrot.lane.b32.xlu0 %v3437_v2, %s3300_s12 }
  0xc7   : > { %531 = vrot.lane.b32.xlu2 %v3456_v7, %s3300_s12 }
  0xc8   : > { %v361_v29 = vpop.permute.xlu1 %360  ;;  %v359_v30 = vpop.permute.xlu0 %358 }
  0xc9   : > { %382 = vst.msk [vmem:[#allocation2 + $0x18] sm:$0xff] %vm378_vm2, %v361_v29  ;;  %v398_v31 = vpop.permute.xlu2 %397 }
  0xca   : > { %381 = vst.msk [vmem:[#allocation2 + $0x10] sm:$0xff] %vm378_vm2, %v359_v30 }
  0xcb   : > { %414 = vst.msk [vmem:[#allocation2 + $0x10] sm:$0xff] %vm411_vm3, %v392_v28 }
  0xce   : > { %552 = vrot.lane.b32.xlu1 %v3432_v1, %s3301_s13  ;;  %533 = vrot.lane.b32.xlu0 %v3453_v6, %s3300_s12 }
  0xcf   : > { %554 = vrot.lane.b32.xlu2 %v3444_v4, %s3301_s13 }
  0xd0   : > { %v367_v32 = vpop.permute.xlu1 %366  ;;  %v365_v33 = vpop.permute.xlu0 %364 }
  0xd1   : > { %385 = vst.msk [vmem:[#allocation2 + $0x30] sm:$0xff] %vm378_vm2, %v367_v32  ;;  %v421_v34 = vpop.permute.xlu2 %420 }
  0xd2   : > { %384 = vst.msk [vmem:[#allocation2 + $0x28] sm:$0xff] %vm378_vm2, %v365_v33  ;;  %vm1550_vm2 = vcmask 125955  }
  0xd3   : > { %417 = vst.msk [vmem:[#allocation2 + $0x28] sm:$0xff] %vm411_vm3, %v398_v31 }
  0xd6   : > { %558 = vrot.lane.b32.xlu1 %v3441_v3, %s3301_s13  ;;  %556 = vrot.lane.b32.xlu0 %v3429_v0, %s3301_s13 }
  0xd7   : > { %560 = vrot.lane.b32.xlu2 %v3437_v2, %s3301_s13 }
  0xd8   : > { %v390_v35 = vpop.permute.xlu1 %389  ;;  %v388_v36 = vpop.permute.xlu0 %387 }
  0xd9   : > { %413 = vst.msk [vmem:[#allocation2 + $0x8] sm:$0xff] %vm411_vm3, %v390_v35  ;;  %v427_v37 = vpop.permute.xlu2 %426 }
  0xda   : > { %412 = vst.msk [vmem:[#allocation2] sm:$0xff] %vm411_vm3, %v388_v36 }
  0xdb   : > { %445 = vst.msk [vmem:[#allocation2] sm:$0xff] %vm444_vm4, %v421_v34 }
  0xde   : > { %564 = vrot.lane.b32.xlu1 %v3456_v7, %s3301_s13  ;;  %562 = vrot.lane.b32.xlu0 %v3447_v5, %s3301_s13 }
  0xdf   : > { %566 = vrot.lane.b32.xlu2 %v3453_v6, %s3301_s13 }
  0xe0   : > { %v396_v38 = vpop.permute.xlu1 %395  ;;  %v394_v39 = vpop.permute.xlu0 %393 }
  0xe1   : > { %416 = vst.msk [vmem:[#allocation2 + $0x20] sm:$0xff] %vm411_vm3, %v396_v38  ;;  %v433_v40 = vpop.permute.xlu2 %432 }
  0xe2   : > { %415 = vst.msk [vmem:[#allocation2 + $0x18] sm:$0xff] %vm411_vm3, %v394_v39 }
  0xe3   : > { %448 = vst.msk [vmem:[#allocation2 + $0x18] sm:$0xff] %vm444_vm4, %v427_v37 }
  0xe6   : > { %587 = vrot.lane.b32.xlu1 %v3444_v4, %s3302_s14  ;;  %585 = vrot.lane.b32.xlu0 %v3432_v1, %s3302_s14 }
  0xe7   : > { %589 = vrot.lane.b32.xlu2 %v3429_v0, %s3302_s14 }
  0xe8   : > { %v402_v41 = vpop.permute.xlu1 %401  ;;  %v400_v42 = vpop.permute.xlu0 %399 }
  0xe9   : > { %419 = vst.msk [vmem:[#allocation2 + $0x38] sm:$0xff] %vm411_vm3, %v402_v41  ;;  %v456_v43 = vpop.permute.xlu2 %455 }
  0xea   : > { %418 = vst.msk [vmem:[#allocation2 + $0x30] sm:$0xff] %vm411_vm3, %v400_v42  ;;  %vm2375_vm3 = vcmask 1041409  }
  0xeb   : > { %451 = vst.msk [vmem:[#allocation2 + $0x30] sm:$0xff] %vm444_vm4, %v433_v40 }
  0xee   : > { %593 = vrot.lane.b32.xlu1 %v3437_v2, %s3302_s14  ;;  %591 = vrot.lane.b32.xlu0 %v3441_v3, %s3302_s14 }
  0xef   : > { %595 = vrot.lane.b32.xlu2 %v3447_v5, %s3302_s14 }
  0xf0   : > { %v425_v44 = vpop.permute.xlu1 %424  ;;  %v423_v45 = vpop.permute.xlu0 %422 }
  0xf1   : > { %447 = vst.msk [vmem:[#allocation2 + $0x10] sm:$0xff] %vm444_vm4, %v425_v44  ;;  %v462_v46 = vpop.permute.xlu2 %461 }
  0xf2   : > { %446 = vst.msk [vmem:[#allocation2 + $0x8] sm:$0xff] %vm444_vm4, %v423_v45 }
  0xf3   : > { %479 = vst.msk [vmem:[#allocation2 + $0x8] sm:$0xff] %vm477_vm5, %v456_v43 }
  0xf6   : > { %599 = vrot.lane.b32.xlu1 %v3453_v6, %s3302_s14  ;;  %597 = vrot.lane.b32.xlu0 %v3456_v7, %s3302_s14 }
  0xf7   : > { %618 = vrot.lane.b32.xlu2 %v3432_v1, %s3303_s21 }
  0xf8   : > { %v431_v47 = vpop.permute.xlu1 %430  ;;  %v429_v48 = vpop.permute.xlu0 %428 }
  0xf9   : > { %450 = vst.msk [vmem:[#allocation2 + $0x28] sm:$0xff] %vm444_vm4, %v431_v47  ;;  %v468_v49 = vpop.permute.xlu2 %467 }
  0xfa   : > { %449 = vst.msk [vmem:[#allocation2 + $0x20] sm:$0xff] %vm444_vm4, %v429_v48 }
  0xfb   : > { %482 = vst.msk [vmem:[#allocation2 + $0x20] sm:$0xff] %vm477_vm5, %v462_v46 }
  0xfe   : > { %622 = vrot.lane.b32.xlu1 %v3429_v0, %s3303_s21  ;;  %620 = vrot.lane.b32.xlu0 %v3444_v4, %s3303_s21 }
  0xff   : > { %624 = vrot.lane.b32.xlu2 %v3441_v3, %s3303_s21 }
 0x100   : > { %v454_v50 = vpop.permute.xlu1 %453  ;;  %v435_v51 = vpop.permute.xlu0 %434 }
 0x101   : > { %478 = vst.msk [vmem:[#allocation2] sm:$0xff] %vm477_vm5, %v454_v50  ;;  %v491_v52 = vpop.permute.xlu2 %490 }
 0x102   : > { %452 = vst.msk [vmem:[#allocation2 + $0x38] sm:$0xff] %vm444_vm4, %v435_v51  ;;  %vm2377_vm4 = vcmask 1045509  }
 0x103   : > { %485 = vst.msk [vmem:[#allocation2 + $0x38] sm:$0xff] %vm477_vm5, %v468_v49 }
 0x106   : > { %628 = vrot.lane.b32.xlu1 %v3447_v5, %s3303_s21  ;;  %626 = vrot.lane.b32.xlu0 %v3437_v2, %s3303_s21 }
 0x107   : > { %630 = vrot.lane.b32.xlu2 %v3456_v7, %s3303_s21 }
 0x108   : > { %v460_v53 = vpop.permute.xlu1 %459  ;;  %v458_v54 = vpop.permute.xlu0 %457 }
 0x109   : > { %481 = vst.msk [vmem:[#allocation2 + $0x18] sm:$0xff] %vm477_vm5, %v460_v53  ;;  %v497_v55 = vpop.permute.xlu2 %496 }
 0x10a   : > { %480 = vst.msk [vmem:[#allocation2 + $0x10] sm:$0xff] %vm477_vm5, %v458_v54 }
 0x10b   : > { %513 = vst.msk [vmem:[#allocation2 + $0x10] sm:$0xff] %vm510_vm6, %v491_v52 }
 0x10e   : > { %632 = vrot.lane.b32.xlu0 %v3453_v6, %s3303_s21  ;;  %s3041_s21 = sshll.u32 %s3281_s18, 3  ;;  %s2803_s18 = scalar_lea.sflag [#allocation9], %s3418_s24 }
 0x110   : > { %v466_v56 = vpop.permute.xlu1 %465  ;;  %v464_v57 = vpop.permute.xlu0 %463 }
 0x111   : > { %484 = vst.msk [vmem:[#allocation2 + $0x30] sm:$0xff] %vm477_vm5, %v466_v56  ;;  %v520_v58 = vpop.permute.xlu2 %519 }
 0x112   : > { %483 = vst.msk [vmem:[#allocation2 + $0x28] sm:$0xff] %vm477_vm5, %v464_v57  ;;  %vm2380_vm5 = vcmask 1042434  }
 0x113   : > { %516 = vst.msk [vmem:[#allocation2 + $0x28] sm:$0xff] %vm510_vm6, %v497_v55 }
 0x118   : > { %v489_v59 = vpop.permute.xlu1 %488  ;;  %v487_v60 = vpop.permute.xlu0 %486 }
 0x119   : > { %512 = vst.msk [vmem:[#allocation2 + $0x8] sm:$0xff] %vm510_vm6, %v489_v59  ;;  %v526_v61 = vpop.permute.xlu2 %525 }
 0x11a   : > { %511 = vst.msk [vmem:[#allocation2] sm:$0xff] %vm510_vm6, %v487_v60 }
 0x11b   : > { %544 = vst.msk [vmem:[#allocation2] sm:$0xff] %vm543_vm7, %v520_v58 }
 0x120   : > { %v495_v62 = vpop.permute.xlu1 %494  ;;  %v493_v63 = vpop.permute.xlu0 %492 }
 0x121   : > { %515 = vst.msk [vmem:[#allocation2 + $0x20] sm:$0xff] %vm510_vm6, %v495_v62  ;;  %v532_v0 = vpop.permute.xlu2 %531 }
 0x122   : > { %514 = vst.msk [vmem:[#allocation2 + $0x18] sm:$0xff] %vm510_vm6, %v493_v63 }
 0x123   : > { %547 = vst.msk [vmem:[#allocation2 + $0x18] sm:$0xff] %vm543_vm7, %v526_v61 }
 0x128   : > { %v501_v2 = vpop.permute.xlu1 %500  ;;  %v499_v3 = vpop.permute.xlu0 %498 }
 0x129   : > { %518 = vst.msk [vmem:[#allocation2 + $0x38] sm:$0xff] %vm510_vm6, %v501_v2  ;;  %v555_v7 = vpop.permute.xlu2 %554 }
 0x12a   : > { %517 = vst.msk [vmem:[#allocation2 + $0x30] sm:$0xff] %vm510_vm6, %v499_v3  ;;  %vm2382_vm6 = vcmask 1046534  }
 0x12b   : > { %550 = vst.msk [vmem:[#allocation2 + $0x30] sm:$0xff] %vm543_vm7, %v532_v0 }
 0x130   : > { %v524_v8 = vpop.permute.xlu1 %523  ;;  %v522_v9 = vpop.permute.xlu0 %521 }
 0x131   : > { %546 = vst.msk [vmem:[#allocation2 + $0x10] sm:$0xff] %vm543_vm7, %v524_v8  ;;  %v561_v10 = vpop.permute.xlu2 %560 }
 0x132   : > { %545 = vst.msk [vmem:[#allocation2 + $0x8] sm:$0xff] %vm543_vm7, %v522_v9 }
 0x133   : > { %578 = vst.msk [vmem:[#allocation2 + $0x8] sm:$0xff] %vm576_vm8, %v555_v7 }
 0x138   : > { %v530_v11 = vpop.permute.xlu1 %529  ;;  %v528_v12 = vpop.permute.xlu0 %527 }
 0x139   : > { %549 = vst.msk [vmem:[#allocation2 + $0x28] sm:$0xff] %vm543_vm7, %v530_v11  ;;  %v567_v13 = vpop.permute.xlu2 %566 }
 0x13a   : > { %548 = vst.msk [vmem:[#allocation2 + $0x20] sm:$0xff] %vm543_vm7, %v528_v12 }
 0x13b   : > { %581 = vst.msk [vmem:[#allocation2 + $0x20] sm:$0xff] %vm576_vm8, %v561_v10 }
 0x140   : > { %v553_v14 = vpop.permute.xlu1 %552  ;;  %v534_v15 = vpop.permute.xlu0 %533 }
 0x141   : > { %577 = vst.msk [vmem:[#allocation2] sm:$0xff] %vm576_vm8, %v553_v14  ;;  %v590_v16 = vpop.permute.xlu2 %589 }
 0x142   : > { %551 = vst.msk [vmem:[#allocation2 + $0x38] sm:$0xff] %vm543_vm7, %v534_v15  ;;  %vm2385_vm7 = vcmask 1043459  }
 0x143   : > { %584 = vst.msk [vmem:[#allocation2 + $0x38] sm:$0xff] %vm576_vm8, %v567_v13 }
 0x148   : > { %v559_v17 = vpop.permute.xlu1 %558  ;;  %v557_v18 = vpop.permute.xlu0 %556 }
 0x149   : > { %580 = vst.msk [vmem:[#allocation2 + $0x18] sm:$0xff] %vm576_vm8, %v559_v17  ;;  %v596_v19 = vpop.permute.xlu2 %595 }
 0x14a   : > { %579 = vst.msk [vmem:[#allocation2 + $0x10] sm:$0xff] %vm576_vm8, %v557_v18 }
 0x14b   : > { %612 = vst.msk [vmem:[#allocation2 + $0x10] sm:$0xff] %vm609_vm9, %v590_v16 }
 0x150   : > { %v565_v20 = vpop.permute.xlu1 %564  ;;  %v563_v21 = vpop.permute.xlu0 %562 }
 0x151   : > { %583 = vst.msk [vmem:[#allocation2 + $0x30] sm:$0xff] %vm576_vm8, %v565_v20  ;;  %v619_v22 = vpop.permute.xlu2 %618 }
 0x152   : > { %582 = vst.msk [vmem:[#allocation2 + $0x28] sm:$0xff] %vm576_vm8, %v563_v21  ;;  %vm2387_vm8 = vcmask 1047559  }
 0x153   : > { %615 = vst.msk [vmem:[#allocation2 + $0x28] sm:$0xff] %vm609_vm9, %v596_v19 }
 0x158   : > { %v588_v23 = vpop.permute.xlu1 %587  ;;  %v586_v24 = vpop.permute.xlu0 %585 }
 0x159   : > { %611 = vst.msk [vmem:[#allocation2 + $0x8] sm:$0xff] %vm609_vm9, %v588_v23  ;;  %v625_v25 = vpop.permute.xlu2 %624 }
 0x15a   : > { %610 = vst.msk [vmem:[#allocation2] sm:$0xff] %vm609_vm9, %v586_v24 }
 0x15b   : > { %643 = vst.msk [vmem:[#allocation2] sm:$0xff] %vm642_vm10, %v619_v22 }
 0x160   : > { %v594_v26 = vpop.permute.xlu1 %593  ;;  %v592_v27 = vpop.permute.xlu0 %591 }
 0x161   : > { %614 = vst.msk [vmem:[#allocation2 + $0x20] sm:$0xff] %vm609_vm9, %v594_v26  ;;  %v631_v29 = vpop.permute.xlu2 %630 }
 0x162   : > { %613 = vst.msk [vmem:[#allocation2 + $0x18] sm:$0xff] %vm609_vm9, %v592_v27  ;;  %v3651_v28 = vld [vmem:[#allocation2] sm:$0xff] }
 0x163   : > { %646 = vst.msk [vmem:[#allocation2 + $0x18] sm:$0xff] %vm642_vm10, %v625_v25  ;;  %667 = vrot.lane.b32.xlu1 %v3651_v28, %s3298_s10 }
 0x168   : > { %v600_v30 = vpop.permute.xlu1 %599  ;;  %v598_v31 = vpop.permute.xlu0 %597 }
 0x169   : > { %617 = vst.msk [vmem:[#allocation2 + $0x38] sm:$0xff] %vm609_vm9, %v600_v30 }
 0x16a   : > { %616 = vst.msk [vmem:[#allocation2 + $0x30] sm:$0xff] %vm609_vm9, %v598_v31  ;;  %v3658_v32 = vld [vmem:[#allocation2 + $0x18] sm:$0xff]  ;;  %vm2390_vm9 = vcmask 125952  }
 0x16b   : > { %649 = vst.msk [vmem:[#allocation2 + $0x30] sm:$0xff] %vm642_vm10, %v631_v29  ;;  %673 = vrot.lane.b32.xlu1 %v3658_v32, %s3298_s10 }
 0x170   : > { %v623_v33 = vpop.permute.xlu1 %622  ;;  %v621_v34 = vpop.permute.xlu0 %620 }
 0x171   : > { %645 = vst.msk [vmem:[#allocation2 + $0x10] sm:$0xff] %vm642_vm10, %v623_v33 }
 0x172   : > { %644 = vst.msk [vmem:[#allocation2 + $0x8] sm:$0xff] %vm642_vm10, %v621_v34  ;;  %v3665_v35 = vld [vmem:[#allocation2 + $0x30] sm:$0xff] }
 0x173   : > { %679 = vrot.lane.b32.xlu1 %v3665_v35, %s3298_s10 }
 0x178   : > { %v629_v36 = vpop.permute.xlu1 %628  ;;  %v627_v37 = vpop.permute.xlu0 %626  ;;  %v3669_v38 = vld [vmem:[#allocation2 + $0x10] sm:$0xff] }
 0x179   : > { %648 = vst.msk [vmem:[#allocation2 + $0x28] sm:$0xff] %vm642_vm10, %v629_v36  ;;  %671 = vrot.lane.b32.xlu0 %v3669_v38, %s3298_s10  ;;  %v3674_v39 = vld [vmem:[#allocation2 + $0x8] sm:$0xff] }
 0x17a   : > { %647 = vst.msk [vmem:[#allocation2 + $0x20] sm:$0xff] %vm642_vm10, %v627_v37  ;;  %669 = vrot.lane.b32.xlu2 %v3674_v39, %s3298_s10 }
 0x17b   : > { %701 = vrot.lane.b32.xlu1 %v3674_v39, %s3304_s22 }
 0x180   : > { %v633_v40 = vpop.permute.xlu0 %632  ;;  %v3681_v41 = vld [vmem:[#allocation2 + $0x28] sm:$0xff] }
 0x181   : > { %650 = vst.msk [vmem:[#allocation2 + $0x38] sm:$0xff] %vm642_vm10, %v633_v40  ;;  %677 = vrot.lane.b32.xlu0 %v3681_v41, %s3298_s10  ;;  %v3686_v42 = vld [vmem:[#allocation2 + $0x20] sm:$0xff]  ;;  %vm2412_vm10 = vcmask 257152  }
 0x182   : > { %675 = vrot.lane.b32.xlu2 %v3686_v42, %s3298_s10 }
 0x183   : > { %707 = vrot.lane.b32.xlu1 %v3686_v42, %s3304_s22 }
 0x188   : > { %v3692_v43 = vld [vmem:[#allocation2 + $0x38] sm:$0xff] }
 0x189   : > { %699 = vrot.lane.b32.xlu0 %v3651_v28, %s3304_s22 }
 0x18a   : > { %681 = vrot.lane.b32.xlu2 %v3692_v43, %s3298_s10 }
 0x18b   : > { %713 = vrot.lane.b32.xlu1 %v3692_v43, %s3304_s22 }
 0x191   : > { %705 = vrot.lane.b32.xlu0 %v3658_v32, %s3304_s22 }
 0x192   : > { %703 = vrot.lane.b32.xlu2 %v3669_v38, %s3304_s22 }
 0x193   : > { %735 = vrot.lane.b32.xlu1 %v3669_v38, %s3300_s12 }
 0x199   : > { %711 = vrot.lane.b32.xlu0 %v3665_v35, %s3304_s22 }
 0x19a   : > { %709 = vrot.lane.b32.xlu2 %v3681_v41, %s3304_s22 }
 0x19b   : > { %741 = vrot.lane.b32.xlu1 %v3681_v41, %s3300_s12 }
 0x1a1   : > { %733 = vrot.lane.b32.xlu0 %v3674_v39, %s3300_s12 }
 0x1a2   : > { %731 = vrot.lane.b32.xlu2 %v3651_v28, %s3300_s12 }
 0x1a3   : > { %763 = vrot.lane.b32.xlu1 %v3651_v28, %s3305_s26 }
 0x1a9   : > { %739 = vrot.lane.b32.xlu0 %v3686_v42, %s3300_s12 }
 0x1aa   : > { %737 = vrot.lane.b32.xlu2 %v3658_v32, %s3300_s12 }
 0x1ab   : > { %769 = vrot.lane.b32.xlu1 %v3658_v32, %s3305_s26 }
 0x1b1   : > { %745 = vrot.lane.b32.xlu0 %v3692_v43, %s3300_s12 }
 0x1b2   : > { %743 = vrot.lane.b32.xlu2 %v3665_v35, %s3300_s12 }
 0x1b3   : > { %775 = vrot.lane.b32.xlu1 %v3665_v35, %s3305_s26 }
 0x1b9   : > { %767 = vrot.lane.b32.xlu0 %v3669_v38, %s3305_s26 }
 0x1ba   : > { %765 = vrot.lane.b32.xlu2 %v3674_v39, %s3305_s26 }
 0x1bb   : > { %797 = vrot.lane.b32.xlu1 %v3674_v39, %s3302_s14 }
 0x1c1   : > { %773 = vrot.lane.b32.xlu0 %v3681_v41, %s3305_s26 }
 0x1c2   : > { %771 = vrot.lane.b32.xlu2 %v3686_v42, %s3305_s26 }
 0x1c3   : > { %803 = vrot.lane.b32.xlu1 %v3686_v42, %s3302_s14 }
 0x1c9   : > { %795 = vrot.lane.b32.xlu0 %v3651_v28, %s3302_s14 }
 0x1ca   : > { %777 = vrot.lane.b32.xlu2 %v3692_v43, %s3305_s26 }
 0x1cb   : > { %809 = vrot.lane.b32.xlu1 %v3692_v43, %s3302_s14 }
 0x1d1   : > { %801 = vrot.lane.b32.xlu0 %v3658_v32, %s3302_s14 }
 0x1d2   : > { %799 = vrot.lane.b32.xlu2 %v3669_v38, %s3302_s14 }
 0x1d3   : > { %831 = vrot.lane.b32.xlu1 %v3669_v38, %s3306_s6 }
 0x1d4   : > { %v3745_v44 = vpop.permute.xlu2 %669 }
 0x1d5   : > { %v3747_v45 = vpop.permute.xlu1 %667 }
 0x1d9   : > { %807 = vrot.lane.b32.xlu0 %v3665_v35, %s3302_s14 }
 0x1da   : > { %805 = vrot.lane.b32.xlu2 %v3681_v41, %s3302_s14  ;;  %s2938_s14 = sshll.u32 %s3418_s24, 3 }
 0x1db   : > { %837 = vrot.lane.b32.xlu1 %v3681_v41, %s3306_s6 }
 0x1dc   : > { %v3754_v46 = vpop.permute.xlu2 %675 }
 0x1dd   : > { %v3756_v47 = vpop.permute.xlu1 %673  ;;  %v695_v30 = vadd.f32 %v3754_v46, %v3686_v42  ;;  %v692_v46 = vadd.f32 %v3745_v44, %v3674_v39 }
 0x1e1   : > { %829 = vrot.lane.b32.xlu0 %v3674_v39, %s3306_s6 }
 0x1e2   : > { %827 = vrot.lane.b32.xlu2 %v3651_v28, %s3306_s6 }
 0x1e3   : > { %859 = vrot.lane.b32.xlu1 %v3651_v28, %s3307_s25 }
 0x1e4   : > { %v3761_v48 = vpop.permute.xlu2 %681 }
 0x1e5   : > { %v3763_v49 = vpop.permute.xlu1 %679 }
 0x1e6   : > { %v697_v40 = vadd.f32 %v3763_v49, %v3665_v35 }
 0x1e9   : > { %835 = vrot.lane.b32.xlu0 %v3686_v42, %s3306_s6 }
 0x1ea   : > { %833 = vrot.lane.b32.xlu2 %v3658_v32, %s3306_s6 }
 0x1eb   : > { %865 = vrot.lane.b32.xlu1 %v3658_v32, %s3307_s25  ;;  %v3768_v50 = vpop.permute.xlu0 %671 }
 0x1ec   : > { %v3770_v51 = vpop.permute.xlu2 %703 }
 0x1ed   : > { %v3772_v52 = vpop.permute.xlu1 %701 }
 0x1f1   : > { %841 = vrot.lane.b32.xlu0 %v3692_v43, %s3306_s6 }
 0x1f2   : > { %839 = vrot.lane.b32.xlu2 %v3665_v35, %s3306_s6 }
 0x1f3   : > { %871 = vrot.lane.b32.xlu1 %v3665_v35, %s3307_s25  ;;  %v3777_v53 = vpop.permute.xlu0 %677 }
 0x1f4   : > { %v3779_v54 = vpop.permute.xlu2 %709 }
 0x1f5   : > { %v3781_v55 = vpop.permute.xlu1 %707 }
 0x1f6   : > { %v727_v31 = vadd.f32 %v3781_v55, %v695_v30 }
 0x1f9   : > { %863 = vrot.lane.b32.xlu0 %v3669_v38, %s3307_s25 }
 0x1fa   : > { %861 = vrot.lane.b32.xlu2 %v3674_v39, %s3307_s25 }
 0x1fb   : > { %893 = vrot.lane.b32.xlu1 %v3674_v39, %s3296_s8  ;;  %v3787_v56 = vpop.permute.xlu0 %699 }
 0x1fc   : > { %v3789_v57 = vpop.permute.xlu2 %731 }
 0x1fd   : > { %v3791_v58 = vpop.permute.xlu1 %713 }
 0x201   : > { %869 = vrot.lane.b32.xlu0 %v3681_v41, %s3307_s25 }
 0x202   : > { %867 = vrot.lane.b32.xlu2 %v3686_v42, %s3307_s25 }
 0x203   : > { %899 = vrot.lane.b32.xlu1 %v3686_v42, %s3296_s8  ;;  %v3797_v59 = vpop.permute.xlu0 %705 }
 0x204   : > { %v3799_v60 = vpop.permute.xlu2 %737 }
 0x205   : > { %v3801_v61 = vpop.permute.xlu1 %735 }
 0x209   : > { %891 = vrot.lane.b32.xlu0 %v3651_v28, %s3296_s8 }
 0x20a   : > { %873 = vrot.lane.b32.xlu2 %v3692_v43, %s3307_s25  ;;  %s3313_s25 = smov 16  }
 0x20b   : > { %905 = vrot.lane.b32.xlu1 %v3692_v43, %s3296_s8  ;;  %v712_v62 = vpop.permute.xlu0 %711 }
 0x20c   : > { %v3808_v63 = vpop.permute.xlu2 %743 }
 0x20d   : > { %v3810_v0 = vpop.permute.xlu1 %741 }
 0x211   : > { %897 = vrot.lane.b32.xlu0 %v3658_v32, %s3296_s8 }
 0x212   : > { %895 = vrot.lane.b32.xlu2 %v3669_v38, %s3296_s8 }
 0x213   : > { %927 = vrot.lane.b32.xlu1 %v3669_v38, %s3308_s27  ;;  %v3817_v2 = vpop.permute.xlu0 %733 }
 0x214   : > { %v3819_v3 = vpop.permute.xlu2 %765 }
 0x215   : > { %v3821_v7 = vpop.permute.xlu1 %763 }
 0x219   : > { %903 = vrot.lane.b32.xlu0 %v3665_v35, %s3296_s8 }
 0x21a   : > { %901 = vrot.lane.b32.xlu2 %v3681_v41, %s3296_s8  ;;  %s3316_s8 = smov 64  }
 0x21b   : > { %933 = vrot.lane.b32.xlu1 %v3681_v41, %s3308_s27  ;;  %v740_v8 = vpop.permute.xlu0 %739 }
 0x21c   : > { %v772_v9 = vpop.permute.xlu2 %771  ;;  %v759_v34 = vadd.f32 %v740_v8, %v727_v31  ;;  %v693_v8 = vadd.f32 %v3768_v50, %v3669_v38 }
 0x21d   : > { %v3828_v10 = vpop.permute.xlu1 %769 }
 0x21e   : > { %5130 = vst [vmem:[#allocation14_spill] sm:$0xff] %v3828_v10  ;;  %v791_v10 = vadd.f32 %v772_v9, %v759_v34 }
 0x221   : > { %925 = vrot.lane.b32.xlu0 %v3674_v39, %s3308_s27 }
 0x222   : > { %923 = vrot.lane.b32.xlu2 %v3651_v28, %s3308_s27 }
 0x223   : > { %955 = vrot.lane.b32.xlu1 %v3651_v28, %s3309_s5  ;;  %v746_v11 = vpop.permute.xlu0 %745 }
 0x224   : > { %v778_v12 = vpop.permute.xlu2 %777 }
 0x225   : > { %v776_v13 = vpop.permute.xlu1 %775 }
 0x229   : > { %931 = vrot.lane.b32.xlu0 %v3686_v42, %s3308_s27 }
 0x22a   : > { %929 = vrot.lane.b32.xlu2 %v3658_v32, %s3308_s27 }
 0x22b   : > { %961 = vrot.lane.b32.xlu1 %v3658_v32, %s3309_s5  ;;  %v768_v14 = vpop.permute.xlu0 %767 }
 0x22c   : > { %v3836_v15 = vpop.permute.xlu2 %799 }
 0x22d   : > { %v3838_v16 = vpop.permute.xlu1 %797 }
 0x231   : > { %937 = vrot.lane.b32.xlu0 %v3692_v43, %s3308_s27 }
 0x232   : > { %935 = vrot.lane.b32.xlu2 %v3665_v35, %s3308_s27  ;;  %s3314_s27 = smov 48  }
 0x233   : > { %967 = vrot.lane.b32.xlu1 %v3665_v35, %s3309_s5  ;;  %v3843_v17 = vpop.permute.xlu0 %773 }
 0x234   : > { %v3845_v18 = vpop.permute.xlu2 %805 }
 0x235   : > { %v804_v19 = vpop.permute.xlu1 %803 }
 0x239   : > { %959 = vrot.lane.b32.xlu0 %v3669_v38, %s3309_s5 }
 0x23a   : > { %957 = vrot.lane.b32.xlu2 %v3674_v39, %s3309_s5  ;;  %v725_v39 = vadd.f32 %v3770_v51, %v693_v8 }
 0x23b   : > { %v3849_v20 = vpop.permute.xlu0 %795 }
 0x23c   : > { %v3851_v21 = vpop.permute.xlu2 %827 }
 0x23d   : > { %5131 = vst [vmem:[#allocation15_spill] sm:$0xff] %v3851_v21  ;;  %v810_v22 = vpop.permute.xlu1 %809  ;;  %v823_v21 = vadd.f32 %v804_v19, %v791_v10  ;;  %v696_v10 = vadd.f32 %v3777_v53, %v3681_v41 }
 0x241   : > { %965 = vrot.lane.b32.xlu0 %v3681_v41, %s3309_s5  ;;  %v728_v41 = vadd.f32 %v3779_v54, %v696_v10 }
 0x242   : > { %963 = vrot.lane.b32.xlu2 %v3686_v42, %s3309_s5  ;;  %v1007_v42 = vsel %vm1003_vm11, %v3444_v4, 0.0 }
 0x243   : > { %v3855_v23 = vpop.permute.xlu0 %801 }
 0x244   : > { %5132 = vst [vmem:[#allocation16_spill] sm:$0xff] %v3855_v23  ;;  %v3857_v24 = vpop.permute.xlu2 %833  ;;  %v729_v23 = vadd.f32 %v712_v62, %v697_v40 }
 0x245   : > { %5133 = vst [vmem:[#allocation17_spill] sm:$0xff] %v3857_v24  ;;  %v832_v25 = vpop.permute.xlu1 %831  ;;  %v698_v24 = vadd.f32 %v3761_v48, %v3692_v43 }
 0x246   : > { %v761_v49 = vadd.f32 %v3808_v63, %v729_v23  ;;  %v1019_v63 = vsel %vm1003_vm11, %v3447_v5, 0.0 }
 0x247   : > { %v730_v6 = vadd.f32 %v3791_v58, %v698_v24  ;;  %v724_v58 = vadd.f32 %v3772_v52, %v692_v46 }
 0x248   : > { %v793_v62 = vadd.f32 %v776_v13, %v761_v49 }
 0x249   : > { %v762_v35 = vadd.f32 %v746_v11, %v730_v6  ;;  %v756_v44 = vadd.f32 %v3817_v2, %v724_v58  ;;  %v757_v6 = vadd.f32 %v3801_v61, %v725_v39 }
 0x24a   : > { %969 = vrot.lane.b32.xlu2 %v3692_v43, %s3309_s5  ;;  %s3315_s5 = smov 80  }
 0x24b   : > { %v808_v26 = vpop.permute.xlu0 %807  ;;  %v794_v9 = vadd.f32 %v778_v12, %v762_v35  ;;  %v789_v52 = vadd.f32 %v768_v14, %v757_v6  ;;  %v788_v13 = vadd.f32 %v3819_v3, %v756_v44  ;;  %v1004_v3 = vsel %vm1003_vm11, %v3432_v1, 0.0 }
 0x24c   : > { %v840_v27 = vpop.permute.xlu2 %839  ;;  %v825_v38 = vadd.f32 %v808_v26, %v793_v62  ;;  %v5136_v62 = vld [vmem:[#allocation14_spill] sm:$0xff] }
 0x24d   : > { %v3860_v29 = vpop.permute.xlu1 %837  ;;  %v826_v50 = vadd.f32 %v810_v22, %v794_v9  ;;  %v820_v61 = vadd.f32 %v3838_v16, %v788_v13  ;;  %v821_v53 = vadd.f32 %v3836_v15, %v789_v52  ;;  %v691_v22 = vadd.f32 %v3747_v45, %v3651_v28  ;;  %v3957_v13 = vld [vmem:[%s3422_s7 + $0x30] sm:$0xff] }
 0x24e   : > { %v3895_v51 = vadd.f32 %v840_v27, %v825_v38  ;;  %v760_v16 = vadd.f32 %v3810_v0, %v728_v41  ;;  %v3920_v0 = vld [vmem:[%s3422_s7 + $0x10] sm:$0xff] }
 0x24f   : > { %v3911_v23 = vadd.f32 %v832_v25, %v821_v53  ;;  %v723_v54 = vadd.f32 %v3787_v56, %v691_v22  ;;  %v1010_v25 = vsel %vm1003_vm11, %v3920_v0, 0.0  ;;  %v3925_v56 = vld [vmem:[%s3422_s7 + $0x20] sm:$0xff] }
 0x250   : > { %v792_v15 = vadd.f32 %v3843_v17, %v760_v16  ;;  %v1016_v17 = vsel %vm1003_vm11, %v3925_v56, 0.0 }
 0x251   : > { %v755_v28 = vadd.f32 %v3789_v57, %v723_v54 }
 0x252   : > { %v824_v45 = vadd.f32 %v3845_v18, %v792_v15 }
 0x253   : > { %v830_v33 = vpop.permute.xlu0 %829  ;;  %v787_v40 = vadd.f32 %v3821_v7, %v755_v28 }
 0x254   : > { %v862_v36 = vpop.permute.xlu2 %861  ;;  %v3904_v14 = vadd.f32 %v830_v33, %v820_v61  ;;  %v3933_v57 = vadd.f32 %v3860_v29, %v824_v45  ;;  %v3943_v29 = vld [vmem:[%s3422_s7 + $0x18] sm:$0xff] }
 0x255   : > { %v3865_v37 = vpop.permute.xlu1 %859  ;;  %v819_v46 = vadd.f32 %v3849_v20, %v787_v40  ;;  %v1013_v58 = vsel %vm1003_vm11, %v3943_v29, 0.0 }
 0x256   : > { %v884_v1 = vadd.f32 %v862_v36, %v3904_v14  ;;  %v694_v36 = vadd.f32 %v3756_v47, %v3658_v32  ;;  %v5134_v47 = vld [vmem:[#allocation15_spill] sm:$0xff] }
 0x257   : > { %v3940_v7 = vadd.f32 %v5134_v47, %v819_v46 }
 0x25b   : > { %v836_v55 = vpop.permute.xlu0 %835 }
 0x25c   : > { %v868_v30 = vpop.permute.xlu2 %867  ;;  %v3879_v43 = vadd.f32 %v836_v55, %v823_v21 }
 0x25d   : > { %1008 = vadd.xlane.f32.xlu1 %v1007_v42  ;;  %v3881_v48 = vpop.permute.xlu1 %865  ;;  %v726_v42 = vadd.f32 %v3797_v59, %v694_v36  ;;  %v5135_v59 = vld [vmem:[#allocation13_spill] sm:$0xff] }
 0x25e   : > { %v887_v4 = vadd.f32 %v868_v30, %v3879_v43  ;;  %v1025_v20 = vsel %vm1003_vm11, %v5135_v59, 0.0 }
 0x25f   : > { %v758_v32 = vadd.f32 %v3799_v60, %v726_v42  ;;  %v5137_v60 = vld [vmem:[#allocation16_spill] sm:$0xff] }
 0x261   : > { %v790_v39 = vadd.f32 %v5136_v62, %v758_v32 }
 0x263   : > { %v842_v11 = vpop.permute.xlu0 %841  ;;  %v822_v9 = vadd.f32 %v5137_v60, %v790_v39 }
 0x264   : > { %v874_v19 = vpop.permute.xlu2 %873  ;;  %v3893_v21 = vadd.f32 %v842_v11, %v826_v50  ;;  %v5138_v11 = vld [vmem:[#allocation17_spill] sm:$0xff] }
 0x265   : > { %1020 = vadd.xlane.f32.xlu1 %v1019_v63  ;;  %v872_v2 = vpop.permute.xlu1 %871  ;;  %v3954_v52 = vadd.f32 %v5138_v11, %v822_v9 }
 0x266   : > { %v3899_v12 = vadd.f32 %v872_v2, %v3895_v51  ;;  %v890_v5 = vadd.f32 %v874_v19, %v3893_v21  ;;  %v1022_v19 = vsel %vm1003_vm11, %v3957_v13, 0.0 }
 0x26b   : > { %v864_v24 = vpop.permute.xlu0 %863  ;;  %1005 = vadd.xlane.f32.xlu0 %v1004_v3 }
 0x26c   : > { %v896_v26 = vpop.permute.xlu2 %895  ;;  %v885_v27 = vadd.f32 %v864_v24, %v3911_v23 }
 0x26d   : > { %v894_v31 = vpop.permute.xlu1 %893 }
 0x26e   : > { %v916_v33 = vadd.f32 %v894_v31, %v884_v1  ;;  %v917_v34 = vadd.f32 %v896_v26, %v885_v27 }
 0x273   : > { %1011 = vadd.xlane.f32.xlu2 %v1010_v25  ;;  %v870_v18 = vpop.permute.xlu0 %869  ;;  %1017 = vadd.xlane.f32.xlu0 %v1016_v17  ;;  %v3310_v25 = vmov 0  }
 0x274   : > { %v902_v55 = vpop.permute.xlu2 %901  ;;  %v888_v8 = vadd.f32 %v870_v18, %v3933_v57  ;;  %3132 = vset.pattern.permute.xlu1 %v3310_v25  ;;  %3134 = vset.pattern.permute.xlu0 %v3310_v25 }
 0x275   : > { %v900_v35 = vpop.permute.xlu1 %899  ;;  %3133 = vset.pattern.permute.xlu2 %v3310_v25 }
 0x276   : > { %v919_v49 = vadd.f32 %v900_v35, %v887_v4  ;;  %v920_v30 = vadd.f32 %v902_v55, %v888_v8  ;;  %v883_v4 = vadd.f32 %v3865_v37, %v3940_v7  ;;  %v886_v37 = vadd.f32 %v3881_v48, %v3954_v52 }
 0x27b   : > { %1014 = vadd.xlane.f32.xlu2 %v1013_v58  ;;  %v892_v44 = vpop.permute.xlu0 %891  ;;  %1026 = vadd.xlane.f32.xlu0 %v1025_v20 }
 0x27c   : > { %v924_v38 = vpop.permute.xlu2 %923  ;;  %v915_v6 = vadd.f32 %v892_v44, %v883_v4 }
 0x27d   : > { %v906_v50 = vpop.permute.xlu1 %905 }
 0x27e   : > { %v922_v63 = vadd.f32 %v906_v50, %v890_v5  ;;  %v947_v10 = vadd.f32 %v924_v38, %v915_v6  ;;  %v3311_v38 = vmov 16.0   ;;  %v2940_v6 = vld [vmem:[%s5090_s1 + $0x5] sm:$0x1] }
 0x27f   : > { %3159 = vrcp.f32 %v3311_v38  ;;  %v1073_v50 = vadd.f32 1.0, %v2940_v6  ;;  %v2949_v38 = vld [vmem:[%s5090_s1 + $0xe] sm:$0x1] }
 0x283   : > { %1023 = vadd.xlane.f32.xlu2 %v1022_v19  ;;  %v898_v2 = vpop.permute.xlu0 %897 }
 0x284   : > { %v930_v61 = vpop.permute.xlu2 %929  ;;  %v918_v41 = vadd.f32 %v898_v2, %v886_v37  ;;  %v1043_v37 = vld [vmem:[%s5090_s1] sm:$0x1] }
 0x285   : > { %v928_v53 = vpop.permute.xlu1 %927 }
 0x286   : > { %v949_v3 = vadd.f32 %v928_v53, %v917_v34  ;;  %v950_v22 = vadd.f32 %v930_v61, %v918_v41  ;;  %v2939_v34 = vld [vmem:[%s5090_s1 + $0x4] sm:$0x1] }
 0x287   : > { %v1072_v17 = vadd.f32 1.0, %v2939_v34  ;;  %v1108_v61 = vsub.f32 %v1043_v37, %v2939_v34  ;;  %v1044_v34 = vld [vmem:[%s5090_s1 + $0x1] sm:$0x1] }
 0x289   : > { %v2959_v53 = vadd.f32 -1.0, %v1108_v61 }
 0x28b   : > { %v904_v5 = vpop.permute.xlu0 %903 }
 0x28c   : > { %v936_v16 = vpop.permute.xlu2 %935  ;;  %v921_v24 = vadd.f32 %v904_v5, %v3899_v12  ;;  %v3974_v12 = vld [vmem:[%s5090_s1 + $0x7] sm:$0x1]  ;;  %v1120_v5 = vperm.slane %v2959_v53, 0 }
 0x28d   : > { %v934_v54 = vpop.permute.xlu1 %933  ;;  %v1075_v40 = vadd.f32 1.0, %v3974_v12 }
 0x28e   : > { %v952_v15 = vadd.f32 %v934_v54, %v920_v30  ;;  %v953_v26 = vadd.f32 %v936_v16, %v921_v24 }
 0x28f   : > { %v1083_v35 = vperm.slane %v1075_v40, 0 }
 0x293   : > { %v926_v27 = vpop.permute.xlu0 %925 }
 0x294   : > { %v958_v1 = vpop.permute.xlu2 %957  ;;  %v948_v31 = vadd.f32 %v926_v27, %v916_v33  ;;  %v1080_v33 = vperm.slane %v1072_v17, 0 }
 0x295   : > { %v956_v28 = vpop.permute.xlu1 %955 }
 0x296   : > { %v3964_v45 = vadd.f32 %v958_v1, %v948_v31  ;;  %v3966_v48 = vadd.f32 %v956_v28, %v947_v10  ;;  %1085 = vperm.xlu1 %3132, %v1080_v33   ;;  %v3160_v10 = vpop.eup %3159  ;;  %v2947_v28 = vld [vmem:[%s5090_s1 + $0xc] sm:$0x1]  ;;  %v1109_v33 = vsub.f32 %v1044_v34, %v2940_v6  ;;  %v2943_v34 = vld [vmem:[%s5090_s1 + $0x8] sm:$0x1] }
 0x297   : > { %v1029_v11 = vmul.f32 16.0, %v3160_v10  ;;  %vm1033_vm12 = vweird.f32 %v3160_v10  ;;  %v1224_v17 = vadd.f32 1.0, %v2947_v28 }
 0x299   : > { %v1030_v19 = vsub.f32 1.0, %v1029_v11 }
 0x29b   : > { %v932_v36 = vpop.permute.xlu0 %931  ;;  %v1031_v2 = vmul.f32 %v3160_v10, %v1030_v19 }
 0x29c   : > { %v964_v18 = vpop.permute.xlu2 %963  ;;  %v951_v42 = vadd.f32 %v932_v36, %v919_v49  ;;  %v2941_v49 = vld [vmem:[%s5090_s1 + $0x6] sm:$0x1] }
 0x29d   : > { %v962_v46 = vpop.permute.xlu1 %961  ;;  %v1074_v4 = vadd.f32 1.0, %v2941_v49  ;;  %v1032_v41 = vadd.f32 %v3160_v10, %v1031_v2 }
 0x29e   : > { %v3977_v55 = vadd.f32 %v964_v18, %v951_v42  ;;  %v3979_v8 = vadd.f32 %v962_v46, %v950_v22  ;;  %1097 = vperm.xlu1 %3132, %v1083_v35   ;;  %v1232_v42 = vperm.slane %v1224_v17, 0  ;;  %v2960_v46 = vadd.f32 -1.0, %v1109_v33  ;;  %v4015_v35 = vld [vmem:[%s5090_s1 + $0xf] sm:$0x1]  ;;  %v3136_v17 = vld [vmem:[%s5090_s1 + $0x10] ss:$0 sm:$0xff] }
 0x29f   : > { %v1082_v60 = vperm.slane %v1074_v4, 0  ;;  %v4001_v22 = vsel %vm1033_vm12, %v3160_v10, %v1032_v41  ;;  %v1260_v33 = vsub.f32 %v2943_v34, %v2947_v28  ;;  %vm2456_vm12 = vcmask 519552  }
 0x2a1   : > { %1093 = vperm.xlu0 %3134, %v1082_v60   ;;  %v2945_v60 = vld [vmem:[%s5090_s1 + $0xa] sm:$0x1] }
 0x2a3   : > { %v938_v30 = vpop.permute.xlu0 %937 }
 0x2a4   : > { %v954_v32 = vadd.f32 %v938_v30, %v922_v63  ;;  %v970_v47 = vpop.permute.xlu2 %969  ;;  %v1081_v63 = vperm.slane %v1073_v50, 0  ;;  %v1121_v30 = vperm.slane %v2960_v46, 0  ;;  %v3137_v46 = vld [vmem:[%s5090_s1 + $0x13] ss:$0 sm:$0xff] }
 0x2a5   : > { %v968_v58 = vpop.permute.xlu1 %967 }
 0x2a6   : > { %v3981_v59 = vadd.f32 %v970_v47, %v954_v32  ;;  %v3983_v20 = vadd.f32 %v968_v58, %v953_v26  ;;  %1089 = vperm.xlu2 %3133, %v1081_v63   ;;  %v1227_v32 = vadd.f32 1.0, %v4015_v35  ;;  %v1262_v63 = vsub.f32 %v2945_v60, %v2949_v38  ;;  %v3139_v60 = vld [vmem:[%s5090_s1 + $0x16] ss:$0 sm:$0xff] }
 0x2a8   : > { %v2965_v41 = vadd.f32 -1.0, %v1262_v63  ;;  %v3142_v63 = vld [vmem:[%s5090_s1 + $0x12] ss:$0 sm:$0xff] }
 0x2ab   : > { %v960_v62 = vpop.permute.xlu0 %959 }
 0x2ac   : > { %v3985_v39 = vadd.f32 %v960_v62, %v949_v3  ;;  %v1045_v3 = vld [vmem:[%s5090_s1 + $0x2] sm:$0x1] }
 0x2ad   : > { %v1110_v16 = vsub.f32 %v1045_v3, %v2941_v49  ;;  %v1046_v49 = vld [vmem:[%s5090_s1 + $0x3] sm:$0x1] }
 0x2ae   : > { %v1111_v50 = vsub.f32 %v1046_v49, %v3974_v12  ;;  %v3138_v49 = vld [vmem:[%s5090_s1 + $0x14] ss:$0 sm:$0xff] }
 0x2af   : > { %v2961_v26 = vadd.f32 -1.0, %v1110_v16 }
 0x2b0   : > { %v2962_v37 = vadd.f32 -1.0, %v1111_v50  ;;  %v3141_v50 = vld [vmem:[%s5090_s1 + $0x11] ss:$0 sm:$0xff] }
 0x2b1   : > { %v1122_v27 = vperm.slane %v2961_v26, 0 }
 0x2b2   : > { %v1123_v53 = vperm.slane %v2962_v37, 0  ;;  %v2967_v37 = vld [vmem:[%s5090_s1 + $0x18] sm:$0x1] }
 0x2b3   : > { %v966_v44 = vpop.permute.xlu0 %965 }
 0x2b4   : > { %v3990_v9 = vadd.f32 %v966_v44, %v952_v15  ;;  %v1235_v44 = vperm.slane %v1227_v32, 0 }
 0x2d0   : > { %v1009_v24 = vpop.xlane.xlu1 %1008 }
 0x2d1   : > { %v1036_v54 = vmul.f32 %v4001_v22, %v1009_v24  ;;  %v2948_v24 = vld [vmem:[%s5090_s1 + $0xd] sm:$0x1] }
 0x2d2   : > { %v1225_v26 = vadd.f32 1.0, %v2948_v24 }
 0x2d3   : > { %v1129_v15 = vmul.f32 %v1120_v5, %v1036_v54 }
 0x2d5   : > { %1143 = vperm.xlu1 %3132, %v1129_v15   ;;  %v3135_v15 = vld [vmem:[%s5090_s1 + $0x15] ss:$0 sm:$0xff] }
 0x2d8   : > { %v1021_v1 = vpop.xlane.xlu1 %1020 }
 0x2d9   : > { %v1040_v31 = vmul.f32 %v4001_v22, %v1021_v1  ;;  %v1233_v1 = vperm.slane %v1225_v26, 0 }
 0x2db   : > { %v1133_v25 = vmul.f32 %v1122_v27, %v1040_v31 }
 0x2dd   : > { %1163 = vperm.xlu0 %3134, %v1133_v25   ;;  %v2944_v25 = vld [vmem:[%s5090_s1 + $0x9] sm:$0x1] }
 0x2de   : > { %v1006_v36 = vpop.xlane.xlu0 %1005 }
 0x2df   : > { %v1035_v40 = vmul.f32 %v4001_v22, %v1006_v36  ;;  %v1261_v36 = vsub.f32 %v2944_v25, %v2948_v24  ;;  %v3000_v25 = vld [vmem:[%s5090_s1 + $0x31] sm:$0x1] }
 0x2e1   : > { %v1128_v18 = vmul.f32 %v1120_v5, %v1035_v40  ;;  %v2963_v40 = vadd.f32 -1.0, %v1260_v33 }
 0x2e3   : > { %1138 = vperm.xlu2 %3133, %v1128_v18   ;;  %v2964_v18 = vadd.f32 -1.0, %v1261_v36 }
 0x2e5   : > { %1237 = vperm.xlu0 %3134, %v1232_v42   ;;  %v2946_v42 = vld [vmem:[%s5090_s1 + $0xb] sm:$0x1] }
 0x2e6   : > { %v1012_v47 = vpop.xlane.xlu2 %1011  ;;  %v1018_v58 = vpop.xlane.xlu0 %1017  ;;  %v1263_v28 = vsub.f32 %v2946_v42, %v4015_v35 }
 0x2e7   : > { %v1037_v62 = vmul.f32 %v4001_v22, %v1012_v47  ;;  %v1039_v6 = vmul.f32 %v4001_v22, %v1018_v58  ;;  %v2968_v47 = vld [vmem:[%s5090_s1 + $0x19] sm:$0x1]  ;;  %v2972_v58 = vld [vmem:[%s5090_s1 + $0x1d] sm:$0x1] }
 0x2e9   : > { %v1130_v4 = vmul.f32 %v1121_v30, %v1037_v62  ;;  %v1132_v19 = vmul.f32 %v1122_v27, %v1039_v6  ;;  %v1226_v27 = vadd.f32 1.0, %v2949_v38  ;;  %v2966_v62 = vadd.f32 -1.0, %v1263_v28  ;;  %v3140_v38 = vld [vmem:[%s5090_s1 + $0x17] ss:$0 sm:$0xff] }
 0x2ea   : > { %v4115_v28 = vld [vmem:[%s5090_s1 + $0x37] sm:$0x1] }
 0x2eb   : > { %1148 = vperm.xlu2 %3133, %v1130_v4   ;;  %v1234_v31 = vperm.slane %v1226_v27, 0 }
 0x2ed   : > { %1249 = vperm.xlu0 %3134, %v1235_v44   ;;  %v1443_v44 = vsub.f32 %v2968_v47, %v2972_v58 }
 0x2ee   : > { %v1015_v10 = vpop.xlane.xlu2 %1014  ;;  %v1027_v2 = vpop.xlane.xlu0 %1026 }
 0x2ef   : > { %v1038_v11 = vmul.f32 %v4001_v22, %v1015_v10  ;;  %v1042_v3 = vmul.f32 %v4001_v22, %v1027_v2  ;;  %v2992_v35 = vadd.f32 -1.0, %v1443_v44  ;;  %v2971_v10 = vld [vmem:[%s5090_s1 + $0x1c] sm:$0x1] }
 0x2f1   : > { %v1131_v61 = vmul.f32 %v1121_v30, %v1038_v11  ;;  %v1135_v12 = vmul.f32 %v1123_v53, %v1042_v3  ;;  %v2973_v30 = vld [vmem:[%s5090_s1 + $0x1e] sm:$0x1]  ;;  %v1455_v6 = vperm.slane %v2992_v35, 0  ;;  %v1406_v11 = vadd.f32 1.0, %v2971_v10 }
 0x2f2   : > { %v1408_v32 = vadd.f32 1.0, %v2973_v30  ;;  %v4121_v35 = vld [vmem:[%s3422_s7 + $0x8] sm:$0xff] }
 0x2f3   : > { %1153 = vperm.xlu1 %3132, %v1131_v61   ;;  %1158 = vperm.xlu2 %3133, %v1132_v19   ;;  %v1407_v19 = vadd.f32 1.0, %v2972_v58  ;;  %v1414_v2 = vperm.slane %v1406_v11, 0 }
 0x2f4   : > { %v1416_v4 = vperm.slane %v1408_v32, 0 }
 0x2f5   : > { %1282 = vperm.xlu0 %3134, %v2965_v41   ;;  %v1415_v61 = vperm.slane %v1407_v19, 0  ;;  %v1442_v41 = vsub.f32 %v2967_v37, %v2971_v10 }
 0x2f6   : > { %v1024_v5 = vpop.xlane.xlu2 %1023 }
 0x2f7   : > { %v1041_v16 = vmul.f32 %v4001_v22, %v1024_v5  ;;  %v2991_v5 = vadd.f32 -1.0, %v1442_v41  ;;  %v4130_v41 = vld [vmem:[%s3422_s7 + $0x28] sm:$0xff] }
 0x2f9   : > { %v1134_v54 = vmul.f32 %v1123_v53, %v1041_v16  ;;  %v2974_v53 = vld [vmem:[%s5090_s1 + $0x1f] sm:$0x1]  ;;  %v2969_v16 = vld [vmem:[%s5090_s1 + $0x1a] sm:$0x1] }
 0x2fa   : > { %v1409_v3 = vadd.f32 1.0, %v2974_v53 }
 0x2fb   : > { %1168 = vperm.xlu1 %3132, %v1134_v54   ;;  %1173 = vperm.xlu2 %3133, %v1135_v12   ;;  %v2970_v12 = vld [vmem:[%s5090_s1 + $0x1b] sm:$0x1]  ;;  %v1454_v54 = vperm.slane %v2991_v5, 0 }
 0x2fc   : > { %v1417_v24 = vperm.slane %v1409_v3, 0  ;;  %v1445_v26 = vsub.f32 %v2970_v12, %v2974_v53 }
 0x2fd   : > { %1317 = vperm.xlu0 %3134, %v3135_v15   ;;  %v1444_v15 = vsub.f32 %v2969_v16, %v2973_v30  ;;  %v3002_v30 = vld [vmem:[%s5090_s1 + $0x33] sm:$0x1] }
 0x2fe   : > { %v2994_v34 = vadd.f32 -1.0, %v1445_v26 }
 0x300   : > { %v4094_v27 = vpop.permute.xlu2 %1089  ;;  %v1457_v36 = vperm.slane %v2994_v34, 0 }
 0x301   : > { %v1102_v44 = vmul.f32 %v3920_v0, %v4094_v27 }
 0x303   : > { %1241 = vperm.xlu1 %3132, %v1233_v1   ;;  %1245 = vperm.xlu2 %3133, %v1234_v31   ;;  %v2993_v31 = vadd.f32 -1.0, %v1444_v15 }
 0x305   : > { %1345 = vperm.xlu0 %3134, %v3136_v17   ;;  %v4102_v17 = vld [vmem:[%s5090_s1 + $0x35] sm:$0x1]  ;;  %v1456_v33 = vperm.slane %v2993_v31, 0 }
 0x308   : > { %v1086_v1 = vpop.permute.xlu1 %1085 }
 0x30b   : > { %1270 = vperm.xlu1 %3132, %v2963_v40   ;;  %1276 = vperm.xlu2 %3133, %v2964_v18   ;;  %v1895_v40 = vsub.f32 %v3000_v25, %v4102_v17  ;;  %v4106_v18 = vld [vmem:[%s3422_s7] sm:$0xff] }
 0x30c   : > { %v1100_v42 = vmul.f32 %v4106_v18, %v1086_v1 }
 0x30d   : > { %1357 = vperm.xlu0 %3134, %v3137_v46   ;;  %v3024_v46 = vadd.f32 -1.0, %v1895_v40 }
 0x310   : > { %v1098_v47 = vpop.permute.xlu1 %1097 }
 0x313   : > { %1288 = vperm.xlu1 %3132, %v2966_v62   ;;  %1313 = vperm.xlu2 %3133, %v3138_v49   ;;  %v1907_v62 = vperm.slane %v3024_v46, 0  ;;  %v1897_v49 = vsub.f32 %v3002_v30, %v4115_v28 }
 0x315   : > { %1427 = vperm.xlu0 %3134, %v1416_v4   ;;  %v3026_v4 = vadd.f32 -1.0, %v1897_v49 }
 0x317   : > { %v1909_v10 = vperm.slane %v3026_v4, 0 }
 0x31b   : > { %1321 = vperm.xlu1 %3132, %v3139_v60   ;;  %1325 = vperm.xlu2 %3133, %v3140_v38   ;;  %v1101_v60 = vmul.f32 %v4121_v35, %v1086_v1 }
 0x31d   : > { %1463 = vperm.xlu0 %3134, %v1455_v6   ;;  %v1094_v6 = vpop.permute.xlu0 %1093 }
 0x31e   : > { %v1105_v53 = vmul.f32 %v4130_v41, %v1094_v6 }
 0x323   : > { %1349 = vperm.xlu1 %3132, %v3141_v50   ;;  %1353 = vperm.xlu2 %3133, %v3142_v63  }
 0x32b   : > { %1419 = vperm.xlu1 %3132, %v1414_v2   ;;  %1423 = vperm.xlu2 %3133, %v1415_v61   ;;  %v1104_v2 = vmul.f32 %v3925_v56, %v1094_v6 }
 0x333   : > { %1431 = vperm.xlu1 %3132, %v1417_v24   ;;  %1459 = vperm.xlu2 %3133, %v1454_v54   ;;  %v4135_v54 = vld [vmem:[%s3422_s7 + $0x38] sm:$0xff] }
 0x334   : > { %v1107_v15 = vmul.f32 %v4135_v54, %v1098_v47 }
 0x33b   : > { %1467 = vperm.xlu1 %3132, %v1456_v33   ;;  %1471 = vperm.xlu2 %3133, %v1457_v36  }
 0x33d   : > { %v1139_v32 = vpop.permute.xlu2 %1138 }
 0x33e   : > { %v1176_v58 = vadd.f32 %v1139_v32, %v1100_v42 }
 0x340   : > { %v1184_v19 = vsel %vm1003_vm11, %v1176_v58, 0.0 }
 0x343   : > { %1915 = vperm.xlu2 %3133, %v1907_v62  }
 0x345   : > { %v1149_v38 = vpop.permute.xlu2 %1148 }
 0x346   : > { %v4124_v50 = vadd.f32 %v1149_v38, %v1102_v44  ;;  %v1103_v38 = vmul.f32 %v3943_v29, %v4094_v27 }
 0x347   : > { %v1144_v63 = vpop.permute.xlu1 %1143 }
 0x348   : > { %v1177_v11 = vadd.f32 %v1144_v63, %v1101_v60 }
 0x34a   : > { %v1185_v37 = vsel %vm1003_vm11, %v1177_v11, 0.0 }
 0x34b   : > { %v1186_v61 = vadd.f32 %v1185_v37, %v1184_v19  ;;  %1923 = vperm.xlu2 %3133, %v1909_v10  }
 0x34d   : > { %v1159_v3 = vpop.permute.xlu2 %1158  ;;  %v1187_v63 = vrot.slane %v1186_v61, 4 }
 0x34e   : > { %v1180_v5 = vadd.f32 %v1159_v3, %v1104_v2 }
 0x34f   : > { %v1164_v16 = vpop.permute.xlu0 %1163 }
 0x350   : > { %v1202_v12 = vsel %vm1003_vm11, %v1180_v5, 0.0  ;;  %v1181_v24 = vadd.f32 %v1164_v16, %v1105_v53 }
 0x352   : > { %v1203_v26 = vsel %vm1003_vm11, %v1181_v24, 0.0 }
 0x353   : > { %v1204_v1 = vadd.f32 %v1203_v26, %v1202_v12  ;;  %v1106_v12 = vmul.f32 %v3957_v13, %v1098_v47 }
 0x355   : > { %v1205_v31 = vrot.slane %v1204_v1, 4  ;;  %v1174_v34 = vpop.permute.xlu2 %1173 }
 0x356   : > { %v1183_v25 = vadd.f32 %v1174_v34, %v1107_v15 }
 0x357   : > { %v1206_v33 = vadd.f32 %v1205_v31, %v1204_v1  ;;  %v1238_v36 = vpop.permute.xlu0 %1237 }
 0x358   : > { %v4139_v40 = vmul.f32 %v1238_v36, %v1176_v58  ;;  %v4141_v42 = vmul.f32 %v1238_v36, %v1177_v11  ;;  %v1193_v11 = vsel %vm1003_vm11, %v4124_v50, 0.0 }
 0x359   : > { %v1207_v46 = vrot.slane %v1206_v33, 2 }
 0x35b   : > { %v1208_v30 = vadd.f32 %v1207_v46, %v1206_v33 }
 0x35d   : > { %v1246_v32 = vpop.permute.xlu2 %1245  ;;  %v1209_v60 = vrot.slane %v1208_v30, 1 }
 0x35e   : > { %v1256_v62 = vmul.f32 %v1246_v32, %v1180_v5  ;;  %v1257_v49 = vmul.f32 %v1246_v32, %v1181_v24  ;;  %v1188_v5 = vadd.f32 %v1187_v63, %v1186_v61 }
 0x35f   : > { %v1250_v4 = vpop.permute.xlu0 %1249  ;;  %v1210_v6 = vadd.f32 %v1209_v60, %v1208_v30  ;;  %v1212_v30 = vsel %vm1003_vm11, %v1183_v25, 0.0 }
 0x360   : > { %v4143_v44 = vmul.f32 %v1250_v4, %v1183_v25  ;;  %v1189_v1 = vrot.slane %v1188_v5, 2 }
 0x361   : > { %v1222_v53 = vmul.f32 %v1210_v6, %v4001_v22 }
 0x365   : > { %v1154_v10 = vpop.permute.xlu1 %1153  ;;  %v1277_v19 = vpop.permute.xlu2 %1276 }
 0x366   : > { %v1179_v58 = vadd.f32 %v1154_v10, %v1103_v38  ;;  %v1190_v38 = vadd.f32 %v1189_v1, %v1188_v5 }
 0x367   : > { %v1283_v37 = vpop.permute.xlu0 %1282 }
 0x368   : > { %v1194_v2 = vsel %vm1003_vm11, %v1179_v58, 0.0  ;;  %v1285_v3 = vperm.slane %v1283_v37, 0 }
 0x369   : > { %v1195_v16 = vadd.f32 %v1194_v2, %v1193_v11  ;;  %v1191_v2 = vrot.slane %v1190_v38, 1 }
 0x36a   : > { %v1294_v24 = vmul.f32 %v1285_v3, %v1222_v53 }
 0x36b   : > { %v1196_v27 = vrot.slane %v1195_v16, 4  ;;  %v1192_v5 = vadd.f32 %v1191_v2, %v1190_v38 }
 0x36c   : > { %v1300_v15 = vadd.f32 %v1294_v24, %v1256_v62  ;;  %v1301_v26 = vadd.f32 %v1294_v24, %v1257_v49 }
 0x36d   : > { %v1197_v31 = vadd.f32 %v1196_v27, %v1195_v16  ;;  %v1169_v34 = vpop.permute.xlu1 %1168  ;;  %v1314_v33 = vpop.permute.xlu2 %1313  ;;  %v1279_v16 = vperm.slane %v1277_v19, 0 }
 0x36e   : > { %v1182_v36 = vadd.f32 %v1169_v34, %v1106_v12  ;;  %v1328_v38 = vmul.f32 %v4106_v18, %v1314_v33 }
 0x36f   : > { %v1198_v46 = vrot.slane %v1197_v31, 2  ;;  %v4154_v63 = vpop.permute.xlu0 %1317 }
 0x370   : > { %v1211_v32 = vsel %vm1003_vm11, %v1182_v36, 0.0  ;;  %v1258_v60 = vmul.f32 %v1250_v4, %v1182_v36  ;;  %v1220_v36 = vmul.f32 %v1192_v5, %v4001_v22  ;;  %v987_v5 = vmul.f32 0.14285715, %v3940_v7 }
 0x371   : > { %v1199_v61 = vadd.f32 %v1198_v46, %v1197_v31  ;;  %v1213_v6 = vadd.f32 %v1212_v30, %v1211_v32 }
 0x373   : > { %v1200_v47 = vrot.slane %v1199_v61, 1  ;;  %v1214_v10 = vrot.slane %v1213_v6, 4 }
 0x375   : > { %v1201_v62 = vadd.f32 %v1200_v47, %v1199_v61  ;;  %v1215_v49 = vadd.f32 %v1214_v10, %v1213_v6  ;;  %v1242_v37 = vpop.permute.xlu1 %1241  ;;  %v1326_v11 = vpop.permute.xlu2 %1325 }
 0x376   : > { %v1254_v53 = vmul.f32 %v1242_v37, %v4124_v50  ;;  %v1255_v3 = vmul.f32 %v1242_v37, %v1179_v58 }
 0x377   : > { %v1221_v25 = vmul.f32 %v1201_v62, %v4001_v22  ;;  %v1216_v12 = vrot.slane %v1215_v49, 2  ;;  %v1346_v31 = vpop.permute.xlu0 %1345 }
 0x379   : > { %v1293_v4 = vmul.f32 %v1279_v16, %v1221_v25  ;;  %v1217_v24 = vadd.f32 %v1216_v12, %v1215_v49  ;;  %v1329_v49 = vmul.f32 %v4121_v35, %v1314_v33  ;;  %v4176_v33 = vld [vmem:[%s5090_s1 + $0x36] sm:$0x1] }
 0x37b   : > { %v1298_v27 = vadd.f32 %v1293_v4, %v1254_v53  ;;  %v1299_v1 = vadd.f32 %v1293_v4, %v1255_v3  ;;  %v1218_v6 = vrot.slane %v1217_v24, 1  ;;  %v3003_v4 = vld [vmem:[%s5090_s1 + $0x34] sm:$0x1] }
 0x37d   : > { %v1271_v34 = vpop.permute.xlu1 %1270  ;;  %v1354_v46 = vpop.permute.xlu2 %1353  ;;  %v1219_v47 = vadd.f32 %v1218_v6, %v1217_v24 }
 0x37e   : > { %v1273_v30 = vperm.slane %v1271_v34, 0  ;;  %v1364_v32 = vmul.f32 %v1354_v46, %v1300_v15  ;;  %v1365_v61 = vmul.f32 %v1354_v46, %v1301_v26  ;;  %v988_v34 = vmul.f32 0.14285715, %v3904_v14 }
 0x37f   : > { %v1223_v53 = vmul.f32 %v1219_v47, %v4001_v22  ;;  %v1358_v3 = vpop.permute.xlu0 %1357  ;;  %v2999_v22 = vld [vmem:[%s5090_s1 + $0x30] sm:$0x1] }
 0x380   : > { %v1292_v50 = vmul.f32 %v1273_v30, %v1220_v36  ;;  %v1894_v6 = vsub.f32 %v2999_v22, %v3003_v4  ;;  %v990_v22 = vmul.f32 0.14285715, %v3954_v52  ;;  %v991_v52 = vmul.f32 0.14285715, %v3879_v43 }
 0x382   : > { %v1296_v58 = vadd.f32 %v1292_v50, %v4139_v40  ;;  %v1297_v19 = vadd.f32 %v1292_v50, %v4141_v42  ;;  %v3001_v42 = vld [vmem:[%s5090_s1 + $0x32] sm:$0x1] }
 0x383   : > { %v1896_v36 = vsub.f32 %v3001_v42, %v4176_v33 }
 0x384   : > { %v1360_v10 = vmul.f32 %v1346_v31, %v1296_v58  ;;  %v1361_v62 = vmul.f32 %v1346_v31, %v1297_v19 }
 0x385   : > { %v1289_v37 = vpop.permute.xlu1 %1288  ;;  %v4163_v2 = vpop.permute.xlu2 %1423 }
 0x386   : > { %v1291_v15 = vperm.slane %v1289_v37, 0  ;;  %v4166_v26 = vadd.f32 %v1360_v10, %v1328_v38  ;;  %v4168_v25 = vadd.f32 %v1361_v62, %v1329_v49  ;;  %v3023_v49 = vadd.f32 -1.0, %v1894_v6 }
 0x387   : > { %v4201_v62 = vpop.permute.xlu0 %1427  ;;  %v1330_v37 = vmul.f32 %v3920_v0, %v4154_v63 }
 0x388   : > { %5139 = vst [vmem:[#allocation15_spill] sm:$0xff] %v4166_v26  ;;  %v1295_v40 = vmul.f32 %v1291_v15, %v1223_v53  ;;  %v1331_v53 = vmul.f32 %v3943_v29, %v4154_v63 }
 0x389   : > { %5140 = vst [vmem:[#allocation13_spill] sm:$0xff] %v4168_v25 }
 0x38a   : > { %v1302_v16 = vadd.f32 %v1295_v40, %v1258_v60  ;;  %v1303_v12 = vadd.f32 %v1295_v40, %v4143_v44  ;;  %v1334_v60 = vmul.f32 %v3957_v13, %v1326_v11  ;;  %v1335_v44 = vmul.f32 %v4135_v54, %v1326_v11 }
 0x38b   : > { %v3025_v11 = vadd.f32 -1.0, %v1896_v36 }
 0x38c   : > { %v1366_v24 = vmul.f32 %v1358_v3, %v1302_v16  ;;  %v1367_v31 = vmul.f32 %v1358_v3, %v1303_v12 }
 0x38d   : > { %v1322_v46 = vpop.permute.xlu1 %1321  ;;  %v1460_v30 = vpop.permute.xlu2 %1459  ;;  %v1908_v15 = vperm.slane %v3025_v11, 0  ;;  %v997_v11 = vmul.f32 0.09090909, %v3985_v39 }
 0x38e   : > { %v1332_v50 = vmul.f32 %v3925_v56, %v1322_v46  ;;  %v1333_v58 = vmul.f32 %v4130_v41, %v1322_v46  ;;  %v1474_v19 = vmul.f32 %v1460_v30, %v987_v5  ;;  %v1475_v47 = vmul.f32 %v1460_v30, %v988_v34 }
 0x38f   : > { %v4192_v7 = vadd.f32 %v1366_v24, %v1334_v60  ;;  %v4194_v38 = vadd.f32 %v1367_v31, %v1335_v44  ;;  %v1464_v12 = vpop.permute.xlu0 %1463  ;;  %v989_v5 = vmul.f32 0.14285715, %v3911_v23  ;;  %v1858_v60 = vadd.f32 1.0, %v3003_v4 }
 0x390   : > { %v4196_v14 = vadd.f32 %v1364_v32, %v1332_v50  ;;  %v4198_v10 = vadd.f32 %v1365_v61, %v1333_v58  ;;  %1492 = vrot.lane.b32.xlu1 %v1475_v47, %s3304_s22  ;;  %1490 = vrot.lane.b32.xlu0 %v1474_v19, %s3304_s22  ;;  %v1906_v32 = vperm.slane %v3023_v49, 0  ;;  %v1477_v31 = vmul.f32 %v1464_v12, %v990_v22 }
 0x391   : > { %5141 = vst [vmem:[#allocation14_spill] sm:$0xff] %v4192_v7  ;;  %v1476_v34 = vmul.f32 %v1464_v12, %v989_v5  ;;  %v992_v23 = vmul.f32 0.14285715, %v3933_v57  ;;  %v1866_v46 = vperm.slane %v1858_v60, 0  ;;  %v994_v50 = vmul.f32 0.14285715, %v3893_v21 }
 0x392   : > { %5142 = vst [vmem:[#allocation16_spill] sm:$0xff] %v4194_v38  ;;  %v998_v4 = vmul.f32 0.09090909, %v3979_v8  ;;  %v1860_v57 = vadd.f32 1.0, %v4176_v33  ;;  %v1861_v21 = vadd.f32 1.0, %v4115_v28 }
 0x393   : > { %5143 = vst [vmem:[#allocation17_spill] sm:$0xff] %v4196_v14  ;;  %v999_v28 = vmul.f32 0.09090909, %v3977_v55  ;;  %v995_v12 = vmul.f32 0.09090909, %v3966_v48 }
 0x394   : > { %5144 = vst [vmem:[#allocation18_spill] sm:$0xff] %v4198_v10  ;;  %v1868_v49 = vperm.slane %v1860_v57, 0  ;;  %v2980_v48 = vld [vmem:[%s5090_s1 + $0x25] sm:$0x1]  ;;  %v1001_v60 = vmul.f32 0.09090909, %v3983_v20 }
 0x395   : > { %v1350_v3 = vpop.permute.xlu1 %1349  ;;  %v1472_v63 = vpop.permute.xlu2 %1471  ;;  %v2975_v57 = vld [vmem:[%s5090_s1 + $0x20] sm:$0x1] }
 0x396   : > { %v1362_v40 = vmul.f32 %v1350_v3, %v1298_v27  ;;  %v1363_v61 = vmul.f32 %v1350_v3, %v1299_v1  ;;  %v993_v27 = vmul.f32 0.14285715, %v3895_v51  ;;  %v1859_v51 = vadd.f32 1.0, %v4102_v17 }
 0x397   : > { %v1481_v43 = vmul.f32 %v1472_v63, %v994_v50 }
 0x398   : > { %v4208_v42 = vadd.f32 %v1362_v40, %v1330_v37  ;;  %v4210_v16 = vadd.f32 %v1363_v61, %v1331_v53  ;;  %1919 = vperm.xlu1 %3132, %v1908_v15   ;;  %1911 = vperm.xlu0 %3134, %v1906_v32   ;;  %v1480_v36 = vmul.f32 %v1472_v63, %v993_v27  ;;  %v1867_v19 = vperm.slane %v1859_v51, 0 }
 0x399   : > { %v1869_v37 = vperm.slane %v1861_v21, 0  ;;  %v1438_v40 = vmul.f32 %v3925_v56, %v4201_v62  ;;  %v996_v61 = vmul.f32 0.09090909, %v3964_v45  ;;  %v2976_v45 = vld [vmem:[%s5090_s1 + $0x21] sm:$0x1] }
 0x39a   : > { %v1002_v63 = vmul.f32 0.09090909, %v3981_v59 }
 0x39d   : > { %v1420_v24 = vpop.permute.xlu1 %1419  ;;  %v1916_v58 = vpop.permute.xlu2 %1915 }
 0x39e   : > { %v1929_v47 = vmul.f32 %v1916_v58, %v998_v4  ;;  %v1928_v17 = vmul.f32 %v1916_v58, %v997_v11  ;;  %v1435_v8 = vmul.f32 %v4121_v35, %v1420_v24  ;;  %v1434_v3 = vmul.f32 %v4106_v18, %v1420_v24 }
 0x3a0   : > { %1496 = vrot.lane.b32.xlu1 %v1477_v31, %s3304_s22  ;;  %1494 = vrot.lane.b32.xlu0 %v1476_v34, %s3304_s22 }
 0x3a5   : > { %v4217_v1 = vpop.permute.xlu1 %1431  ;;  %v1924_v53 = vpop.permute.xlu2 %1923 }
 0x3a6   : > { %v1441_v27 = vmul.f32 %v4135_v54, %v4217_v1  ;;  %v1932_v59 = vmul.f32 %v1924_v53, %v1001_v60  ;;  %v2978_v60 = vld [vmem:[%s5090_s1 + $0x23] sm:$0x1] }
 0x3a8   : > { %1502 = vrot.lane.b32.xlu1 %v1480_v36, %s3304_s22  ;;  %v1709_v36 = vsub.f32 %v2976_v45, %v2980_v48 }
 0x3aa   : > { %v2996_v58 = vadd.f32 -1.0, %v1709_v36 }
 0x3ad   : > { %v1468_v44 = vpop.permute.xlu1 %1467 }
 0x3ae   : > { %v1478_v30 = vmul.f32 %v1468_v44, %v991_v52  ;;  %v1479_v6 = vmul.f32 %v1468_v44, %v992_v23  ;;  %v1000_v52 = vmul.f32 0.09090909, %v3990_v9 }
 0x3b0   : > { %1498 = vrot.lane.b32.xlu2 %v1478_v30, %s3304_s22  ;;  %1500 = vrot.lane.b32.xlu0 %v1479_v6, %s3304_s22  ;;  %v1437_v30 = vmul.f32 %v3943_v29, %v4163_v2  ;;  %v1933_v6 = vmul.f32 %v1924_v53, %v1002_v63  ;;  %v2977_v29 = vld [vmem:[%s5090_s1 + $0x22] sm:$0x1] }
 0x3b1   : > { %1871 = vperm.xlu1 %3132, %v1866_v46   ;;  %v2979_v46 = vld [vmem:[%s5090_s1 + $0x24] sm:$0x1] }
 0x3b2   : > { %v1672_v9 = vadd.f32 1.0, %v2979_v46 }
 0x3b8   : > { %1504 = vrot.lane.b32.xlu2 %v1481_v43, %s3304_s22  ;;  %1875 = vperm.xlu0 %3134, %v1867_v19   ;;  %v1673_v19 = vadd.f32 1.0, %v2980_v48  ;;  %v2981_v43 = vld [vmem:[%s5090_s1 + $0x26] sm:$0x1] }
 0x3b9   : > { %1948 = vrot.lane.b32.xlu1 %v1929_v47, %s3304_s22  ;;  %v1436_v47 = vmul.f32 %v3920_v0, %v4163_v2  ;;  %v1721_v2 = vperm.slane %v2996_v58, 0 }
 0x3ba   : > { %v1681_v21 = vperm.slane %v1673_v19, 0 }
 0x3c0   : > { %1879 = vperm.xlu2 %3133, %v1868_v49   ;;  %1946 = vrot.lane.b32.xlu0 %v1928_v17, %s3304_s22  ;;  %v1680_v49 = vperm.slane %v1672_v9, 0  ;;  %v1710_v17 = vsub.f32 %v2977_v29, %v2981_v43 }
 0x3c8   : > { %1883 = vperm.xlu2 %3133, %v1869_v37   ;;  %v1708_v37 = vsub.f32 %v2975_v57, %v2979_v46 }
 0x402   : > { %v1493_v15 = vpop.permute.xlu1 %1492  ;;  %v1491_v32 = vpop.permute.xlu0 %1490 }
 0x403   : > { %v4235_v33 = vadd.f32 %v1493_v15, %v1435_v8  ;;  %v4239_v39 = vadd.f32 %v1491_v32, %v1434_v3  ;;  %v1440_v8 = vmul.f32 %v3957_v13, %v4217_v1  ;;  %v2997_v15 = vadd.f32 -1.0, %v1710_v17  ;;  %v3008_v1 = vld [vmem:[%s5090_s1 + $0x39] sm:$0x1]  ;;  %v3012_v32 = vld [vmem:[%s5090_s1 + $0x3d] sm:$0x1] }
 0x404   : > { %v2995_v3 = vadd.f32 -1.0, %v1708_v37  ;;  %v1674_v13 = vadd.f32 1.0, %v2981_v43 }
 0x405   : > { %5145 = vst [vmem:[#allocation19_spill] sm:$0xff] %v4235_v33 }
 0x406   : > { %1523 = vst.msk [vmem:[#allocation3 + $0xd] sm:$0xff] %vm1003_vm11, %v4235_v33 }
 0x407   : > { %5146 = vst [vmem:[#allocation20_spill] sm:$0xff] %v4239_v39 }
 0x408   : > { %1536 = vst.msk [vmem:[#allocation3 + $0xf] sm:$0x40] %vm1535_vm13, %v4235_v33 }
 0x409   : > { %1546 = vst.msk [vmem:[#allocation3 + $0x11] sm:$0x20] %vm1545_vm14, %v4235_v33 }
 0x40a   : > { %1556 = vst.msk [vmem:[#allocation3 + $0x13] sm:$0x10] %vm1555_vm15, %v4235_v33  ;;  %v1499_v22 = vpop.permute.xlu2 %1498  ;;  %v1920_v5 = vpop.permute.xlu1 %1919 }
 0x40b   : > { %1522 = vst.msk [vmem:[#allocation3 + $0x5] sm:$0xff] %vm1003_vm11, %v4239_v39  ;;  %v4258_v55 = vadd.f32 %v1499_v22, %v1438_v40  ;;  %v1930_v24 = vmul.f32 %v1920_v5, %v999_v28  ;;  %v1912_v56 = vpop.permute.xlu0 %1911  ;;  %v1931_v50 = vmul.f32 %v1920_v5, %v1000_v52  ;;  %v1439_v28 = vmul.f32 %v4130_v41, %v4201_v62  ;;  %v2982_v5 = vld [vmem:[%s5090_s1 + $0x27] sm:$0x1] }
 0x40c   : > { %1531 = vst.msk [vmem:[#allocation3 + $0x3] sm:$0x2] %vm1530_vm0, %v4239_v39  ;;  %v1926_v31 = vmul.f32 %v1912_v56, %v995_v12  ;;  %v1927_v34 = vmul.f32 %v1912_v56, %v996_v61  ;;  %v1722_v40 = vperm.slane %v2997_v15, 0  ;;  %v1720_v12 = vperm.slane %v2995_v3, 0 }
 0x40d   : > { %1541 = vst.msk [vmem:[#allocation3 + $0x1] sm:$0x4] %vm1540_vm1, %v4239_v39  ;;  %1950 = vrot.lane.b32.xlu2 %v1930_v24, %s3304_s22  ;;  %v1682_v22 = vperm.slane %v1674_v13, 0  ;;  %v2223_v24 = vsub.f32 %v3008_v1, %v3012_v32  ;;  %v1675_v45 = vadd.f32 1.0, %v2982_v5  ;;  %v3007_v13 = vld [vmem:[%s5090_s1 + $0x38] sm:$0x1] }
 0x40e   : > { %5147 = vst [vmem:[#allocation21_spill] sm:$0xff] %v4258_v55  ;;  %1944 = vrot.lane.b32.xlu1 %v1927_v34, %s3304_s22  ;;  %1942 = vrot.lane.b32.xlu0 %v1926_v31, %s3304_s22  ;;  %v3011_v1 = vld [vmem:[%s5090_s1 + $0x3c] sm:$0x1] }
 0x40f   : > { %1551 = vst.msk [vmem:[#allocation3 - $0x1] sm:$0x8] %vm1550_vm2, %v4239_v39  ;;  %v3028_v63 = vadd.f32 -1.0, %v2223_v24  ;;  %v3143_v24 = vld [vmem:[%s5090_s1 + $0x29] ss:$0 sm:$0xff] }
 0x410   : > { %1526 = vst.msk [vmem:[#allocation3 + $0x45] sm:$0xff] %vm1003_vm11, %v4258_v55 }
 0x411   : > { %1533 = vst.msk [vmem:[#allocation3 + $0x43] sm:$0x2] %vm1530_vm0, %v4258_v55  ;;  %v2235_v58 = vperm.slane %v3028_v63, 0 }
 0x412   : > { %1543 = vst.msk [vmem:[#allocation3 + $0x41] sm:$0x4] %vm1540_vm1, %v4258_v55  ;;  %v1505_v23 = vpop.permute.xlu2 %1504  ;;  %v1497_v44 = vpop.permute.xlu1 %1496  ;;  %v1561_v7 = vld [vmem:[#allocation3 + $0xa] sm:$0xff] }
 0x413   : > { %1553 = vst.msk [vmem:[#allocation3 + $0x3f] sm:$0x8] %vm1550_vm2, %v4258_v55  ;;  %v4289_v51 = vadd.f32 %v1505_v23, %v1441_v27  ;;  %v4293_v20 = vadd.f32 %v1497_v44, %v1437_v30  ;;  %v1495_v4 = vpop.permute.xlu0 %1494  ;;  %v2187_v27 = vadd.f32 1.0, %v3012_v32  ;;  %v4633_v10 = vld [vmem:[#allocation3 + $0x5] sm:$0xff] }
 0x414   : > { %v4317_v11 = vadd.f32 %v1495_v4, %v1436_v47  ;;  %v1711_v4 = vsub.f32 %v2978_v60, %v2982_v5  ;;  %v4372_v47 = vld [vmem:[%s3422_s7 + $0x18] sm:$0xff]  ;;  %v3013_v60 = vld [vmem:[%s5090_s1 + $0x3e] sm:$0x1] }
 0x415   : > { %5148 = vst [vmem:[#allocation22_spill] sm:$0xff] %v4289_v51  ;;  %1956 = vrot.lane.b32.xlu2 %v1933_v6, %s3304_s22  ;;  %v1683_v6 = vperm.slane %v1675_v45, 0  ;;  %v2195_v19 = vperm.slane %v2187_v27, 0 }
 0x416   : > { %1529 = vst.msk [vmem:[#allocation3 + $0x6d] sm:$0xff] %vm1003_vm11, %v4289_v51  ;;  %1954 = vrot.lane.b32.xlu1 %v1932_v59, %s3304_s22  ;;  %1952 = vrot.lane.b32.xlu0 %v1931_v50, %s3304_s22  ;;  %v2998_v3 = vadd.f32 -1.0, %v1711_v4  ;;  %s3317_s22 = smov 96  }
 0x417   : > { %1539 = vst.msk [vmem:[#allocation3 + $0x6f] sm:$0x40] %vm1535_vm13, %v4289_v51 }
 0x418   : > { %1549 = vst.msk [vmem:[#allocation3 + $0x71] sm:$0x20] %vm1545_vm14, %v4289_v51  ;;  %v1723_v63 = vperm.slane %v2998_v3, 0 }
 0x419   : > { %1559 = vst.msk [vmem:[#allocation3 + $0x73] sm:$0x10] %vm1555_vm15, %v4289_v51 }
 0x41a   : > { %1525 = vst.msk [vmem:[#allocation3 + $0x2d] sm:$0xff] %vm1003_vm11, %v4293_v20  ;;  %v1503_v0 = vpop.permute.xlu1 %1502 }
 0x41b   : > { %1537 = vst.msk [vmem:[#allocation3 + $0x2f] sm:$0x40] %vm1535_vm13, %v4293_v20  ;;  %v4329_v53 = vadd.f32 %v1503_v0, %v1440_v8 }
 0x41c   : > { %1547 = vst.msk [vmem:[#allocation3 + $0x31] sm:$0x20] %vm1545_vm14, %v4293_v20 }
 0x41d   : > { %1557 = vst.msk [vmem:[#allocation3 + $0x33] sm:$0x10] %vm1555_vm15, %v4293_v20  ;;  %1685 = vperm.xlu2 %3133, %v1680_v49  }
 0x41e   : > { %1524 = vst.msk [vmem:[#allocation3 + $0x25] sm:$0xff] %vm1003_vm11, %v4317_v11  ;;  %1729 = vperm.xlu1 %3132, %v1721_v2   ;;  %1689 = vperm.xlu0 %3134, %v1681_v21  }
 0x41f   : > { %5149 = vst [vmem:[#allocation23_spill] sm:$0xff] %v4329_v53 }
 0x420   : > { %1532 = vst.msk [vmem:[#allocation3 + $0x23] sm:$0x2] %vm1530_vm0, %v4317_v11 }
 0x421   : > { %1542 = vst.msk [vmem:[#allocation3 + $0x21] sm:$0x4] %vm1540_vm1, %v4317_v11  ;;  %v1603_v46 = vld [vmem:[#allocation3 + $0x2d] sm:$0xff] }
 0x422   : > { %1552 = vst.msk [vmem:[#allocation3 + $0x1f] sm:$0x8] %vm1550_vm2, %v4317_v11  ;;  %v1501_v61 = vpop.permute.xlu0 %1500  ;;  %v1619_v29 = vld [vmem:[#allocation3 + $0x2e] sm:$0xff] }
 0x423   : > { %1528 = vst.msk [vmem:[#allocation3 + $0x65] sm:$0xff] %vm1003_vm11, %v4329_v53  ;;  %v4354_v56 = vadd.f32 %v1501_v61, %v1439_v28  ;;  %v4356_v62 = vpop.permute.xlu1 %1871  ;;  %v1635_v2 = vld [vmem:[#allocation3 + $0x2f] sm:$0xff] }
 0x424   : > { %1534 = vst.msk [vmem:[#allocation3 + $0x63] sm:$0x2] %vm1530_vm0, %v4329_v53  ;;  %v1651_v32 = vld [vmem:[#allocation3 + $0x30] sm:$0xff] }
 0x425   : > { %1544 = vst.msk [vmem:[#allocation3 + $0x61] sm:$0x4] %vm1540_vm1, %v4329_v53  ;;  %v1563_v31 = vld [vmem:[#allocation3 + $0x2a] sm:$0xff]  ;;  %1733 = vperm.xlu2 %3133, %v1722_v40  }
 0x426   : > { %5150 = vst [vmem:[#allocation24_spill] sm:$0xff] %v4354_v56  ;;  %v1571_v34 = vld [vmem:[#allocation3 + $0x2b] sm:$0xff]  ;;  %1725 = vperm.xlu1 %3132, %v1720_v12   ;;  %1693 = vperm.xlu0 %3134, %v1682_v22   ;;  %v4390_v22 = vld [vmem:[%s3422_s7 + $0x10] sm:$0xff] }
 0x427   : > { %1554 = vst.msk [vmem:[#allocation3 + $0x5f] sm:$0x8] %vm1550_vm2, %v4329_v53  ;;  %v1579_v48 = vadd.f32 %v1571_v34, %v1563_v31  ;;  %v1587_v36 = vld [vmem:[#allocation3 + $0x2c] sm:$0xff]  ;;  %v1586_v59 = vld [vmem:[#allocation3 + $0x24] sm:$0xff]  ;;  %v2222_v31 = vsub.f32 %v3007_v13, %v3011_v1  ;;  %v4453_v13 = vpop.permute.xlu2 %1879 }
 0x428   : > { %1527 = vst.msk [vmem:[#allocation3 + $0x4d] sm:$0xff] %vm1003_vm11, %v4354_v56  ;;  %v1570_v23 = vld [vmem:[#allocation3 + $0x23] sm:$0xff] }
 0x429   : > { %1538 = vst.msk [vmem:[#allocation3 + $0x4f] sm:$0x40] %vm1535_vm13, %v4354_v56  ;;  %v1562_v52 = vld [vmem:[#allocation3 + $0x22] sm:$0xff]  ;;  %v1595_v44 = vadd.f32 %v1587_v36, %v1579_v48 }
 0x42a   : > { %1548 = vst.msk [vmem:[#allocation3 + $0x51] sm:$0x20] %vm1545_vm14, %v4354_v56  ;;  %v1578_v30 = vadd.f32 %v1570_v23, %v1562_v52  ;;  %v1876_v9 = vpop.permute.xlu0 %1875  ;;  %v1602_v17 = vld [vmem:[#allocation3 + $0x25] sm:$0xff]  ;;  %v3027_v52 = vadd.f32 -1.0, %v2222_v31  ;;  %v2188_v23 = vadd.f32 1.0, %v3013_v60 }
 0x42b   : > { %1558 = vst.msk [vmem:[#allocation3 + $0x53] sm:$0x10] %vm1555_vm15, %v4354_v56  ;;  %v1611_v50 = vadd.f32 %v1603_v46, %v1595_v44  ;;  %v1889_v57 = vmul.f32 %v4372_v47, %v1876_v9  ;;  %v1949_v49 = vpop.permute.xlu1 %1948  ;;  %v1618_v8 = vld [vmem:[#allocation3 + $0x26] sm:$0xff]  ;;  %v1888_v5 = vmul.f32 %v4390_v22, %v1876_v9  ;;  %v3144_v48 = vld [vmem:[%s5090_s1 + $0x2d] ss:$0 sm:$0xff]  ;;  %v2186_v44 = vadd.f32 1.0, %v3011_v1 }
 0x42c   : > { %v1594_v43 = vadd.f32 %v1586_v59, %v1578_v30  ;;  %5151 = vst [vmem:[#allocation25_spill] sm:$0xff] %v4372_v47  ;;  %v1634_v40 = vld [vmem:[#allocation3 + $0x27] sm:$0xff]  ;;  %v3009_v46 = vld [vmem:[%s5090_s1 + $0x3a] sm:$0x1]  ;;  %v2234_v30 = vperm.slane %v3027_v52, 0 }
 0x42d   : > { %v1627_v0 = vadd.f32 %v1619_v29, %v1611_v50  ;;  %v4375_v37 = vadd.f32 %v1949_v49, %v1889_v57  ;;  %1697 = vperm.xlu2 %3133, %v1683_v6   ;;  %5153 = vst [vmem:[#allocation27_spill] sm:$0xff] %v4390_v22  ;;  %v1650_v34 = vld [vmem:[#allocation3 + $0x28] sm:$0xff]  ;;  %v2196_v6 = vperm.slane %v2188_v23, 0  ;;  %v2194_v59 = vperm.slane %v2186_v44, 0  ;;  %v3014_v29 = vld [vmem:[%s5090_s1 + $0x3f] sm:$0x1] }
 0x42e   : > { %v1610_v21 = vadd.f32 %v1602_v17, %v1594_v43  ;;  %2243 = vperm.xlu1 %3132, %v2235_v58   ;;  %2203 = vperm.xlu0 %3134, %v2195_v19   ;;  %v2224_v50 = vsub.f32 %v3009_v46, %v3013_v60  ;;  %v3145_v58 = vld [vmem:[%s5090_s1 + $0x2e] ss:$0 sm:$0xff]  ;;  %v3146_v19 = vld [vmem:[%s5090_s1 + $0x2c] ss:$0 sm:$0xff]  ;;  %v2189_v43 = vadd.f32 1.0, %v3014_v29  ;;  %v4476_v31 = vld [vmem:[%s3422_s7 + $0x20] sm:$0xff] }
 0x42f   : > { %5152 = vst [vmem:[#allocation26_spill] sm:$0xff] %v4375_v37  ;;  %v1643_v15 = vadd.f32 %v1635_v2, %v1627_v0  ;;  %v3010_v57 = vld [vmem:[%s5090_s1 + $0x3b] sm:$0x1]  ;;  %v3147_v17 = vld [vmem:[%s5090_s1 + $0x2a] ss:$0 sm:$0xff]  ;;  %v4494_v23 = vld [vmem:[#allocation3 + $0x43] sm:$0xff] }
 0x430   : > { %v1626_v28 = vadd.f32 %v1618_v8, %v1610_v21  ;;  %2011 = vst.msk [vmem:[#allocation3 + $0x35] sm:$0x8] %vm1550_vm2, %v4375_v37  ;;  %v3029_v9 = vadd.f32 -1.0, %v2224_v50  ;;  %v2197_v49 = vperm.slane %v2189_v43, 0  ;;  %v3148_v0 = vld [vmem:[%s5090_s1 + $0x28] ss:$0 sm:$0xff]  ;;  %v2225_v2 = vsub.f32 %v3010_v57, %v3014_v29 }
 0x431   : > { %v4385_v61 = vadd.f32 %v1651_v32, %v1643_v15  ;;  %2019 = vst.msk [vmem:[#allocation3 + $0x37] sm:$0x4] %vm1540_vm1, %v4375_v37  ;;  %v3149_v8 = vld [vmem:[%s5090_s1 + $0x41] ss:$0 sm:$0xff]  ;;  %v3150_v15 = vld [vmem:[%s5090_s1 + $0x45] ss:$0 sm:$0xff] }
 0x432   : > { %v1642_v12 = vadd.f32 %v1634_v40, %v1626_v28  ;;  %1987 = vst.msk [vmem:[#allocation3 + $0x2f] sm:$0x40] %vm1535_vm13, %v4375_v37  ;;  %v1947_v45 = vpop.permute.xlu0 %1946  ;;  %v2236_v4 = vperm.slane %v3029_v9, 0  ;;  %v3030_v21 = vadd.f32 -1.0, %v2225_v2  ;;  %v3151_v1 = vld [vmem:[%s5090_s1 + $0x44] ss:$0 sm:$0xff]  ;;  %v4464_v40 = vpop.permute.xlu2 %1883 }
 0x433   : > { %1995 = vst.msk [vmem:[#allocation3 + $0x31] sm:$0x20] %vm1545_vm14, %v4375_v37  ;;  %v4405_v36 = vadd.f32 %v1947_v45, %v1888_v5  ;;  %v3152_v32 = vld [vmem:[%s5090_s1 + $0x2b] ss:$0 sm:$0xff]  ;;  %v3153_v28 = vld [vmem:[%s5090_s1 + $0x2f] ss:$0 sm:$0xff]  ;;  %v1893_v50 = vmul.f32 %v4135_v54, %v4464_v40 }
 0x434   : > { %v4401_v27 = vadd.f32 %v1650_v34, %v1642_v12  ;;  %2003 = vst.msk [vmem:[#allocation3 + $0x33] sm:$0x10] %vm1555_vm15, %v4375_v37  ;;  %v2237_v3 = vperm.slane %v3030_v21, 0  ;;  %v3154_v12 = vld [vmem:[%s5090_s1 + $0x42] ss:$0 sm:$0xff]  ;;  %v1890_v34 = vmul.f32 %v4476_v31, %v4453_v13  ;;  %v4492_v52 = vld [vmem:[#allocation3 + $0x42] sm:$0xff] }
 0x435   : > { %5154 = vst [vmem:[#allocation28_spill] sm:$0xff] %v4405_v36  ;;  %1801 = vperm.xlu2 %3133, %v3143_v24   ;;  %v3155_v5 = vld [vmem:[%s5090_s1 + $0x40] ss:$0 sm:$0xff]  ;;  %v3156_v24 = vld [vmem:[%s5090_s1 + $0x46] ss:$0 sm:$0xff]  ;;  %v4496_v44 = vld [vmem:[#allocation3 + $0x44] sm:$0xff] }
 0x436   : > { %1977 = vst.msk [vmem:[#allocation3 + $0x2d] sm:$0xff] %vm1003_vm11, %v4375_v37  ;;  %1769 = vperm.xlu1 %3132, %v3144_v48   ;;  %1737 = vperm.xlu0 %3134, %v1723_v63   ;;  %v3157_v63 = vld [vmem:[%s5090_s1 + $0x43] ss:$0 sm:$0xff]  ;;  %v3158_v60 = vld [vmem:[%s5090_s1 + $0x47] ss:$0 sm:$0xff]  ;;  %v4498_v46 = vld [vmem:[#allocation3 + $0x45] sm:$0xff] }
 0x437   : > { %2007 = vst.msk [vmem:[#allocation3 + $0x1d] sm:$0x10] %vm1555_vm15, %v4405_v36  ;;  %v4512_v9 = vld [vmem:[#allocation3 + $0x46] sm:$0xff]  ;;  %v4528_v54 = vld [vmem:[#allocation3 + $0x6e] sm:$0xff]  ;;  %v1667_v39 = vmul.f32 0.14285715, %v4385_v61 }
 0x438   : > { %2015 = vst.msk [vmem:[#allocation3 + $0x1b] sm:$0x20] %vm1545_vm14, %v4405_v36  ;;  %v4530_v43 = vld [vmem:[#allocation3 + $0x6f] sm:$0xff]  ;;  %v4546_v21 = vld [vmem:[#allocation3 + $0x66] sm:$0xff] }
 0x439   : > { %1983 = vst.msk [vmem:[#allocation3 + $0x23] sm:$0x2] %vm1530_vm0, %v4405_v36  ;;  %v4532_v57 = vld [vmem:[#allocation3 + $0x70] sm:$0xff]  ;;  %v4643_v53 = vld [vmem:[#allocation3 + $0x6] sm:$0xff] }
 0x43a   : > { %1991 = vst.msk [vmem:[#allocation3 + $0x21] sm:$0x4] %vm1540_vm1, %v4405_v36  ;;  %v4542_v2 = vld [vmem:[#allocation3 + $0x6c] sm:$0xff]  ;;  %v4659_v25 = vld [vmem:[#allocation3 + $0x64] sm:$0xff] }
 0x43b   : > { %1999 = vst.msk [vmem:[#allocation3 + $0x1f] sm:$0x8] %vm1550_vm2, %v4405_v36  ;;  %v1601_v56 = vld [vmem:[#allocation3 + $0xd] sm:$0xff] }
 0x43c   : > { %1976 = vst.msk [vmem:[#allocation3 + $0x25] sm:$0xff] %vm1003_vm11, %v4405_v36 }
 0x43d   : > { %2239 = vperm.xlu2 %3133, %v2234_v30   ;;  %5155 = vst [vmem:[#allocation29_spill] sm:$0xff] %v4476_v31  ;;  %v4502_v30 = vld [vmem:[#allocation3 + $0x4a] sm:$0xff] }
 0x43e   : > { %2207 = vperm.xlu1 %3132, %v2196_v6   ;;  %2199 = vperm.xlu0 %3134, %v2194_v59   ;;  %v4504_v6 = vld [vmem:[#allocation3 + $0x4b] sm:$0xff]  ;;  %5159 = vst [vmem:[#allocation33_spill] sm:$0xff] %v4530_v43 }
 0x43f   : > { %v4506_v59 = vld [vmem:[#allocation3 + $0x4c] sm:$0xff]  ;;  %5160 = vst [vmem:[#allocation34_spill] sm:$0xff] %v4532_v57  ;;  %v4655_v57 = vld [vmem:[#allocation3 + $0x62] sm:$0xff] }
 0x440   : > { %5161 = vst [vmem:[#allocation35_spill] sm:$0xff] %v4546_v21  ;;  %v4645_v31 = vld [vmem:[#allocation3 + $0x7] sm:$0xff] }
 0x443   : > { %v2024_v14 = vld [vmem:[#allocation3 + $0x20] sm:$0xff]  ;;  %v2065_v43 = vld [vmem:[#allocation3 + $0x2b] sm:$0xff] }
 0x444   : > { %v2032_v51 = vld [vmem:[#allocation3 + $0x21] sm:$0xff] }
 0x445   : > { %1773 = vperm.xlu2 %3133, %v3145_v58   ;;  %v4514_v58 = vld [vmem:[#allocation3 + $0x47] sm:$0xff]  ;;  %v2040_v55 = vadd.f32 %v2032_v51, %v2024_v14 }
 0x446   : > { %1765 = vperm.xlu1 %3132, %v3146_v19   ;;  %2247 = vperm.xlu0 %3134, %v2236_v4   ;;  %v4516_v19 = vld [vmem:[#allocation3 + $0x48] sm:$0xff] }
 0x447   : > { %5157 = vst [vmem:[#allocation31_spill] sm:$0xff] %v4516_v19  ;;  %v2048_v14 = vld [vmem:[#allocation3 + $0x22] sm:$0xff]  ;;  %v4669_v51 = vld [vmem:[#allocation3 + $0x2a] sm:$0xff] }
 0x448   : > { %v2064_v36 = vld [vmem:[#allocation3 + $0x23] sm:$0xff] }
 0x44d   : > { %2211 = vperm.xlu2 %3133, %v2197_v49   ;;  %v4534_v49 = vld [vmem:[#allocation3 + $0x6d] sm:$0xff] }
 0x44e   : > { %1805 = vperm.xlu1 %3132, %v3147_v17   ;;  %1797 = vperm.xlu0 %3134, %v3148_v0   ;;  %v4538_v17 = vld [vmem:[#allocation3 + $0x6a] sm:$0xff] }
 0x44f   : > { %v4540_v0 = vld [vmem:[#allocation3 + $0x6b] sm:$0xff] }
 0x455   : > { %2315 = vperm.xlu2 %3133, %v3149_v8   ;;  %v4548_v8 = vld [vmem:[#allocation3 + $0x67] sm:$0xff] }
 0x456   : > { %2283 = vperm.xlu1 %3132, %v3150_v15   ;;  %2251 = vperm.xlu0 %3134, %v2237_v3   ;;  %5162 = vst [vmem:[#allocation36_spill] sm:$0xff] %v4548_v8  ;;  %v4550_v15 = vld [vmem:[#allocation3 + $0x68] sm:$0xff] }
 0x457   : > { %5163 = vst [vmem:[#allocation37_spill] sm:$0xff] %v4550_v15 }
 0x45d   : > { %2279 = vperm.xlu2 %3133, %v3151_v1   ;;  %v1887_v1 = vmul.f32 %v4121_v35, %v4356_v62 }
 0x45e   : > { %1809 = vperm.xlu1 %3132, %v3152_v32   ;;  %1777 = vperm.xlu0 %3134, %v3153_v28  }
 0x465   : > { %2319 = vperm.xlu2 %3133, %v3154_v12  }
 0x466   : > { %2311 = vperm.xlu1 %3132, %v3155_v5   ;;  %2287 = vperm.xlu0 %3134, %v3156_v24   ;;  %v1886_v5 = vmul.f32 %v4106_v18, %v4356_v62  ;;  %v4564_v24 = vld [vmem:[#allocation3 + $0xe] sm:$0xff]  ;;  %v4583_v18 = vld [vmem:[%s3422_s7 + $0x30] sm:$0xff] }
 0x467   : > { %v1951_v45 = vpop.permute.xlu2 %1950  ;;  %5168 = vst [vmem:[#allocation42_spill] sm:$0xff] %v4583_v18  ;;  %v1892_v62 = vmul.f32 %v4583_v18, %v4464_v40  ;;  %v1585_v18 = vld [vmem:[#allocation3 + $0xc] sm:$0xff] }
 0x468   : > { %v4480_v48 = vadd.f32 %v1951_v45, %v1890_v34  ;;  %v4566_v34 = vld [vmem:[#allocation3 + $0xf] sm:$0xff] }
 0x469   : > { %v4568_v45 = vld [vmem:[#allocation3 + $0x10] sm:$0xff] }
 0x46a   : > { %5156 = vst [vmem:[#allocation30_spill] sm:$0xff] %v4480_v48 }
 0x46b   : > { %2008 = vst.msk [vmem:[#allocation3 + $0x3d] sm:$0x10] %vm1555_vm15, %v4480_v48 }
 0x46c   : > { %2016 = vst.msk [vmem:[#allocation3 + $0x3b] sm:$0x20] %vm1545_vm14, %v4480_v48 }
 0x46d   : > { %1984 = vst.msk [vmem:[#allocation3 + $0x43] sm:$0x2] %vm1530_vm0, %v4480_v48 }
 0x46e   : > { %1992 = vst.msk [vmem:[#allocation3 + $0x41] sm:$0x4] %vm1540_vm1, %v4480_v48  ;;  %2323 = vperm.xlu1 %3132, %v3157_v63   ;;  %2291 = vperm.xlu0 %3134, %v3158_v60   ;;  %v4589_v60 = vld [vmem:[#allocation3 + $0x2] sm:$0xff] }
 0x46f   : > { %2000 = vst.msk [vmem:[#allocation3 + $0x3f] sm:$0x8] %vm1550_vm2, %v4480_v48  ;;  %v1957_v4 = vpop.permute.xlu2 %1956 }
 0x470   : > { %1978 = vst.msk [vmem:[#allocation3 + $0x45] sm:$0xff] %vm1003_vm11, %v4480_v48  ;;  %v4522_v29 = vadd.f32 %v1957_v4, %v1893_v50  ;;  %v4591_v50 = vld [vmem:[#allocation3 + $0x3] sm:$0xff] }
 0x471   : > { %v4593_v4 = vld [vmem:[#allocation3 + $0x4] sm:$0xff]  ;;  %v1576_v21 = vadd.f32 %v4591_v50, %v4589_v60  ;;  %v2097_v50 = vld [vmem:[#allocation3 + $0x2d] sm:$0xff] }
 0x472   : > { %5158 = vst [vmem:[#allocation32_spill] sm:$0xff] %v4522_v29  ;;  %v4637_v48 = vld [vmem:[#allocation3 + $0x28] sm:$0xff] }
 0x473   : > { %2013 = vst.msk [vmem:[#allocation3 + $0x75] sm:$0x8] %vm1550_vm2, %v4522_v29  ;;  %v2096_v60 = vld [vmem:[#allocation3 + $0x25] sm:$0xff] }
 0x474   : > { %2021 = vst.msk [vmem:[#allocation3 + $0x77] sm:$0x4] %vm1540_vm1, %v4522_v29 }
 0x475   : > { %1989 = vst.msk [vmem:[#allocation3 + $0x6f] sm:$0x40] %vm1535_vm13, %v4522_v29 }
 0x476   : > { %1997 = vst.msk [vmem:[#allocation3 + $0x71] sm:$0x20] %vm1545_vm14, %v4522_v29 }
 0x477   : > { %2005 = vst.msk [vmem:[#allocation3 + $0x73] sm:$0x10] %vm1555_vm15, %v4522_v29  ;;  %v4556_v3 = vpop.permute.xlu2 %1685 }
 0x478   : > { %1981 = vst.msk [vmem:[#allocation3 + $0x6d] sm:$0xff] %vm1003_vm11, %v4522_v29  ;;  %v1569_v29 = vld [vmem:[#allocation3 + $0xb] sm:$0xff] }
 0x479   : > { %5164 = vst [vmem:[#allocation38_spill] sm:$0xff] %v4556_v3  ;;  %v1666_v3 = vmul.f32 0.14285715, %v4401_v27 }
 0x47f   : > { %v4570_v63 = vpop.permute.xlu2 %1733 }
 0x480   : > { %v1945_v32 = vpop.permute.xlu1 %1944  ;;  %v1943_v28 = vpop.permute.xlu0 %1942  ;;  %5166 = vst [vmem:[#allocation40_spill] sm:$0xff] %v4570_v63  ;;  %v4647_v63 = vld [vmem:[#allocation3 + $0x8] sm:$0xff] }
 0x481   : > { %v4560_v12 = vadd.f32 %v1945_v32, %v1887_v1  ;;  %v4576_v35 = vadd.f32 %v1943_v28, %v1886_v5  ;;  %v1891_v28 = vmul.f32 %v4130_v41, %v4453_v13  ;;  %v4615_v41 = vld [vmem:[#allocation3 + $0x4e] sm:$0xff] }
 0x482   : > { %v4617_v13 = vld [vmem:[#allocation3 + $0x4f] sm:$0xff] }
 0x483   : > { %5165 = vst [vmem:[#allocation39_spill] sm:$0xff] %v4560_v12 }
 0x484   : > { %1986 = vst.msk [vmem:[#allocation3 + $0xf] sm:$0x40] %vm1535_vm13, %v4560_v12 }
 0x485   : > { %1994 = vst.msk [vmem:[#allocation3 + $0x11] sm:$0x20] %vm1545_vm14, %v4560_v12 }
 0x486   : > { %5167 = vst [vmem:[#allocation41_spill] sm:$0xff] %v4576_v35 }
 0x487   : > { %2002 = vst.msk [vmem:[#allocation3 + $0x13] sm:$0x10] %vm1555_vm15, %v4560_v12  ;;  %v4611_v38 = vpop.permute.xlu2 %1697 }
 0x488   : > { %2010 = vst.msk [vmem:[#allocation3 + $0x15] sm:$0x8] %vm1550_vm2, %v4560_v12  ;;  %v1955_v1 = vpop.permute.xlu1 %1954  ;;  %v1953_v32 = vpop.permute.xlu0 %1952 }
 0x489   : > { %2018 = vst.msk [vmem:[#allocation3 + $0x17] sm:$0x4] %vm1540_vm1, %v4560_v12  ;;  %v4601_v40 = vadd.f32 %v1955_v1, %v1892_v62  ;;  %v4607_v5 = vadd.f32 %v1953_v32, %v1891_v28  ;;  %v4619_v62 = vld [vmem:[#allocation3 + $0x50] sm:$0xff] }
 0x48a   : > { %1982 = vst.msk [vmem:[#allocation3 + $0x3] sm:$0x2] %vm1530_vm0, %v4576_v35  ;;  %v4629_v28 = vld [vmem:[#allocation3 + $0x4d] sm:$0xff] }
 0x48b   : > { %1990 = vst.msk [vmem:[#allocation3 + $0x1] sm:$0x4] %vm1540_vm1, %v4576_v35 }
 0x48c   : > { %5169 = vst [vmem:[#allocation43_spill] sm:$0xff] %v4601_v40 }
 0x48d   : > { %1998 = vst.msk [vmem:[#allocation3 - $0x1] sm:$0x8] %vm1550_vm2, %v4576_v35 }
 0x48e   : > { %2006 = vst.msk [vmem:[#allocation3 - $0x3] sm:$0x10] %vm1555_vm15, %v4576_v35 }
 0x48f   : > { %5170 = vst [vmem:[#allocation44_spill] sm:$0xff] %v4607_v5  ;;  %v1802_v26 = vpop.permute.xlu2 %1801 }
 0x490   : > { %2014 = vst.msk [vmem:[#allocation3 - $0x5] sm:$0x20] %vm1545_vm14, %v4576_v35  ;;  %v1730_v1 = vpop.permute.xlu1 %1729  ;;  %v1690_v32 = vpop.permute.xlu0 %1689 }
 0x491   : > { %5171 = vst [vmem:[#allocation45_spill] sm:$0xff] %v4611_v38  ;;  %v4639_v38 = vld [vmem:[#allocation3 + $0x29] sm:$0xff] }
 0x492   : > { %2009 = vst.msk [vmem:[#allocation3 + $0x5d] sm:$0x10] %vm1555_vm15, %v4601_v40  ;;  %v2041_v15 = vadd.f32 %v4639_v38, %v4637_v48 }
 0x493   : > { %5172 = vst [vmem:[#allocation46_spill] sm:$0xff] %v4617_v13 }
 0x494   : > { %5173 = vst [vmem:[#allocation47_spill] sm:$0xff] %v4619_v62  ;;  %v2056_v62 = vadd.f32 %v2048_v14, %v2040_v55  ;;  %v2057_v37 = vadd.f32 %v4669_v51, %v2041_v15  ;;  %v1742_v15 = vmul.f32 %v1730_v1, %v1666_v3  ;;  %v1743_v14 = vmul.f32 %v1730_v1, %v1667_v39 }
 0x495   : > { %2017 = vst.msk [vmem:[#allocation3 + $0x5b] sm:$0x20] %vm1545_vm14, %v4601_v40 }
 0x496   : > { %1988 = vst.msk [vmem:[#allocation3 + $0x4f] sm:$0x40] %vm1535_vm13, %v4607_v5  ;;  %v2072_v13 = vadd.f32 %v2064_v36, %v2056_v62  ;;  %v2073_v33 = vadd.f32 %v2065_v43, %v2057_v37  ;;  %v2080_v37 = vld [vmem:[#allocation3 + $0x24] sm:$0xff]  ;;  %v2081_v36 = vld [vmem:[#allocation3 + $0x2c] sm:$0xff]  ;;  %v1592_v43 = vadd.f32 %v4593_v4, %v1576_v21  ;;  %vm2478_vm13 = vcmask 650752  }
 0x497   : > { %1996 = vst.msk [vmem:[#allocation3 + $0x51] sm:$0x20] %vm1545_vm14, %v4607_v5  ;;  %v2026_v62 = vld [vmem:[#allocation3 + $0x40] sm:$0xff]  ;;  %vm2500_vm14 = vcmask 781952  }
 0x498   : > { %2004 = vst.msk [vmem:[#allocation3 + $0x53] sm:$0x10] %vm1555_vm15, %v4607_v5  ;;  %v4663_v8 = vpop.permute.xlu1 %1725  ;;  %v2089_v61 = vadd.f32 %v2081_v36, %v2073_v33  ;;  %v1608_v21 = vadd.f32 %v4633_v10, %v1592_v43  ;;  %v2112_v36 = vld [vmem:[#allocation3 + $0x26] sm:$0xff]  ;;  %vm2522_vm15 = vcmask 913152  }
 0x499   : > { %2012 = vst.msk [vmem:[#allocation3 + $0x55] sm:$0x8] %vm1550_vm2, %v4607_v5 }
 0x49a   : > { %2020 = vst.msk [vmem:[#allocation3 + $0x57] sm:$0x4] %vm1540_vm1, %v4607_v5 }
 0x49b   : > { %1979 = vst.msk [vmem:[#allocation3 + $0x4d] sm:$0xff] %vm1003_vm11, %v4607_v5  ;;  %v4657_v5 = vld [vmem:[#allocation3 + $0x63] sm:$0xff] }
 0x49c   : > { %1974 = vst.msk [vmem:[#allocation3 + $0x5] sm:$0xff] %vm1003_vm11, %v4576_v35  ;;  %v4665_v35 = vpop.permute.xlu0 %1693 }
 0x49d   : > { %1975 = vst.msk [vmem:[#allocation3 + $0xd] sm:$0xff] %vm1003_vm11, %v4560_v12  ;;  %v4671_v12 = vld [vmem:[#allocation3 + $0x65] sm:$0xff] }
 0x49e   : > { %1985 = vst.msk [vmem:[#allocation3 + $0x63] sm:$0x2] %vm1530_vm0, %v4601_v40  ;;  %vm2544_vm0 = vcmask 1044352  }
 0x49f   : > { %5174 = vst [vmem:[#allocation48_spill] sm:$0xff] %v4663_v8  ;;  %v1703_v8 = vmul.f32 %v1690_v32, %v4293_v20 }
 0x4a0   : > { %5175 = vst [vmem:[#allocation49_spill] sm:$0xff] %v4665_v35  ;;  %v1577_v35 = vadd.f32 %v1569_v29, %v1561_v7  ;;  %v4682_v19 = vpop.permute.xlu1 %2243  ;;  %v4688_v7 = vpop.permute.xlu2 %2239  ;;  %v2088_v29 = vadd.f32 %v2080_v37, %v2072_v13  ;;  %v1580_v13 = vadd.f32 %v4494_v23, %v4492_v52 }
 0x4a1   : > { %1993 = vst.msk [vmem:[#allocation3 + $0x61] sm:$0x4] %vm1540_vm1, %v4601_v40  ;;  %v1751_v20 = vadd.f32 %v1743_v14, %v1703_v8  ;;  %vm2722_vm1 = vcmask 1043456  }
 0x4a2   : > { %2001 = vst.msk [vmem:[#allocation3 + $0x5f] sm:$0x8] %vm1550_vm2, %v4601_v40  ;;  %v1593_v27 = vadd.f32 %v1585_v18, %v1577_v35  ;;  %v4691_v3 = vld [vmem:[#allocation3 + $0x48] sm:$0xff]  ;;  %v2104_v33 = vadd.f32 %v2096_v60, %v2088_v29  ;;  %v2105_v18 = vadd.f32 %v2097_v50, %v2089_v61  ;;  %vm2718_vm2 = vcmask 31744  }
 0x4a3   : > { %1980 = vst.msk [vmem:[#allocation3 + $0x65] sm:$0xff] %vm1003_vm11, %v4601_v40  ;;  %v1702_v40 = vmul.f32 %v1690_v32, %v4317_v11  ;;  %v4693_v39 = vld [vmem:[#allocation3 + $0x49] sm:$0xff]  ;;  %v2030_v32 = vld [vmem:[#allocation3 + $0x1] sm:$0xff]  ;;  %v1815_v61 = vmul.f32 %v1802_v26, %v1751_v20 }
 0x4a4   : > { %5176 = vst [vmem:[#allocation50_spill] sm:$0xff] %v4682_v19  ;;  %v4684_v55 = vpop.permute.xlu0 %2203  ;;  %v2034_v19 = vld [vmem:[#allocation3 + $0x41] sm:$0xff]  ;;  %v1609_v35 = vadd.f32 %v1601_v56, %v1593_v27  ;;  %v2043_v4 = vadd.f32 %v4693_v39, %v4691_v3  ;;  %v2113_v56 = vld [vmem:[#allocation3 + $0x2e] sm:$0xff] }
 0x4a5   : > { %5177 = vst [vmem:[#allocation51_spill] sm:$0xff] %v4684_v55  ;;  %v2022_v55 = vld [vmem:[#allocation3] sm:$0xff]  ;;  %v1750_v11 = vadd.f32 %v1742_v15, %v1702_v40  ;;  %v4695_v1 = vld [vmem:[#allocation3 + $0x8] sm:$0xff]  ;;  %v2042_v14 = vadd.f32 %v2034_v19, %v2026_v62  ;;  %v2121_v50 = vadd.f32 %v2113_v56, %v2105_v18  ;;  %v1624_v19 = vadd.f32 %v4643_v53, %v1608_v21 }
 0x4a6   : > { %5178 = vst [vmem:[#allocation52_spill] sm:$0xff] %v4688_v7  ;;  %v4697_v7 = vld [vmem:[#allocation3 + $0x9] sm:$0xff]  ;;  %v2038_v37 = vadd.f32 %v2030_v32, %v2022_v55  ;;  %v1625_v23 = vadd.f32 %v4564_v24, %v1609_v35  ;;  %v2120_v55 = vadd.f32 %v2112_v36, %v2104_v33  ;;  %v1583_v35 = vadd.f32 %v4540_v0, %v4538_v17 }
 0x4a7   : > { %5179 = vst [vmem:[#allocation53_spill] sm:$0xff] %v4697_v7  ;;  %v2039_v8 = vadd.f32 %v4697_v7, %v4695_v1  ;;  %v1814_v29 = vmul.f32 %v1802_v26, %v1750_v11  ;;  %v4710_v43 = vld [vmem:[#allocation3 + $0x4a] sm:$0xff]  ;;  %v2046_v60 = vld [vmem:[#allocation3 + $0x2] sm:$0xff]  ;;  %v1581_v33 = vadd.f32 %v4504_v6, %v4502_v30  ;;  %v1640_v30 = vadd.f32 %v4645_v31, %v1624_v19 }
 0x4a8   : > { %v1770_v40 = vpop.permute.xlu1 %1769  ;;  %v4712_v52 = vld [vmem:[#allocation3 + $0xa] sm:$0xff]  ;;  %v4716_v62 = vpop.permute.xlu2 %1773  ;;  %v2054_v7 = vadd.f32 %v2046_v60, %v2038_v37  ;;  %v2050_v53 = vld [vmem:[#allocation3 + $0x42] sm:$0xff]  ;;  %v1599_v31 = vadd.f32 %v4542_v2, %v1583_v35 }
 0x4a9   : > { %v1782_v27 = vmul.f32 %v4390_v22, %v1770_v40  ;;  %v1783_v10 = vmul.f32 %v4372_v47, %v1770_v40  ;;  %v2059_v40 = vadd.f32 %v4710_v43, %v2043_v4  ;;  %v1596_v47 = vadd.f32 %v4496_v44, %v1580_v13  ;;  %v2128_v18 = vld [vmem:[#allocation3 + $0x27] sm:$0xff]  ;;  %v2129_v21 = vld [vmem:[#allocation3 + $0x2f] sm:$0xff] }
 0x4aa   : > { %v2028_v32 = vld [vmem:[#allocation3 + $0x60] sm:$0xff]  ;;  %v4719_v11 = vld [vmem:[#allocation3 + $0x68] sm:$0xff]  ;;  %v2055_v24 = vadd.f32 %v4712_v52, %v2039_v8  ;;  %v2058_v56 = vadd.f32 %v2050_v53, %v2042_v14  ;;  %v2136_v44 = vadd.f32 %v2128_v18, %v2120_v55  ;;  %v2137_v13 = vadd.f32 %v2129_v21, %v2121_v50  ;;  %v2143_v55 = vld [vmem:[#allocation3 + $0x30] sm:$0xff] }
 0x4ab   : > { %v1823_v22 = vadd.f32 %v1815_v61, %v1783_v10  ;;  %v2036_v26 = vld [vmem:[#allocation3 + $0x61] sm:$0xff]  ;;  %v4721_v20 = vld [vmem:[#allocation3 + $0x69] sm:$0xff]  ;;  %v1597_v61 = vadd.f32 %v4506_v59, %v1581_v33  ;;  %v1612_v60 = vadd.f32 %v4498_v46, %v1596_v47  ;;  %v1656_v59 = vadd.f32 %v4647_v63, %v1640_v30  ;;  %v2155_v18 = vld [vmem:[#allocation3 + $0x31] sm:$0xff] }
 0x4ac   : > { %v4706_v15 = vpop.permute.xlu0 %1737  ;;  %v2067_v37 = vld [vmem:[#allocation3 + $0x4b] sm:$0xff]  ;;  %v2044_v8 = vadd.f32 %v2036_v26, %v2028_v32  ;;  %v2045_v17 = vadd.f32 %v4721_v20, %v4719_v11  ;;  %v2062_v0 = vld [vmem:[#allocation3 + $0x3] sm:$0xff] }
 0x4ad   : > { %5180 = vst [vmem:[#allocation54_spill] sm:$0xff] %v4706_v15  ;;  %v1822_v15 = vadd.f32 %v1814_v29, %v1782_v27  ;;  %v4733_v36 = vadd.f32 %v1823_v22, %v4210_v16  ;;  %v2063_v27 = vld [vmem:[#allocation3 + $0xb] sm:$0xff]  ;;  %v2075_v6 = vadd.f32 %v2067_v37, %v2059_v40  ;;  %v2070_v10 = vadd.f32 %v2062_v0, %v2054_v7  ;;  %v2066_v14 = vld [vmem:[#allocation3 + $0x43] sm:$0xff] }
 0x4ae   : > { %v2071_v29 = vadd.f32 %v2063_v27, %v2055_v24  ;;  %v1582_v16 = vadd.f32 %v4657_v5, %v4655_v57  ;;  %v2074_v50 = vadd.f32 %v2066_v14, %v2058_v56  ;;  %v2052_v7 = vld [vmem:[#allocation3 + $0x62] sm:$0xff]  ;;  %v4748_v32 = vld [vmem:[#allocation3 + $0x6a] sm:$0xff]  ;;  %v1628_v47 = vadd.f32 %v4512_v9, %v1612_v60  ;;  %v2167_v60 = vld [vmem:[#allocation3 + $0x32] sm:$0xff] }
 0x4af   : > { %v4730_v4 = vadd.f32 %v1822_v15, %v4208_v42  ;;  %v1641_v42 = vadd.f32 %v4566_v34, %v1625_v23  ;;  %v2148_v34 = vadd.f32 %v2136_v44, %v4637_v48  ;;  %v2149_v23 = vadd.f32 %v2143_v55, %v2137_v13  ;;  %v2083_v57 = vld [vmem:[#allocation3 + $0x4c] sm:$0xff]  ;;  %v2078_v40 = vld [vmem:[#allocation3 + $0x4] sm:$0xff] }
 0x4b0   : > { %v4741_v22 = vpop.permute.xlu1 %2207  ;;  %v2060_v5 = vadd.f32 %v2052_v7, %v2044_v8  ;;  %v2061_v19 = vadd.f32 %v4748_v32, %v2045_v17  ;;  %v2079_v26 = vld [vmem:[#allocation3 + $0xc] sm:$0xff]  ;;  %v2091_v24 = vadd.f32 %v2083_v57, %v2075_v6  ;;  %v2086_v46 = vadd.f32 %v2078_v40, %v2070_v10  ;;  %v2082_v53 = vld [vmem:[#allocation3 + $0x44] sm:$0xff]  ;;  %v4757_v21 = vpop.permute.xlu2 %2211 }
 0x4b1   : > { %v2087_v2 = vadd.f32 %v2079_v26, %v2071_v29  ;;  %v1598_v35 = vadd.f32 %v4659_v25, %v1582_v16  ;;  %v1613_v33 = vadd.f32 %v4629_v28, %v1597_v61  ;;  %v1657_v48 = vadd.f32 %v4568_v45, %v1641_v42  ;;  %v2068_v13 = vld [vmem:[#allocation3 + $0x63] sm:$0xff]  ;;  %v2069_v63 = vld [vmem:[#allocation3 + $0x6b] sm:$0xff] }
 0x4b2   : > { %v1615_v56 = vadd.f32 %v4534_v49, %v1599_v31  ;;  %v2090_v44 = vadd.f32 %v2082_v53, %v2074_v50  ;;  %v2160_v37 = vadd.f32 %v2148_v34, %v4639_v38  ;;  %v2161_v9 = vadd.f32 %v2155_v18, %v2149_v23  ;;  %v2099_v8 = vld [vmem:[#allocation3 + $0x4d] sm:$0xff]  ;;  %v2094_v25 = vld [vmem:[#allocation3 + $0x5] sm:$0xff] }
 0x4b3   : > { %v2076_v17 = vadd.f32 %v2068_v13, %v2060_v5  ;;  %v2077_v0 = vadd.f32 %v2069_v63, %v2061_v19  ;;  %v2095_v27 = vld [vmem:[#allocation3 + $0xd] sm:$0xff]  ;;  %v1664_v30 = vmul.f32 0.14285715, %v1656_v59  ;;  %v2107_v28 = vadd.f32 %v2099_v8, %v2091_v24  ;;  %v2098_v42 = vld [vmem:[#allocation3 + $0x45] sm:$0xff]  ;;  %v5188_v63 = vld [vmem:[#allocation33_spill] sm:$0xff] }
 0x4b4   : > { %v4743_v15 = vpop.permute.xlu0 %2199  ;;  %v1644_v45 = vadd.f32 %v4514_v58, %v1628_v47  ;;  %v2102_v6 = vadd.f32 %v2094_v25, %v2086_v46  ;;  %v2103_v10 = vadd.f32 %v2095_v27, %v2087_v2  ;;  %v1614_v29 = vadd.f32 %v4671_v12, %v1598_v35  ;;  %v2114_v16 = vld [vmem:[#allocation3 + $0x46] sm:$0xff]  ;;  %v2115_v23 = vld [vmem:[#allocation3 + $0x4e] sm:$0xff] }
 0x4b5   : > { %v1629_v38 = vadd.f32 %v4615_v41, %v1613_v33  ;;  %v1665_v61 = vmul.f32 0.14285715, %v1657_v48  ;;  %v1631_v55 = vadd.f32 %v4528_v54, %v1615_v56  ;;  %v2106_v31 = vadd.f32 %v2098_v42, %v2090_v44  ;;  %v2084_v50 = vld [vmem:[#allocation3 + $0x64] sm:$0xff]  ;;  %v2085_v7 = vld [vmem:[#allocation3 + $0x6c] sm:$0xff] }
 0x4b6   : > { %v2172_v58 = vadd.f32 %v2160_v37, %v4669_v51  ;;  %v2173_v34 = vadd.f32 %v2167_v60, %v2161_v9  ;;  %v2092_v57 = vadd.f32 %v2084_v50, %v2076_v17  ;;  %v2093_v12 = vadd.f32 %v2085_v7, %v2077_v0  ;;  %v2110_v5 = vld [vmem:[#allocation3 + $0x6] sm:$0xff]  ;;  %v2111_v19 = vld [vmem:[#allocation3 + $0xe] sm:$0xff] }
 0x4b7   : > { %v5181_v40 = vld [vmem:[#allocation48_spill] sm:$0xff]  ;;  %v2122_v41 = vadd.f32 %v2114_v16, %v2106_v31  ;;  %v2123_v24 = vadd.f32 %v2115_v23, %v2107_v28  ;;  %v5182_v47 = vld [vmem:[#allocation31_spill] sm:$0xff]  ;;  %v2118_v54 = vadd.f32 %v2110_v5, %v2102_v6  ;;  %v2119_v2 = vadd.f32 %v2111_v19, %v2103_v10  ;;  %v5185_v51 = vld [vmem:[#allocation38_spill] sm:$0xff] }
 0x4b8   : > { %v1766_v49 = vpop.permute.xlu1 %1765  ;;  %v1740_v26 = vmul.f32 %v5181_v40, %v1664_v30  ;;  %v1741_v59 = vmul.f32 %v5181_v40, %v1665_v61  ;;  %v1660_v46 = vadd.f32 %v5182_v47, %v1644_v45  ;;  %v5183_v35 = vld [vmem:[#allocation35_spill] sm:$0xff]  ;;  %v5184_v33 = vld [vmem:[#allocation20_spill] sm:$0xff]  ;;  %v5187_v44 = vld [vmem:[#allocation46_spill] sm:$0xff]  ;;  %v1647_v37 = vadd.f32 %v5188_v63, %v1631_v55  ;;  %v2316_v10 = vpop.permute.xlu2 %2315 }
 0x4b9   : > { %v1630_v53 = vadd.f32 %v5183_v35, %v1614_v29  ;;  %v1700_v48 = vmul.f32 %v5185_v51, %v5184_v33  ;;  %v5186_v18 = vld [vmem:[#allocation19_spill] sm:$0xff]  ;;  %v1645_v13 = vadd.f32 %v5187_v44, %v1629_v38  ;;  %v2180_v17 = vmul.f32 0.09090909, %v2172_v58  ;;  %v5189_v55 = vld [vmem:[#allocation50_spill] sm:$0xff] }
 0x4ba   : > { %v1701_v56 = vmul.f32 %v5185_v51, %v5186_v18  ;;  %v2100_v9 = vld [vmem:[#allocation3 + $0x65] sm:$0xff]  ;;  %v2101_v8 = vld [vmem:[#allocation3 + $0x6d] sm:$0xff]  ;;  %v2181_v0 = vmul.f32 0.09090909, %v2173_v34 }
 0x4bb   : > { %v2130_v25 = vld [vmem:[#allocation3 + $0x47] sm:$0xff]  ;;  %v2131_v27 = vld [vmem:[#allocation3 + $0x4f] sm:$0xff]  ;;  %v2108_v30 = vadd.f32 %v2100_v9, %v2092_v57  ;;  %v2109_v28 = vadd.f32 %v2101_v8, %v2093_v12  ;;  %v1748_v16 = vadd.f32 %v1740_v26, %v1700_v48  ;;  %v2256_v31 = vmul.f32 %v5189_v55, %v2180_v17 }
 0x4bc   : > { %v4763_v14 = vpop.permute.xlu0 %2247  ;;  %v2126_v45 = vld [vmem:[#allocation3 + $0x7] sm:$0xff]  ;;  %v2127_v6 = vld [vmem:[#allocation3 + $0xf] sm:$0xff]  ;;  %v2138_v29 = vadd.f32 %v2130_v25, %v2122_v41  ;;  %v2139_v42 = vadd.f32 %v2131_v27, %v2123_v24  ;;  %v1749_v61 = vadd.f32 %v1741_v59, %v1701_v56  ;;  %v2257_v50 = vmul.f32 %v5189_v55, %v2181_v0 }
 0x4bd   : > { %v2134_v38 = vadd.f32 %v2126_v45, %v2118_v54  ;;  %v2135_v60 = vadd.f32 %v2127_v6, %v2119_v2  ;;  %v4783_v34 = vld [vmem:[%s3422_s7] sm:$0xff]  ;;  %v4787_v57 = vld [vmem:[%s3422_s7 + $0x8] sm:$0xff]  ;;  %v5192_v47 = vld [vmem:[#allocation26_spill] sm:$0xff] }
 0x4be   : > { %v1780_v23 = vmul.f32 %v4783_v34, %v1766_v49  ;;  %v1781_v12 = vmul.f32 %v4787_v57, %v1766_v49  ;;  %v2116_v40 = vld [vmem:[#allocation3 + $0x66] sm:$0xff]  ;;  %v2117_v26 = vld [vmem:[#allocation3 + $0x6e] sm:$0xff]  ;;  %v2150_v48 = vadd.f32 %v2138_v29, %v4691_v3  ;;  %v5196_v45 = vld [vmem:[#allocation13_spill] sm:$0xff] }
 0x4bf   : > { %v5190_v59 = vld [vmem:[#allocation28_spill] sm:$0xff]  ;;  %v5191_v41 = vld [vmem:[#allocation51_spill] sm:$0xff]  ;;  %v2124_v35 = vadd.f32 %v2116_v40, %v2108_v30  ;;  %v2125_v33 = vadd.f32 %v2117_v26, %v2109_v28  ;;  %v2146_v9 = vadd.f32 %v2134_v38, %v4695_v1  ;;  %v5197_v3 = vld [vmem:[#allocation34_spill] sm:$0xff] }
 0x4c0   : > { %v4780_v7 = vpop.permute.xlu1 %1805  ;;  %v2216_v24 = vmul.f32 %v5191_v41, %v5190_v59  ;;  %v2217_v54 = vmul.f32 %v5191_v41, %v5192_v47  ;;  %v2144_v2 = vld [vmem:[#allocation3 + $0x50] sm:$0xff]  ;;  %v5193_v49 = vld [vmem:[#allocation47_spill] sm:$0xff]  ;;  %v1663_v29 = vadd.f32 %v5197_v3, %v1647_v37  ;;  %v2162_v38 = vadd.f32 %v2150_v48, %v4693_v39 }
 0x4c1   : > { %v2142_v51 = vld [vmem:[#allocation3 + $0x10] sm:$0xff]  ;;  %v2151_v18 = vadd.f32 %v2144_v2, %v2139_v42  ;;  %v1661_v63 = vadd.f32 %v5193_v49, %v1645_v13  ;;  %v5195_v25 = vld [vmem:[#allocation15_spill] sm:$0xff]  ;;  %v5201_v2 = vld [vmem:[#allocation25_spill] sm:$0xff] }
 0x4c2   : > { %v2147_v8 = vadd.f32 %v2142_v51, %v2135_v60  ;;  %v5194_v17 = vld [vmem:[#allocation36_spill] sm:$0xff]  ;;  %v2132_v30 = vld [vmem:[#allocation3 + $0x67] sm:$0xff]  ;;  %v2265_v1 = vadd.f32 %v2257_v50, %v2217_v54  ;;  %v5202_v50 = vld [vmem:[#allocation21_spill] sm:$0xff]  ;;  %v2280_v51 = vpop.permute.xlu2 %2279  ;;  %v2174_v49 = vadd.f32 %v2162_v38, %v4710_v43 }
 0x4c3   : > { %v1646_v0 = vadd.f32 %v5194_v17, %v1630_v53  ;;  %v2133_v28 = vld [vmem:[#allocation3 + $0x6f] sm:$0xff]  ;;  %v1669_v60 = vmul.f32 0.14285715, %v1661_v63 }
 0x4c4   : > { %v1798_v58 = vpop.permute.xlu0 %1797  ;;  %v2156_v42 = vld [vmem:[#allocation3 + $0x51] sm:$0xff]  ;;  %v2141_v55 = vadd.f32 %v2133_v28, %v2125_v33  ;;  %v2329_v37 = vmul.f32 %v2316_v10, %v2265_v1  ;;  %v5200_v41 = vld [vmem:[#allocation27_spill] sm:$0xff]  ;;  %v1671_v28 = vmul.f32 0.14285715, %v1663_v29 }
 0x4c5   : > { %v1812_v5 = vmul.f32 %v1798_v58, %v1748_v16  ;;  %v1813_v19 = vmul.f32 %v1798_v58, %v1749_v61  ;;  %v1668_v16 = vmul.f32 0.14285715, %v1660_v46  ;;  %v2140_v61 = vadd.f32 %v2132_v30, %v2124_v35  ;;  %v2154_v13 = vld [vmem:[#allocation3 + $0x11] sm:$0xff] }
 0x4c6   : > { %v2264_v58 = vadd.f32 %v2256_v31, %v2216_v24  ;;  %v2163_v53 = vadd.f32 %v2156_v42, %v2151_v18  ;;  %v2145_v31 = vld [vmem:[#allocation3 + $0x70] sm:$0xff]  ;;  %v5203_v24 = vld [vmem:[#allocation49_spill] sm:$0xff] }
 0x4c7   : > { %v1820_v56 = vadd.f32 %v1812_v5, %v1780_v23  ;;  %v1821_v44 = vadd.f32 %v1813_v19, %v1781_v12  ;;  %v5198_v23 = vld [vmem:[#allocation53_spill] sm:$0xff]  ;;  %v2159_v5 = vadd.f32 %v2154_v13, %v2147_v8  ;;  %v1704_v39 = vmul.f32 %v5203_v24, %v5202_v50  ;;  %v5204_v54 = vld [vmem:[#allocation24_spill] sm:$0xff] }
 0x4c8   : > { %v2158_v12 = vadd.f32 %v2146_v9, %v5198_v23  ;;  %v5199_v19 = vld [vmem:[#allocation37_spill] sm:$0xff]  ;;  %v2284_v26 = vpop.permute.xlu1 %2283  ;;  %v2328_v46 = vmul.f32 %v2316_v10, %v2264_v58  ;;  %v1705_v33 = vmul.f32 %v5203_v24, %v5204_v54  ;;  %v2152_v18 = vadd.f32 %v2140_v61, %v4719_v11  ;;  %v5205_v8 = vld [vmem:[#allocation40_spill] sm:$0xff]  ;;  %v5212_v24 = vld [vmem:[#allocation22_spill] sm:$0xff] }
 0x4c9   : > { %v4799_v27 = vadd.f32 %v1820_v56, %v5195_v25  ;;  %v4802_v6 = vadd.f32 %v1821_v44, %v5196_v45  ;;  %v1662_v40 = vadd.f32 %v5199_v19, %v1646_v0  ;;  %v2296_v47 = vmul.f32 %v5200_v41, %v2284_v26  ;;  %v2168_v48 = vld [vmem:[#allocation3 + $0x52] sm:$0xff]  ;;  %v5209_v41 = vld [vmem:[#allocation39_spill] sm:$0xff]  ;;  %v5213_v54 = vld [vmem:[#allocation30_spill] sm:$0xff] }
 0x4ca   : > { %v2297_v35 = vmul.f32 %v5201_v2, %v2284_v26  ;;  %v2153_v56 = vadd.f32 %v2145_v31, %v2141_v55  ;;  %v2166_v44 = vld [vmem:[#allocation3 + $0x12] sm:$0xff]  ;;  %v2175_v10 = vadd.f32 %v2168_v48, %v2163_v53  ;;  %v1744_v17 = vmul.f32 %v5205_v8, %v1668_v16 }
 0x4cb   : > { %v2336_v63 = vadd.f32 %v2328_v46, %v2296_v47  ;;  %v1745_v0 = vmul.f32 %v5205_v8, %v1669_v60  ;;  %v2170_v25 = vadd.f32 %v2158_v12, %v4712_v52  ;;  %v2171_v45 = vadd.f32 %v2166_v44, %v2159_v5  ;;  %v2157_v42 = vld [vmem:[#allocation3 + $0x71] sm:$0xff]  ;;  %v5207_v12 = vld [vmem:[#allocation54_spill] sm:$0xff] }
 0x4cc   : > { %v4808_v59 = vpop.permute.xlu0 %2251  ;;  %v2337_v9 = vadd.f32 %v2329_v37, %v2297_v35  ;;  %v1670_v30 = vmul.f32 0.14285715, %v1662_v40  ;;  %v1752_v61 = vadd.f32 %v1744_v17, %v1704_v39  ;;  %v2164_v55 = vadd.f32 %v2152_v18, %v4721_v20  ;;  %v5206_v58 = vld [vmem:[#allocation29_spill] sm:$0xff]  ;;  %v3175_v1 = vld [vmem:[%s3422_s7 + $0x28] sm:$0xff]  ;;  %v5210_v35 = vld [vmem:[#allocation23_spill] sm:$0xff] }
 0x4cd   : > { %v2352_v3 = vadd.f32 %v4730_v4, %v2336_v63  ;;  %v1753_v43 = vadd.f32 %v1745_v0, %v1705_v33  ;;  %v2165_v13 = vadd.f32 %v2157_v42, %v2153_v56  ;;  %v1784_v16 = vmul.f32 %v5206_v58, %v4716_v62  ;;  %v2169_v26 = vld [vmem:[#allocation3 + $0x72] sm:$0xff] }
 0x4ce   : > { %v2353_v11 = vadd.f32 %v4733_v36, %v2337_v9  ;;  %v1785_v38 = vmul.f32 %v3175_v1, %v4716_v62  ;;  %v2182_v52 = vmul.f32 0.09090909, %v2174_v49  ;;  %v2183_v53 = vmul.f32 0.09090909, %v2175_v10  ;;  %v5208_v46 = vld [vmem:[#allocation41_spill] sm:$0xff]  ;;  %v5215_v18 = vld [vmem:[#allocation52_spill] sm:$0xff] }
 0x4cf   : > { %2360 = vst.msk [vmem:[#allocation4 + $0x10] sm:$0xff] %vm1003_vm11, %v2352_v3  ;;  %v2178_v29 = vmul.f32 0.09090909, %v2170_v25  ;;  %v2179_v4 = vmul.f32 0.09090909, %v2171_v45  ;;  %v1816_v36 = vmul.f32 %v4780_v7, %v1752_v61  ;;  %v1817_v60 = vmul.f32 %v4780_v7, %v1753_v43  ;;  %v5211_v31 = vld [vmem:[#allocation45_spill] sm:$0xff] }
 0x4d0   : > { %2361 = vst.msk [vmem:[#allocation4 + $0x18] sm:$0xff] %vm1003_vm11, %v2353_v11  ;;  %v1810_v20 = vpop.permute.xlu1 %1809  ;;  %v1746_v5 = vmul.f32 %v5207_v12, %v1670_v30  ;;  %v1747_v19 = vmul.f32 %v5207_v12, %v1671_v28  ;;  %v2258_v62 = vmul.f32 %v4763_v14, %v2182_v52  ;;  %v2259_v40 = vmul.f32 %v4763_v14, %v2183_v53  ;;  %v5214_v14 = vld [vmem:[#allocation44_spill] sm:$0xff]  ;;  %v5216_v11 = vld [vmem:[#allocation17_spill] sm:$0xff]  ;;  %v5217_v61 = vld [vmem:[#allocation18_spill] sm:$0xff] }
 0x4d1   : > { %v2214_v37 = vmul.f32 %v4743_v15, %v5208_v46  ;;  %v2215_v47 = vmul.f32 %v4743_v15, %v5209_v41  ;;  %v2176_v7 = vadd.f32 %v2164_v55, %v4748_v32  ;;  %v2177_v2 = vadd.f32 %v2169_v26, %v2165_v13  ;;  %v2320_v15 = vpop.permute.xlu2 %2319  ;;  %v5219_v26 = vld [vmem:[#allocation43_spill] sm:$0xff]  ;;  %v5220_v46 = vld [vmem:[#allocation32_spill] sm:$0xff] }
 0x4d2   : > { %v1706_v50 = vmul.f32 %v5211_v31, %v5210_v35  ;;  %v1707_v39 = vmul.f32 %v5211_v31, %v5212_v24  ;;  %v2218_v33 = vmul.f32 %v4741_v22, %v5213_v54  ;;  %v2219_v48 = vmul.f32 %v4741_v22, %v5214_v14  ;;  %v5221_v14 = vld [vmem:[#allocation14_spill] sm:$0xff] }
 0x4d3   : > { %v2254_v56 = vmul.f32 %v5215_v18, %v2178_v29  ;;  %v2255_v44 = vmul.f32 %v5215_v18, %v2179_v4  ;;  %v1824_v49 = vadd.f32 %v1816_v36, %v1784_v16  ;;  %v1825_v32 = vadd.f32 %v1817_v60, %v1785_v38  ;;  %v3176_v60 = vld [vmem:[%s3422_s7 + $0x38] sm:$0xff]  ;;  %v5222_v18 = vld [vmem:[#allocation16_spill] sm:$0xff]  ;;  %s3312_s7 = smov 32  }
 0x4d4   : > { %v1778_v23 = vpop.permute.xlu0 %1777  ;;  %v2266_v10 = vadd.f32 %v2258_v62, %v2218_v33  ;;  %v2267_v63 = vadd.f32 %v2259_v40, %v2219_v48  ;;  %v1754_v9 = vadd.f32 %v1746_v5, %v1706_v50  ;;  %v1755_v8 = vadd.f32 %v1747_v19, %v1707_v39 }
 0x4d5   : > { %v2184_v17 = vmul.f32 0.09090909, %v2176_v7  ;;  %v2185_v0 = vmul.f32 0.09090909, %v2177_v2  ;;  %v2262_v25 = vadd.f32 %v2254_v56, %v2214_v37  ;;  %v2263_v45 = vadd.f32 %v2255_v44, %v2215_v47 }
 0x4d6   : > { %v2294_v30 = vmul.f32 %v4783_v34, %v2280_v51  ;;  %v2295_v28 = vmul.f32 %v4787_v57, %v2280_v51  ;;  %v2330_v22 = vmul.f32 %v2320_v15, %v2266_v10  ;;  %v2331_v3 = vmul.f32 %v2320_v15, %v2267_v63  ;;  %v5218_v51 = vld [vmem:[#allocation42_spill] sm:$0xff]  ;;  %v2415_v24 = vld [vmem:[#allocation4 + $0x12] sm:$0x1]  ;;  %v2393_v39 = vld [vmem:[#allocation4 + $0x11] sm:$0x1] }
 0x4d7   : > { %v2346_v42 = vadd.f32 %v1824_v49, %v5216_v11  ;;  %v2347_v43 = vadd.f32 %v1825_v32, %v5217_v61  ;;  %v2260_v55 = vmul.f32 %v4808_v59, %v2184_v17  ;;  %v2261_v13 = vmul.f32 %v4808_v59, %v2185_v0  ;;  %v2566_v54 = vld [vmem:[#allocation4 + $0x19] sm:$0x1]  ;;  %v4871_v33 = vld [vmem:[#allocation4 + $0x13] sm:$0x1]  ;;  %v2608_v10 = vld [vmem:[#allocation4 + $0x1b] sm:$0x1] }
 0x4d8   : > { %v2312_v16 = vpop.permute.xlu1 %2311  ;;  %v1818_v4 = vmul.f32 %v1810_v20, %v1754_v9  ;;  %v1819_v57 = vmul.f32 %v1810_v20, %v1755_v8  ;;  %v1786_v36 = vmul.f32 %v5218_v51, %v1778_v23  ;;  %v1787_v12 = vmul.f32 %v3176_v60, %v1778_v23  ;;  %v4876_v0 = vld [vmem:[#allocation4 + $0x1a] sm:$0x1] }
 0x4d9   : > { %v2326_v52 = vmul.f32 %v2312_v16, %v2262_v25  ;;  %v2327_v53 = vmul.f32 %v2312_v16, %v2263_v45  ;;  %v2220_v59 = vmul.f32 %v4757_v21, %v5219_v26  ;;  %v2221_v37 = vmul.f32 %v4757_v21, %v5220_v46  ;;  %v4878_v25 = vld [vmem:[#allocation4 + $0x1c] sm:$0x1]  ;;  %v4889_v16 = vld [vmem:[#allocation4 + $0x1e] sm:$0x1] }
 0x4da   : > { %v1826_v47 = vadd.f32 %v1818_v4, %v1786_v36  ;;  %v1827_v7 = vadd.f32 %v1819_v57, %v1787_v12  ;;  %v2422_v49 = vrot.slane %v2415_v24, 7  ;;  %v2400_v32 = vrot.slane %v2393_v39, 7 }
 0x4db   : > { %v2334_v5 = vadd.f32 %v2326_v52, %v2294_v30  ;;  %v2335_v19 = vadd.f32 %v2327_v53, %v2295_v28  ;;  %v2268_v23 = vadd.f32 %v2260_v55, %v2220_v59  ;;  %v2269_v2 = vadd.f32 %v2261_v13, %v2221_v37  ;;  %v4887_v13 = vld [vmem:[#allocation4 + $0x16] sm:$0x1] }
 0x4dc   : > { %v2288_v38 = vpop.permute.xlu0 %2287  ;;  %v2348_v48 = vadd.f32 %v1826_v47, %v5221_v14  ;;  %v2349_v56 = vadd.f32 %v1827_v7, %v5222_v18  ;;  %v2573_v8 = vrot.slane %v2566_v54, 7  ;;  %v2444_v17 = vrot.slane %v4871_v33, 7 }
 0x4dd   : > { %v2298_v29 = vmul.f32 %v5206_v58, %v2288_v38  ;;  %v2299_v34 = vmul.f32 %v3175_v1, %v2288_v38  ;;  %v2350_v41 = vadd.f32 %v4799_v27, %v2334_v5  ;;  %v2351_v58 = vadd.f32 %v4802_v6, %v2335_v19 }
 0x4de   : > { %v2615_v55 = vrot.slane %v2608_v10, 7  ;;  %v2678_v47 = vrot.slane %v4889_v16, 7 }
 0x4df   : > { %v2338_v62 = vadd.f32 %v2330_v22, %v2298_v29  ;;  %v2339_v40 = vadd.f32 %v2331_v3, %v2299_v34  ;;  %2358 = vst.msk [vmem:[#allocation4] sm:$0xff] %vm1003_vm11, %v2350_v41  ;;  %v4880_v22 = vld [vmem:[#allocation4 + $0x15] sm:$0x1]  ;;  %v4882_v3 = vld [vmem:[#allocation4 + $0x14] sm:$0x1]  ;;  %v2594_v29 = vrot.slane %v4876_v0, 7 }
 0x4e0   : > { %2359 = vst.msk [vmem:[#allocation4 + $0x8] sm:$0xff] %vm1003_vm11, %v2351_v58  ;;  %v2324_v35 = vpop.permute.xlu1 %2323  ;;  %v2488_v46 = vrot.slane %v4880_v22, 7  ;;  %v2466_v37 = vrot.slane %v4882_v3, 7 }
 0x4e1   : > { %v2354_v1 = vadd.f32 %v2346_v42, %v2338_v62  ;;  %v2355_v20 = vadd.f32 %v2347_v43, %v2339_v40  ;;  %v2332_v21 = vmul.f32 %v2324_v35, %v2268_v23  ;;  %v2333_v50 = vmul.f32 %v2324_v35, %v2269_v2 }
 0x4e2   : > { %v2636_v40 = vrot.slane %v4878_v25, 7 }
 0x4e3   : > { %2362 = vst.msk [vmem:[#allocation4 + $0x20] sm:$0xff] %vm1003_vm11, %v2354_v1 }
 0x4e4   : > { %v2292_v31 = vpop.permute.xlu0 %2291  ;;  %2363 = vst.msk [vmem:[#allocation4 + $0x28] sm:$0xff] %vm1003_vm11, %v2355_v20  ;;  %v2510_v20 = vrot.slane %v4887_v13, 7 }
 0x4e5   : > { %v2300_v27 = vmul.f32 %v5218_v51, %v2292_v31  ;;  %v2301_v6 = vmul.f32 %v3176_v60, %v2292_v31 }
 0x4e6   : > { %v2414_v45 = vld [vmem:[#allocation4 + $0x2] sm:$0x1]  ;;  %v2392_v30 = vld [vmem:[#allocation4 + $0x1] sm:$0x1]  ;;  %v2436_v28 = vld [vmem:[#allocation4 + $0x3] sm:$0x1] }
 0x4e7   : > { %v2340_v44 = vadd.f32 %v2332_v21, %v2300_v27  ;;  %v2341_v15 = vadd.f32 %v2333_v50, %v2301_v6  ;;  %v2565_v11 = vld [vmem:[#allocation4 + $0x9] sm:$0x1]  ;;  %v2423_v42 = vsel %vm2375_vm3, %v2422_v49, %v2414_v45  ;;  %v2401_v61 = vsel %vm2375_vm3, %v2400_v32, %v2392_v30  ;;  %v2607_v43 = vld [vmem:[#allocation4 + $0xb] sm:$0x1]  ;;  %v2586_v62 = vld [vmem:[#allocation4 + $0xa] sm:$0x1] }
 0x4e8   : > { %v2574_v38 = vsel %vm2375_vm3, %v2573_v8, %v2565_v11  ;;  %v2424_v4 = vsel %vm2377_vm4, %v2422_v49, %v2423_v42  ;;  %v2402_v5 = vsel %vm2377_vm4, %v2400_v32, %v2401_v61  ;;  %v2445_v26 = vsel %vm2375_vm3, %v2444_v17, %v2436_v28  ;;  %v2628_v31 = vld [vmem:[#allocation4 + $0xc] sm:$0x1]  ;;  %v2480_v24 = vld [vmem:[#allocation4 + $0x5] sm:$0x1]  ;;  %v2458_v25 = vld [vmem:[#allocation4 + $0x4] sm:$0x1] }
 0x4e9   : > { %v2356_v63 = vadd.f32 %v2348_v48, %v2340_v44  ;;  %v2357_v9 = vadd.f32 %v2349_v56, %v2341_v15  ;;  %v2575_v60 = vsel %vm2377_vm4, %v2573_v8, %v2574_v38  ;;  %v2616_v59 = vsel %vm2375_vm3, %v2615_v55, %v2607_v43 }
 0x4ea   : > { %v2416_v52 = vld [vmem:[#allocation4 + $0x22] sm:$0x1]  ;;  %v2394_v53 = vld [vmem:[#allocation4 + $0x21] sm:$0x1]  ;;  %v4895_v36 = vld [vmem:[#allocation4 + $0x23] sm:$0x1]  ;;  %v2595_v35 = vsel %vm2375_vm3, %v2594_v29, %v2586_v62  ;;  %v2446_v27 = vsel %vm2377_vm4, %v2444_v17, %v2445_v26  ;;  %v2617_v6 = vsel %vm2377_vm4, %v2615_v55, %v2616_v59  ;;  %v2637_v0 = vsel %vm2375_vm3, %v2636_v40, %v2628_v31 }
 0x4eb   : > { %2364 = vst.msk [vmem:[#allocation4 + $0x30] sm:$0xff] %vm1003_vm11, %v2356_v63  ;;  %v2567_v34 = vld [vmem:[#allocation4 + $0x29] sm:$0x1]  ;;  %v2425_v57 = vrot.slane %v2416_v52, 6  ;;  %v2403_v51 = vrot.slane %v2394_v53, 6  ;;  %v2447_v58 = vrot.slane %v4895_v36, 6  ;;  %v2596_v32 = vsel %vm2377_vm4, %v2594_v29, %v2595_v35 }
 0x4ec   : > { %2365 = vst.msk [vmem:[#allocation4 + $0x38] sm:$0xff] %vm1003_vm11, %v2357_v9  ;;  %v2576_v12 = vrot.slane %v2567_v34, 6  ;;  %v2609_v19 = vld [vmem:[#allocation4 + $0x2b] sm:$0x1]  ;;  %v2588_v1 = vld [vmem:[#allocation4 + $0x2a] sm:$0x1]  ;;  %v2489_v38 = vsel %vm2375_vm3, %v2488_v46, %v2480_v24 }
 0x4ed   : > { %v2426_v41 = vsel %vm2380_vm5, %v2425_v57, %v2424_v4  ;;  %v2404_v23 = vsel %vm2380_vm5, %v2403_v51, %v2402_v5  ;;  %v2618_v2 = vrot.slane %v2609_v19, 6  ;;  %v2597_v48 = vrot.slane %v2588_v1, 6  ;;  %v2630_v17 = vld [vmem:[#allocation4 + $0x2c] sm:$0x1]  ;;  %v4924_v42 = vld [vmem:[#allocation4 + $0x25] sm:$0x1] }
 0x4ee   : > { %v2577_v7 = vsel %vm2380_vm5, %v2576_v12, %v2575_v60  ;;  %v2427_v54 = vsel %vm2382_vm6, %v2425_v57, %v2426_v41  ;;  %v2405_v44 = vsel %vm2382_vm6, %v2403_v51, %v2404_v23  ;;  %v2460_v52 = vld [vmem:[#allocation4 + $0x24] sm:$0x1]  ;;  %v2448_v53 = vsel %vm2380_vm5, %v2447_v58, %v2446_v27  ;;  %v2502_v19 = vld [vmem:[#allocation4 + $0x6] sm:$0x1]  ;;  %v2670_v35 = vld [vmem:[#allocation4 + $0xe] sm:$0x1] }
 0x4ef   : > { %v2578_v18 = vsel %vm2382_vm6, %v2576_v12, %v2577_v7  ;;  %v2619_v8 = vsel %vm2380_vm5, %v2618_v2, %v2617_v6  ;;  %v2598_v43 = vsel %vm2380_vm5, %v2597_v48, %v2596_v32  ;;  %v2639_v34 = vrot.slane %v2630_v17, 6  ;;  %v4958_v36 = vld [vmem:[#allocation4 + $0x1f] sm:$0x1]  ;;  %v2672_v6 = vld [vmem:[#allocation4 + $0x2e] sm:$0x1] }
 0x4f0   : > { %v2467_v4 = vsel %vm2375_vm3, %v2466_v37, %v2458_v25  ;;  %v2620_v57 = vsel %vm2382_vm6, %v2618_v2, %v2619_v8  ;;  %v2599_v51 = vsel %vm2382_vm6, %v2597_v48, %v2598_v43  ;;  %v2638_v12 = vsel %vm2377_vm4, %v2636_v40, %v2637_v0  ;;  %v2504_v2 = vld [vmem:[#allocation4 + $0x26] sm:$0x1]  ;;  %v4963_v24 = vld [vmem:[#allocation4 + $0x17] sm:$0x1]  ;;  %v2649_v48 = vld [vmem:[#allocation4 + $0xd] sm:$0x1] }
 0x4f1   : > { %v2491_v5 = vrot.slane %v4924_v42, 6  ;;  %v2490_v41 = vsel %vm2377_vm4, %v2488_v46, %v2489_v38  ;;  %v2469_v1 = vrot.slane %v2460_v52, 6  ;;  %v2449_v7 = vsel %vm2382_vm6, %v2447_v58, %v2448_v53  ;;  %v2650_v46 = vld [vmem:[#allocation4 + $0x1d] sm:$0x1]  ;;  %v2547_v25 = vld [vmem:[#allocation4 + $0x18] sm:$0x1] }
 0x4f2   : > { %v2417_v21 = vld [vmem:[#allocation4 + $0x32] sm:$0x1]  ;;  %v2395_v50 = vld [vmem:[#allocation4 + $0x31] sm:$0x1]  ;;  %v2439_v9 = vld [vmem:[#allocation4 + $0x33] sm:$0x1]  ;;  %v2468_v40 = vsel %vm2377_vm4, %v2466_v37, %v2467_v4  ;;  %v2511_v22 = vsel %vm2375_vm3, %v2510_v20, %v2502_v19 }
 0x4f3   : > { %v2568_v39 = vld [vmem:[#allocation4 + $0x39] sm:$0x1]  ;;  %v2428_v33 = vrot.slane %v2417_v21, 5  ;;  %v2406_v14 = vrot.slane %v2395_v50, 5  ;;  %v2610_v15 = vld [vmem:[#allocation4 + $0x3b] sm:$0x1]  ;;  %v2640_v21 = vsel %vm2380_vm5, %v2639_v34, %v2638_v12  ;;  %v2492_v37 = vsel %vm2380_vm5, %v2491_v5, %v2490_v41 }
 0x4f4   : > { %v2579_v56 = vrot.slane %v2568_v39, 5  ;;  %v2589_v49 = vld [vmem:[#allocation4 + $0x3a] sm:$0x1]  ;;  %v2621_v11 = vrot.slane %v2610_v15, 5  ;;  %v2450_v29 = vrot.slane %v2439_v9, 5  ;;  %v2470_v39 = vsel %vm2380_vm5, %v2469_v1, %v2468_v40 }
 0x4f5   : > { %v2429_v10 = vsel %vm2385_vm7, %v2428_v33, %v2427_v54  ;;  %v2407_v63 = vsel %vm2385_vm7, %v2406_v14, %v2405_v44  ;;  %v2600_v55 = vrot.slane %v2589_v49, 5  ;;  %v2631_v60 = vld [vmem:[#allocation4 + $0x3c] sm:$0x1]  ;;  %v2483_v59 = vld [vmem:[#allocation4 + $0x35] sm:$0x1]  ;;  %v2512_v44 = vsel %vm2377_vm4, %v2510_v20, %v2511_v22 }
 0x4f6   : > { %v2580_v45 = vsel %vm2385_vm7, %v2579_v56, %v2578_v18  ;;  %v2430_v30 = vsel %vm2387_vm8, %v2428_v33, %v2429_v10  ;;  %v2408_v28 = vsel %vm2387_vm8, %v2406_v14, %v2407_v63  ;;  %v2622_v62 = vsel %vm2385_vm7, %v2621_v11, %v2620_v57  ;;  %v2461_v23 = vld [vmem:[#allocation4 + $0x34] sm:$0x1]  ;;  %v2367_v49 = vld [vmem:[#allocation4 + $0x10] sm:$0x1]  ;;  %v2651_v63 = vld [vmem:[#allocation4 + $0x2d] sm:$0x1] }
 0x4f7   : > { %v2581_v61 = vsel %vm2387_vm8, %v2579_v56, %v2580_v45  ;;  %2431 = vrot.lane.b32.xlu1 %v2430_v30, %s3312_s7  ;;  %2409 = vrot.lane.b32.xlu2 %v2408_v28, %s3313_s25  ;;  %v2601_v26 = vsel %vm2385_vm7, %v2600_v55, %v2599_v51  ;;  %v2451_v31 = vsel %vm2385_vm7, %v2450_v29, %v2449_v7  ;;  %v2642_v50 = vrot.slane %v2631_v60, 5  ;;  %v4986_v28 = vld [vmem:[#allocation4 + $0x36] sm:$0x1]  ;;  %v2673_v42 = vld [vmem:[#allocation4 + $0x3e] sm:$0x1] }
 0x4f8   : > { %2582 = vrot.lane.b32.xlu0 %v2581_v61, %s3313_s25  ;;  %v2623_v58 = vsel %vm2387_vm8, %v2621_v11, %v2622_v62  ;;  %v2602_v3 = vsel %vm2387_vm8, %v2600_v55, %v2601_v26  ;;  %v2494_v27 = vrot.slane %v2483_v59, 5  ;;  %v2472_v54 = vrot.slane %v2461_v23, 5  ;;  %v2691_v61 = vld [vmem:[#allocation4 + $0xf] sm:$0x1]  ;;  %v2366_v55 = vld [vmem:[#allocation4] sm:$0x1] }
 0x4f9   : > { %v2513_v33 = vrot.slane %v2504_v2, 6  ;;  %v2679_v14 = vsel %vm2375_vm3, %v2678_v47, %v2670_v35  ;;  %v2452_v18 = vsel %vm2387_vm8, %v2450_v29, %v2451_v31  ;;  %v2641_v56 = vsel %vm2382_vm6, %v2639_v34, %v2640_v21  ;;  %v2368_v38 = vld [vmem:[#allocation4 + $0x20] sm:$0x1]  ;;  %v2652_v53 = vld [vmem:[#allocation4 + $0x3d] sm:$0x1]  ;;  %s261_s25 = scalar_lea.vmem [#allocation10], %s2938_s14 }
 0x4fa   : > { %v2657_v15 = vrot.slane %v2650_v46, 7  ;;  %v2643_v32 = vsel %vm2385_vm7, %v2642_v50, %v2641_v56  ;;  %v2681_v10 = vrot.slane %v2672_v6, 6  ;;  %v2699_v9 = vrot.slane %v4958_v36, 7  ;;  %v2524_v34 = vld [vmem:[#allocation4 + $0x7] sm:$0x1] }
 0x4fb   : > { %v2532_v8 = vrot.slane %v4963_v24, 7  ;;  %v2493_v17 = vsel %vm2382_vm6, %v2491_v5, %v2492_v37  ;;  %v2471_v0 = vsel %vm2382_vm6, %v2469_v1, %v2470_v39  ;;  %v2680_v13 = vsel %vm2377_vm4, %v2678_v47, %v2679_v14  ;;  %v2369_v5 = vld [vmem:[#allocation4 + $0x30] sm:$0x1]  ;;  %v2546_v19 = vld [vmem:[#allocation4 + $0x8] sm:$0x1] }
 0x4fc   : > { %v2658_v20 = vsel %vm2375_vm3, %v2657_v15, %v2649_v48  ;;  %v2495_v45 = vsel %vm2385_vm7, %v2494_v27, %v2493_v17  ;;  %v2473_v30 = vsel %vm2385_vm7, %v2472_v54, %v2471_v0  ;;  %v2514_v11 = vsel %vm2380_vm5, %v2513_v33, %v2512_v44  ;;  %v2548_v1 = vld [vmem:[#allocation4 + $0x28] sm:$0x1]  ;;  %v2549_v35 = vld [vmem:[#allocation4 + $0x38] sm:$0x1]  ;;  %v2526_v31 = vld [vmem:[#allocation4 + $0x27] sm:$0x1] }
 0x4fd   : > { %v2660_v43 = vrot.slane %v2651_v63, 6  ;;  %v2374_v52 = vrot.slane %v2367_v49, 7  ;;  %v2644_v16 = vsel %vm2387_vm8, %v2642_v50, %v2643_v32  ;;  %v2682_v47 = vsel %vm2380_vm5, %v2681_v10, %v2680_v13  ;;  %v2527_v49 = vld [vmem:[#allocation4 + $0x37] sm:$0x1]  ;;  %v2694_v63 = vld [vmem:[#allocation4 + $0x3f] sm:$0x1] }
 0x4fe   : > { %v2659_v29 = vsel %vm2377_vm4, %v2657_v15, %v2658_v20  ;;  %v2554_v4 = vrot.slane %v2547_v25, 7  ;;  %v2496_v57 = vsel %vm2387_vm8, %v2494_v27, %v2495_v45  ;;  %v2474_v51 = vsel %vm2387_vm8, %v2472_v54, %v2473_v30 }
 0x4ff   : > { %2624 = vrot.lane.b32.xlu1 %v2623_v58, %s3314_s27  ;;  %2603 = vrot.lane.b32.xlu2 %v2602_v3, %s3312_s7  ;;  %v2515_v60 = vsel %vm2382_vm6, %v2513_v33, %v2514_v11  ;;  %v2516_v12 = vrot.slane %v4986_v28, 5  ;;  %v2684_v62 = vrot.slane %v2673_v42, 5  ;;  %v2700_v26 = vsel %vm2375_vm3, %v2699_v9, %v2691_v61  ;;  %v2693_v58 = vld [vmem:[#allocation4 + $0x2f] sm:$0x1]  ;;  %v2771_v61 = vld [vmem:[%s5092_s3] sm:$0xf]  ;;  %s2814_s7 = scalar_lea.hbm %s5093_s4, %s3041_s21 }
 0x500   : > { %2453 = vrot.lane.b32.xlu0 %v2452_v18, %s3314_s27  ;;  %v2376_v59 = vsel %vm2375_vm3, %v2374_v52, %v2366_v55  ;;  %v2379_v41 = vrot.slane %v2368_v38, 6  ;;  %v2683_v7 = vsel %vm2382_vm6, %v2681_v10, %v2682_v47  ;;  %v2661_v23 = vsel %vm2380_vm5, %v2660_v43, %v2659_v29  ;;  %s2816_s27 = sshll.u32 %s261_s25, 4  ;;  %s2817_s27 = int_to_ptr.vmem [resolvable:$true] %s2816_s27 }
 0x501   : > { %v2663_v40 = vrot.slane %v2652_v53, 5  ;;  %v2378_v2 = vsel %vm2377_vm4, %v2374_v52, %v2376_v59  ;;  %v2533_v21 = vsel %vm2375_vm3, %v2532_v8, %v2524_v34  ;;  %v2384_v22 = vrot.slane %v2369_v5, 5 }
 0x502   : > { %v2381_v50 = vsel %vm2380_vm5, %v2379_v41, %v2378_v2  ;;  %v2555_v46 = vsel %vm2375_vm3, %v2554_v4, %v2546_v19  ;;  %v2557_v27 = vrot.slane %v2548_v1, 6  ;;  %v2685_v6 = vsel %vm2385_vm7, %v2684_v62, %v2683_v7 }
 0x503   : > { %v2383_v3 = vsel %vm2382_vm6, %v2379_v41, %v2381_v50  ;;  %v2556_v37 = vsel %vm2377_vm4, %v2554_v4, %v2555_v46  ;;  %v2662_v39 = vsel %vm2382_vm6, %v2660_v43, %v2661_v23  ;;  %v2560_v33 = vrot.slane %v2549_v35, 5 }
 0x504   : > { %v2386_v54 = vsel %vm2385_vm7, %v2384_v22, %v2383_v3  ;;  %v2664_v14 = vsel %vm2385_vm7, %v2663_v40, %v2662_v39  ;;  %v2535_v48 = vrot.slane %v2526_v31, 6  ;;  %v2558_v56 = vsel %vm2380_vm5, %v2557_v27, %v2556_v37 }
 0x505   : > { %v2388_v18 = vsel %vm2387_vm8, %v2384_v22, %v2386_v54  ;;  %v2517_v44 = vsel %vm2385_vm7, %v2516_v12, %v2515_v60  ;;  %v2702_v15 = vrot.slane %v2693_v58, 6  ;;  %v2534_v32 = vsel %vm2377_vm4, %v2532_v8, %v2533_v21 }
 0x506   : > { %2391 = vst.msk [vmem:[#allocation5] sm:$0xf] %vm2390_vm9, %v2388_v18  ;;  %v2559_v10 = vsel %vm2382_vm6, %v2557_v27, %v2558_v56  ;;  %v2701_v17 = vsel %vm2377_vm4, %v2699_v9, %v2700_v26  ;;  %v2686_v13 = vsel %vm2387_vm8, %v2684_v62, %v2685_v6  ;;  %v2665_v20 = vsel %vm2387_vm8, %v2663_v40, %v2664_v14  ;;  %v2712_v26 = vld [vmem:[%s5091_s2] sm:$0xf] }
 0x507   : > { %2497 = vrot.lane.b32.xlu1 %v2496_v57, %s3315_s5  ;;  %2475 = vrot.lane.b32.xlu2 %v2474_v51, %s3316_s8  ;;  %v2561_v0 = vsel %vm2385_vm7, %v2560_v33, %v2559_v10  ;;  %v2518_v24 = vsel %vm2387_vm8, %v2516_v12, %v2517_v44  ;;  %v2536_v8 = vsel %vm2380_vm5, %v2535_v48, %v2534_v32  ;;  %v2538_v45 = vrot.slane %v2527_v49, 5 }
 0x508   : > { %2645 = vrot.lane.b32.xlu0 %v2644_v16, %s3316_s8  ;;  %v2562_v25 = vsel %vm2387_vm8, %v2560_v33, %v2561_v0  ;;  %v2703_v36 = vsel %vm2380_vm5, %v2702_v15, %v2701_v17  ;;  %v2705_v9 = vrot.slane %v2694_v63, 5  ;;  %v2537_v30 = vsel %vm2382_vm6, %v2535_v48, %v2536_v8 }
 0x509   : > { %2564 = vst.msk [vmem:[#allocation5 + $0x4] sm:$0xf] %vm2390_vm9, %v2562_v25  ;;  %v2704_v28 = vsel %vm2382_vm6, %v2702_v15, %v2703_v36  ;;  %v2539_v11 = vsel %vm2385_vm7, %v2538_v45, %v2537_v30  ;;  %vm2434_vm11 = vcmask 388352  }
 0x50a   : > { %v2706_v42 = vsel %vm2385_vm7, %v2705_v9, %v2704_v28  ;;  %v2540_v43 = vsel %vm2387_vm8, %v2538_v45, %v2539_v11 }
 0x50b   : > { %v2707_v55 = vsel %vm2387_vm8, %v2705_v9, %v2706_v42 }
 0x50f   : > { %2687 = vrot.lane.b32.xlu1 %v2686_v13, %s3317_s22  ;;  %2666 = vrot.lane.b32.xlu2 %v2665_v20, %s3315_s5  ;;  %s2818_s5 = sshll.u32 %s2814_s7, 4  ;;  %s2819_s5 = int_to_ptr.hbm [resolvable:$true] %s2818_s5 }
 0x510   : > { %2519 = vrot.lane.b32.xlu0 %v2518_v24, %s3317_s22  ;;  %s3221_s8 = sshra.s32 %s2819_s5, 4  ;;  %s3222_s8 = int_to_ptr.hbm [resolvable:$true] %s3221_s8 }
 0x511   : > { %s3223_s22 = scalar_lea.hbm %s3222_s8, 8  ;;  %p3228_p7 = scmp.lt.s32.totalorder %s3222_s8, %s5093_s4 }
 0x512   : > { %p3224_p4 = scmp.ne.s32.totalorder %s3222_s8, %s3223_s22 }
 0x514   : > { %p3225_p5 = pnand %p3224_p4, %p3395_p9 }
 0x516   : > { %p3226_p6 = pneg %p3225_p5 }
 0x517   : > { %2774 = vperm.xlu1 %3132, %v2771_v61   ;;  %2541 = vrot.lane.b32.xlu2 %v2540_v43, %s3318_s11 }
 0x518   : > { %2708 = vrot.lane.b32.xlu0 %v2707_v55, %s3318_s11  ;;  %s3227_s11 = scalar_lea.hbm %s5093_s4, 16 }
 0x519   : > { %p3229_p8 = scmp.lt.s32.totalorder %s3227_s11, %s3223_s22 }
 0x51b   : > { %p3230_p10 = por %p3229_p8, %p3228_p7 }
 0x51d   : > { %p3231_p13 = pnand %p3230_p10, %p3226_p6 }
 0x551   : > { %v2410_v38 = vpop.permute.xlu2 %2409 }
 0x552   : > { %2413 = vst.msk [vmem:[#allocation5] sm:$0xf] %vm2412_vm10, %v2410_v38 }
 0x559   : > { %v2604_v52 = vpop.permute.xlu2 %2603 }
 0x561   : > { %v2476_v53 = vpop.permute.xlu2 %2475 }
 0x569   : > { %v2432_v16 = vpop.permute.xlu1 %2431  ;;  %v2667_v4 = vpop.permute.xlu2 %2666 }
 0x56a   : > { %v2583_v47 = vpop.permute.xlu0 %2582  ;;  %2435 = vst.msk [vmem:[#allocation5] sm:$0xf] %vm2434_vm11, %v2432_v16 }
 0x56b   : > { %2585 = vst.msk [vmem:[#allocation5 + $0x4] sm:$0xf] %vm2412_vm10, %v2583_v47 }
 0x56c   : > { %2606 = vst.msk [vmem:[#allocation5 + $0x4] sm:$0xf] %vm2434_vm11, %v2604_v52 }
 0x571   : > { %v2625_v29 = vpop.permute.xlu1 %2624  ;;  %v2542_v5 = vpop.permute.xlu2 %2541 }
 0x572   : > { %v2454_v34 = vpop.permute.xlu0 %2453  ;;  %2627 = vst.msk [vmem:[#allocation5 + $0x4] sm:$0xf] %vm2456_vm12, %v2625_v29 }
 0x573   : > { %2457 = vst.msk [vmem:[#allocation5] sm:$0xf] %vm2456_vm12, %v2454_v34 }
 0x574   : > { %2479 = vst.msk [vmem:[#allocation5] sm:$0xf] %vm2478_vm13, %v2476_v53 }
 0x579   : > { %v2498_v57 = vpop.permute.xlu1 %2497 }
 0x57a   : > { %v2646_v51 = vpop.permute.xlu0 %2645  ;;  %2501 = vst.msk [vmem:[#allocation5] sm:$0xf] %vm2500_vm14, %v2498_v57 }
 0x57b   : > { %2648 = vst.msk [vmem:[#allocation5 + $0x4] sm:$0xf] %vm2478_vm13, %v2646_v51 }
 0x57c   : > { %2669 = vst.msk [vmem:[#allocation5 + $0x4] sm:$0xf] %vm2500_vm14, %v2667_v4 }
 0x581   : > { %v2688_v60 = vpop.permute.xlu1 %2687 }
 0x582   : > { %v2520_v12 = vpop.permute.xlu0 %2519  ;;  %2690 = vst.msk [vmem:[#allocation5 + $0x4] sm:$0xf] %vm2522_vm15, %v2688_v60 }
 0x583   : > { %2523 = vst.msk [vmem:[#allocation5] sm:$0xf] %vm2522_vm15, %v2520_v12 }
 0x584   : > { %2545 = vst.msk [vmem:[#allocation5] sm:$0xf] %vm2544_vm0, %v2542_v5 }
 0x589   : > { %v2775_v1 = vpop.permute.xlu1 %2774 }
 0x58a   : > { %v2709_v19 = vpop.permute.xlu0 %2708 }
 0x58b   : > { %2711 = vst.msk [vmem:[#allocation5 + $0x4] sm:$0xf] %vm2544_vm0, %v2709_v19 }
 0x592   : > { %v2713_v62 = vld [vmem:[#allocation5] sm:$0xff] }
 0x593   : > { %2715 = vst [vmem:[#allocation1] ss:$2 sm:$0xff] %v2713_v62 }
 0x59a   : > { %v2716_v59 = vld.sshfl [vmem:[#allocation1] sm:$0xff pattern:$0x75316420]  ;;  %v2717_v41 = vld.sshfl [vmem:[#allocation1 + $0x8] sm:$0xff pattern:$0x75316420] }
 0x59b   : > { %3031 = vmatpush.msk.msra.mxu0 %vm2722_vm1, %v2716_v59  ;;  %3033 = vmatpush.msk.msra.mxu1 %vm2722_vm1, %v2717_v41 }
 0x59c   : > { %3032 = vmatmul.msk.f32.vlgmr.msra.gmra.mxu0 %vm2718_vm2, %v2712_v26  ;;  %3034 = vmatmul.msk.f32.vlgmr.msra.gmra.mxu1 %vm2718_vm2, %v2712_v26 }
 0x619   : > { %v2744_v7 = vpop.f32.mrf.mxu0  ;;  %v2764_v23 = vpop.f32.mrf.mxu1 }
 0x61a   : > { %v2778_v40 = vadd.f32 %v2775_v1, %v2764_v23  ;;  %v2777_v2 = vadd.f32 %v2775_v1, %v2744_v7 }
 0x61c   : > { %v2781_v35 = vrot.slane %v2778_v40, 4 }
 0x61e   : > { %v2782_v31 = vsel %vm2722_vm1, %v2777_v2, %v2781_v35 }
 0x61f   : > { %2801 = vst [vmem:[%s261_s25] sm:$0xff] %v2782_v31 }
 0x620   : > { %3234 = shalt.err (!%p3231_p13)
}
 0x621   : > { %3044 = dma.vmem_to_hbm [thread:$0]  (%p3395_p9), %s2817_s27, 128, %s2819_s5, %s2803_s18  }
 0x622 PF: > { %s2830_s24 = sand.u32 1, %s3269_s15   ;;  %p3051_p0 = pnand %p2932_p12, %p3402_p11 }
 0x623   : > { %s2831_s14 = scalar_lea.sflag [#allocation9], %s2830_s24 }
 0x624   : > { %p3052_p1 = pneg %p3051_p0 }
 0x626   : > { %3264 = dma.done.wait (%p3052_p1), %s2831_s14, 128  }
 0x627   : > { %3266 = vsyncadd (%p3052_p1), %s2831_s14, 4294967168  ;;  %s20_s20 = sadd.s32 1, %s3289_s20   ;;  %s5223_s15 = smov %s3273_s16 }
 0x628   : > { %p17_p2 = scmp.ge.s32.totalorder %s20_s20, 4   ;;  %s5224_s16 = smov %s3277_s17 }
 0x629   : > { %s5225_s17 = smov %s3400_s29  ;;  %s5226_s18 = smov %s3285_s19 }
 0x62a   : > { %s5227_s19 = smov %s5229_s23  ;;  %19 = sbr.rel (!%p17_p2) target bundleno = 6 (0x6), region = 116 }
 0x62f   :  { %2837 = vsyncpa [#allocation8], 1 }
 0x630   :  { %2839 = vsyncpa [#allocation8 + $0x1], 1 }
 0x631   :  { %2840 = vsyncpa [#allocation9], 1 }
 0x632   :  { %2842 = vsyncpa [#allocation9 + $0x1], 1 }

</bundles_post_ra>
